<compile_context>
chip_gen: v7x
topology: tpu7x:2x2x1
jax: 0.10.0
libtpu: 0.0.40
codegen_flags: <defaults>
</compile_context>

<pallas_src>
import functools

import jax
import jax.numpy as jnp
from jax import lax
from jax.experimental import pallas as pl
from jax.experimental.pallas import tpu as pltpu

_EPS = 1e-5


def _round_up(a, m):
    return (a + m - 1) // m * m


def _vmem_limit_bytes():
    # Generation-aware scoped-VMEM limit: ~80 MiB on v5e/v6e (128 MiB physical),
    # ~40 MiB on v7x (64 MiB physical); conservative 32 MiB fallback.
    try:
        info = pltpu.get_tpu_info()
        cap = getattr(info, "vmem_capacity_bytes", None) or getattr(info, "vmem_bytes", None)
        if cap:
            return int(min(100 * 2**20, max(32 * 2**20, int(cap) * 5 // 8)))
    except Exception:
        pass
    return 32 * 2**20


def _use_mxu_path(cp, cop):
    # Small channel counts skip the MXU (f32 VPU FMAs, no bf16 round-trip).
    return cp > 16 or cop > 16


# ---------------------------------------------------------------------------
# In-kernel math helpers
# ---------------------------------------------------------------------------
def _erf_f32(x):
    # Abramowitz & Stegun 7.1.26, |err| <= 1.5e-7; mul/add/exp only.
    a1, a2, a3, a4, a5 = 0.254829592, -0.284496736, 1.421413741, -1.453152027, 1.061405429
    p = 0.3275911
    sgn = jnp.where(x >= 0.0, 1.0, -1.0)
    ax = jnp.abs(x)
    t = 1.0 / (1.0 + p * ax)
    poly = ((((a5 * t + a4) * t + a3) * t + a2) * t + a1) * t
    return sgn * (1.0 - poly * jnp.exp(-ax * ax))


def _gelu_exact(x):
    # PyTorch nn.GELU() default ('none'): 0.5*x*(1+erf(x/sqrt(2)))
    return 0.5 * x * (1.0 + _erf_f32(x * 0.7071067811865476))


def _taps(w):
    """(lane offset, column-wrap mask row) for the 9 taps on the row-padded slab.

    Image row i lives at slab row i+2 (two zero rows above/below), so tap
    (dy', dx') of output column n = i*W + j sits at slab column
    n + (dy'+1)*W + (dx'-1).  dx' = 0 / 2 taps can wrap across a row boundary
    and are masked with the "not last column" / "not first column" rows.
    """
    taps = []
    for dy in range(3):
        for dx in range(3):
            off = (dy + 1) * w + (dx - 1)
            mrow = {0: 1, 1: None, 2: 2}[dx]
            taps.append((off, mrow))
    return taps


# ---------------------------------------------------------------------------
# Pass A: per-image partial sums for BN0 (pre-norm) and BN1 (post-dw-conv)
#   x_ref : (Cp, slab_len) row-padded, lane-padded slab of one (shifted) image
#   m_ref : (8, slab_len)  rows 0..2 = [inside-image, not-last-col, not-first-col]
#   w_ref : (Cp, 9)        depthwise 3x3 weights (tap-minor)
#   st_ref: (Cp, 8)        [sum x, sum x^2, sum u, sum u^2, sum u*mw, 0, 0, 0]
# where u = dwconv(zero-padded shifted x), mw = dwconv(padding validity mask).
# ---------------------------------------------------------------------------
def _stats_kernel(x_ref, m_ref, w_ref, st_ref, *, hw, lo, taps):
    f32 = jnp.float32
    cp = x_ref.shape[0]
    u = jnp.zeros((cp, lo), f32)
    mw = jnp.zeros((cp, lo), f32)
    for k, (off, mrow) in enumerate(taps):
        wk = w_ref[:, k:k + 1]                      # (Cp, 1)
        xk = x_ref[:, off:off + lo]                 # (Cp, lo)
        mk = m_ref[0:1, off:off + lo]               # inside-image  -> (1, lo)
        if mrow is not None:                        # column-wrap fix-up
            cm = m_ref[mrow:mrow + 1, off:off + lo]
            xk = xk * cm
            mk = mk * cm
        u = u + wk * xk
        mw = mw + wk * mk
    valid = (lax.broadcasted_iota(jnp.int32, (1, lo), 1) < hw).astype(f32)
    uv = u * valid
    x = x_ref[...]
    rsum = lambda t: jnp.sum(t, axis=1, keepdims=True)
    st_ref[:, 0:1] = rsum(x)            # shifted-x padding is exactly 0 -> exact
    st_ref[:, 1:2] = rsum(x * x)
    st_ref[:, 2:3] = rsum(uv)
    st_ref[:, 3:4] = rsum(uv * u)
    st_ref[:, 4:5] = rsum(uv * mw)
    st_ref[:, 5:8] = jnp.zeros((cp, 3), f32)


# ---------------------------------------------------------------------------
# Pass B: (BN0 -> depthwise 3x3 -> BN1) folded into per-channel tap weights,
#         then GELU -> 1x1 conv, and the per-image sums needed for BN2.
#   wp_ref: (Cp, 19) = [wu (9) | wm (9) | c1 (1)]
# ---------------------------------------------------------------------------
def _apply_kernel(x_ref, m_ref, wp_ref, pw_ref, z_ref, zst_ref, *,
                  hw, lo, taps, use_mxu):
    f32 = jnp.float32
    cp = x_ref.shape[0]
    cop = z_ref.shape[0]
    y = jnp.zeros((cp, lo), f32)
    for k, (off, mrow) in enumerate(taps):
        xk = x_ref[:, off:off + lo]
        mk = m_ref[0:1, off:off + lo]
        if mrow is not None:
            cm = m_ref[mrow:mrow + 1, off:off + lo]
            xk = xk * cm
            mk = mk * cm
        y = y + wp_ref[:, k:k + 1] * xk + wp_ref[:, 9 + k:10 + k] * mk
    y = y + wp_ref[:, 18:19]                               # + c1 (BN1 bias)
    t = _gelu_exact(y)
    if use_mxu:
        z = jnp.dot(pw_ref[...], t.astype(jnp.bfloat16),
                    preferred_element_type=jnp.float32)    # (Cop, lo)
    else:
        pw = pw_ref[...]                                   # f32, tiny
        z = jnp.zeros((cop, lo), f32)
        for ci in range(cp):
            z = z + pw[:, ci:ci + 1] * t[ci:ci + 1, :]
    z_ref[...] = z
    valid = (lax.broadcasted_iota(jnp.int32, (1, lo), 1) < hw).astype(f32)
    zv = z * valid
    zst_ref[:, 0:1] = jnp.sum(zv, axis=1, keepdims=True)
    zst_ref[:, 1:2] = jnp.sum(zv * z, axis=1, keepdims=True)
    zst_ref[:, 2:8] = jnp.zeros((cop, 6), f32)


# ---------------------------------------------------------------------------
# Pass C: BN2 + shared PReLU, large lane-dense tiles, output already (B, Cop, L)
# ---------------------------------------------------------------------------
def _finalize_kernel(z_ref, sc_ref, a_ref, o_ref):
    a = a_ref[0, 0]                                        # PReLU slope (SMEM)
    z = sc_ref[:, 0:1] * z_ref[...] + sc_ref[:, 1:2]
    o_ref[...] = jnp.where(z >= 0.0, z, a * z)


# ---------------------------------------------------------------------------
# One MBConv branch (+ trailing shared PReLU)
# ---------------------------------------------------------------------------
def _mbconv_prelu(x, p, prelu_a):
    """x: (B, C, H, W) f32 -> (B, Co, H, W) f32."""
    b, c, h, w = x.shape
    co = p["w_pw"].shape[0]
    cp = _round_up(max(c, 8), 8)
    cop = _round_up(max(co, 8), 8)
    hw = h * w
    out_len = _round_up(hw, 128)                                   # lanes / image (output)
    slab_len = _round_up(max((h + 4) * w, out_len + 3 * w + 2), 128)
    n = jnp.float32(b * hw)
    taps = _taps(w)
    use_mxu = _use_mxu_path(cp, cop)
    vmem_limit = _vmem_limit_bytes()

    # --- coarse per-channel shift (stabilises one-pass BN statistics)
    mu_hat = jnp.mean(x[:, :, ::4, ::4], axis=(0, 2, 3))           # (C,)
    mu_hat_p = jnp.pad(mu_hat, (0, cp - c))

    # --- input slab in (B, Cp, slab_len): 2 zero rows above/below each image,
    #     channel & lane padded; the shift is folded into the same copy.
    xs = x - mu_hat.reshape(1, c, 1, 1)
    xp = jnp.pad(xs, ((0, 0), (0, 0), (2, 2), (0, 0)))
    xp = xp.reshape(b, c, (h + 4) * w)
    slab = jnp.pad(xp, ((0, 0), (0, cp - c), (0, slab_len - (h + 4) * w)))

    # --- tiny channel-invariant masks in slab coordinates
    f = jnp.arange(slab_len, dtype=jnp.int32)
    col = f % w
    masks = jnp.zeros((8, slab_len), jnp.float32)
    masks = masks.at[0].set(((f >= 2 * w) & (f < 2 * w + hw)).astype(jnp.float32))
    masks = masks.at[1].set((col != w - 1).astype(jnp.float32))
    masks = masks.at[2].set((col != 0).astype(jnp.float32))

    # --- weights / BN affine params, channel padded
    wdw = jnp.pad(p["w_dw"].reshape(c, 9), ((0, cp - c), (0, 0)))
    pw_dtype = jnp.bfloat16 if use_mxu else jnp.float32
    wpw = jnp.pad(p["w_pw"], ((0, cop - co), (0, cp - c))).astype(pw_dtype)
    pad1 = lambda v, m: jnp.pad(v, (0, m - v.shape[0]), constant_values=1.0)
    pad0 = lambda v, m: jnp.pad(v, (0, m - v.shape[0]))
    g0, b0 = pad1(p["g0"], cp), pad0(p["b0"], cp)
    g1, b1 = pad1(p["g1"], cp), pad0(p["b1"], cp)
    g2, b2 = pad1(p["g2"], cop), pad0(p["b2"], cop)

    cparams = pltpu.CompilerParams(dimension_semantics=("parallel",),
                                   vmem_limit_bytes=vmem_limit)

    # ---- pass A: partial sums ------------------------------------------------
    stats = pl.pallas_call(
        functools.partial(_stats_kernel, hw=hw, lo=out_len, taps=taps),
        out_shape=jax.ShapeDtypeStruct((b, cp, 8), jnp.float32),
        grid=(b,),
        in_specs=[pl.BlockSpec((None, cp, slab_len), lambda i: (i, 0, 0)),
                  pl.BlockSpec((8, slab_len), lambda i: (0, 0)),
                  pl.BlockSpec((cp, 9), lambda i: (0, 0))],
        out_specs=pl.BlockSpec((None, cp, 8), lambda i: (i, 0, 0)),
        compiler_params=cparams,
        cost_estimate=pl.CostEstimate(
            flops=int(b * cp * out_len * 30), transcendentals=0,
            bytes_accessed=int(4 * (b * cp * slab_len + 8 * slab_len + cp * 9))),
    )(slab, masks, wdw)

    # mask-only sums (smw, smww) via a 9x9 mask Gram matrix (host-side, tiny)
    valid_out = (jnp.arange(out_len) < hw).astype(jnp.float32)
    meff = []
    for off, mrow in taps:
        mk = masks[0, off:off + out_len]
        if mrow is not None:
            mk = mk * masks[mrow, off:off + out_len]
        meff.append(mk * valid_out)
    mm = jnp.stack(meff)                               # (9, out_len)
    sm_taps = jnp.sum(mm, axis=1)                      # (9,)
    gram = mm @ mm.T                                   # (9, 9)
    smw = b * (wdw @ sm_taps)                          # (Cp,)
    smww = b * jnp.einsum("ck,kj,cj->c", wdw, gram, wdw)

    st = jnp.sum(stats, axis=0)                        # (Cp, 8)
    sx, sxx, su, suu, sumw = st[:, 0], st[:, 1], st[:, 2], st[:, 3], st[:, 4]

    # BN0 (batch stats of the raw input), via shifted sums (exact in algebra).
    mu0s = sx / n
    var0 = jnp.maximum(sxx / n - mu0s * mu0s, 0.0)
    s0 = g0 * lax.rsqrt(var0 + _EPS)
    c0 = b0 - (mu_hat_p + mu0s) * s0
    c0p = c0 + s0 * mu_hat_p                           # constant seen by shifted slab
    # BN1 (batch stats of the depthwise output) derived analytically from
    # y = s0 * u + c0' * mw  (u = dwconv(shifted x), mw = dwconv(padding mask)).
    sy = s0 * su + c0p * smw
    syy = s0 * s0 * suu + 2.0 * s0 * c0p * sumw + c0p * c0p * smww
    mu1 = sy / n
    var1 = jnp.maximum(syy / n - mu1 * mu1, 0.0)
    s1 = g1 * lax.rsqrt(var1 + _EPS)
    c1 = b1 - mu1 * s1

    # Fold BN0+BN1 into the depthwise weights (no BN0'd slab materialization).
    wu = (s1 * s0)[:, None] * wdw                      # (Cp, 9) data taps
    wm = (s1 * c0p)[:, None] * wdw                     # (Cp, 9) padding-mask taps
    wpack = jnp.concatenate([wu, wm, c1[:, None]], axis=1)   # (Cp, 19)

    # ---- pass B: fused dw-conv + BN1 + GELU + 1x1 conv, emit BN2 sums ---------
    z, zst = pl.pallas_call(
        functools.partial(_apply_kernel, hw=hw, lo=out_len, taps=taps,
                          use_mxu=use_mxu),
        out_shape=(jax.ShapeDtypeStruct((b, cop, out_len), jnp.float32),
                   jax.ShapeDtypeStruct((b, cop, 8), jnp.float32)),
        grid=(b,),
        in_specs=[pl.BlockSpec((None, cp, slab_len), lambda i: (i, 0, 0)),
                  pl.BlockSpec((8, slab_len), lambda i: (0, 0)),
                  pl.BlockSpec((cp, 19), lambda i: (0, 0)),
                  pl.BlockSpec((cop, cp), lambda i: (0, 0))],
        out_specs=(pl.BlockSpec((None, cop, out_len), lambda i: (i, 0, 0)),
                   pl.BlockSpec((None, cop, 8), lambda i: (i, 0, 0))),
        compiler_params=cparams,
        cost_estimate=pl.CostEstimate(
            flops=int(b * out_len * (cp * 40 + 2 * cp * cop)),
            transcendentals=int(b * cp * out_len),
            bytes_accessed=int(4 * (b * cp * slab_len + b * cop * out_len))),
    )(slab, masks, wpack, wpw)

    # BN2 (batch stats of the 1x1-conv output).
    zs = jnp.sum(zst, axis=0)
    mu2 = zs[:, 0] / n
    var2 = jnp.maximum(zs[:, 1] / n - mu2 * mu2, 0.0)
    s2 = g2 * lax.rsqrt(var2 + _EPS)
    c2 = b2 - mu2 * s2
    sc2 = jnp.stack([s2, c2], axis=1)                  # (Cop, 2)

    # ---- pass C: BN2 + shared PReLU, output directly in (B, Cop, L) -----------
    tile = min(out_len, 2048)
    nt = pl.cdiv(out_len, tile)
    out3d = pl.pallas_call(
        _finalize_kernel,
        out_shape=jax.ShapeDtypeStruct((b, cop, out_len), jnp.float32),
        grid=(b, nt),
        in_specs=[pl.BlockSpec((None, cop, tile), lambda i, j: (i, 0, j)),
                  pl.BlockSpec((cop, 2), lambda i, j: (0, 0)),
                  pl.BlockSpec(memory_space=pltpu.MemorySpace.SMEM)],
        out_specs=pl.BlockSpec((None, cop, tile), lambda i, j: (i, 0, j)),
        compiler_params=pltpu.CompilerParams(
            dimension_semantics=("parallel", "parallel"),
            vmem_limit_bytes=vmem_limit),
        cost_estimate=pl.CostEstimate(
            flops=int(3 * b * cop * out_len), transcendentals=0,
            bytes_accessed=int(8 * b * cop * out_len)),
    )(z, sc2, jnp.full((1, 1), prelu_a, jnp.float32))

    return out3d[:, :co, :hw].reshape(b, co, h, w)


# ---------------------------------------------------------------------------
# Glue (plain JAX): avg-pool, parameter init, top-level forward
# ---------------------------------------------------------------------------
def _avgpool2x2(x):
    # nn.AvgPool2d(kernel_size=2, stride=2); floors odd spatial dims like torch.
    b, c, h, w = x.shape
    x = x[:, :, : (h // 2) * 2, : (w // 2) * 2]
    return x.reshape(b, c, h // 2, 2, w // 2, 2).mean(axis=(3, 5))


def init_mbconv_params(key, c_in, c_out):
    k1, k2 = jax.random.split(key)
    bd = 1.0 / 3.0                      # kaiming-uniform bound, fan_in = 1*3*3
    w_dw = jax.random.uniform(k1, (c_in, 3, 3), jnp.float32, -bd, bd)
    bp = 1.0 / (c_in ** 0.5)            # fan_in = c_in*1*1
    w_pw = jax.random.uniform(k2, (c_out, c_in), jnp.float32, -bp, bp)
    ones = lambda m: jnp.ones((m,), jnp.float32)
    zeros = lambda m: jnp.zeros((m,), jnp.float32)
    return dict(w_dw=w_dw, w_pw=w_pw,
                g0=ones(c_in), b0=zeros(c_in),
                g1=ones(c_in), b1=zeros(c_in),
                g2=ones(c_out), b2=zeros(c_out))


def init_first_octave_conv_params(key, in_nc, out_nc, alpha=0.5):
    k1, k2 = jax.random.split(key)
    c_low = int(alpha * out_nc)
    c_high = out_nc - c_low
    return dict(h2h=init_mbconv_params(k1, in_nc, c_high),
                h2l=init_mbconv_params(k2, in_nc, c_low),
                prelu_a=0.25)           # nn.PReLU() default init


@jax.jit
def first_octave_conv(x, params):
    """FirstOctaveConv.forward (stride=1, norm_type=None, act='prelu')."""
    x_h = _mbconv_prelu(x, params["h2h"], params["prelu_a"])
    x_l = _mbconv_prelu(_avgpool2x2(x), params["h2l"], params["prelu_a"])
    return x_h, x_l


# ---------------------------------------------------------------------------
# Pure-JAX reference (mirrors the kernel's shape-conditional 1x1-conv dtype;
# everything else in f32 exactly like PyTorch training-mode forward).
# ---------------------------------------------------------------------------
def _ref_mbconv_prelu(x, p, a):
    c = x.shape[1]
    co = p["w_pw"].shape[0]
    use_mxu = _use_mxu_path(_round_up(max(c, 8), 8), _round_up(max(co, 8), 8))
    rs = lambda v: v.reshape(1, -1, 1, 1)
    mu0 = x.mean((0, 2, 3), keepdims=True)
    var0 = x.var((0, 2, 3), keepdims=True)
    xn = (x - mu0) * lax.rsqrt(var0 + _EPS) * rs(p["g0"]) + rs(p["b0"])
    y = lax.conv_general_dilated(xn, p["w_dw"].reshape(c, 1, 3, 3), (1, 1),
                                 ((1, 1), (1, 1)),
                                 dimension_numbers=("NCHW", "OIHW", "NCHW"),
                                 feature_group_count=c)
    mu1 = y.mean((0, 2, 3), keepdims=True)
    var1 = y.var((0, 2, 3), keepdims=True)
    y = (y - mu1) * lax.rsqrt(var1 + _EPS) * rs(p["g1"]) + rs(p["b1"])
    t = 0.5 * y * (1.0 + lax.erf(y * 0.7071067811865476))
    if use_mxu:
        t = t.astype(jnp.bfloat16).astype(jnp.float32)
        wpw = p["w_pw"].astype(jnp.bfloat16).astype(jnp.float32)
    else:
        wpw = p["w_pw"]
    z = jnp.einsum("oc,bchw->bohw", wpw, t, precision=lax.Precision.HIGHEST)
    mu2 = z.mean((0, 2, 3), keepdims=True)
    var2 = z.var((0, 2, 3), keepdims=True)
    z = (z - mu2) * lax.rsqrt(var2 + _EPS) * rs(p["g2"]) + rs(p["b2"])
    return jnp.where(z >= 0.0, z, a * z)


def _ref_first_octave(x, params):
    a = params["prelu_a"]
    return (_ref_mbconv_prelu(x, params["h2h"], a),
            _ref_mbconv_prelu(_avgpool2x2(x), params["h2l"], a))


if __name__ == "__main__":
    key = jax.random.PRNGKey(0)
    k_x, k_p = jax.random.split(key)

    B, in_nc, H, W = 2, 4, 16, 16
    out_nc, alpha = 8, 0.5

    x = jax.random.normal(k_x, (B, in_nc, H, W), jnp.float32)   # NCHW like torch
    params = init_first_octave_conv_params(k_p, in_nc, out_nc, alpha)

    x_h, x_l = first_octave_conv(x, params)
    jax.block_until_ready(x_h)
    jax.block_until_ready(x_l)

    c_low = int(alpha * out_nc)
    assert x_h.shape == (B, out_nc - c_low, H, W)
    assert x_l.shape == (B, c_low, H // 2, W // 2)

    # correctness check against a pure-JAX implementation of the same forward
    r_h, r_l = _ref_first_octave(x, params)
    err_h = float(jnp.max(jnp.abs(x_h - r_h)))
    err_l = float(jnp.max(jnp.abs(x_l - r_l)))
    assert err_h < 1e-2 and err_l < 1e-2, (err_h, err_l)

    print("KERNEL_OK")
</pallas_src>

<mosaic_0001>
module attributes {stable_mosaic.version = 11 : i64} {
  func.func @_stats_kernel(%arg0: i32, %arg1: memref<1x8x256xf32, #tpu.memory_space<vmem>>, %arg2: memref<8x256xf32, #tpu.memory_space<vmem>>, %arg3: memref<8x9xf32, #tpu.memory_space<vmem>>, %arg4: memref<1x8x8xf32, #tpu.memory_space<vmem>>) attributes {dimension_semantics = [#tpu.dimension_semantics<parallel>], iteration_bounds = array<i64: 2>, scalar_prefetch = 0 : i64, scratch_operands = 0 : i64, tpu.core_type = #tpu.core_type<tc>, window_params = [{transform_indices = @transform_0, window_bounds = array<i64: 1, 8, 256>}, {pipeline_mode = #tpu.pipeline_mode<synchronous>, transform_indices = @transform_1, window_bounds = array<i64: 8, 256>}, {pipeline_mode = #tpu.pipeline_mode<synchronous>, transform_indices = @transform_2, window_bounds = array<i64: 8, 9>}, {transform_indices = @transform_3, window_bounds = array<i64: 1, 8, 8>}]} {
    %cst = arith.constant 0.000000e+00 : f32
    %0 = vector.broadcast %cst : f32 to vector<8x128xf32>
    %cst_0 = arith.constant 0.000000e+00 : f32
    %1 = vector.broadcast %cst_0 : f32 to vector<8x128xf32>
    %c0 = arith.constant 0 : index
    %c0_1 = arith.constant 0 : index
    %2 = vector.load %arg3[%c0, %c0_1] : memref<8x9xf32, #tpu.memory_space<vmem>>, vector<8x1xf32>
    %c0_2 = arith.constant 0 : index
    %c0_3 = arith.constant 0 : index
    %c7 = arith.constant 7 : index
    %3 = vector.load %arg1[%c0_2, %c0_3, %c7] : memref<1x8x256xf32, #tpu.memory_space<vmem>>, vector<1x8x128xf32>
    %4 = vector.shape_cast %3 : vector<1x8x128xf32> to vector<8x128xf32>
    %c0_4 = arith.constant 0 : index
    %c7_5 = arith.constant 7 : index
    %5 = vector.load %arg2[%c0_4, %c7_5] : memref<8x256xf32, #tpu.memory_space<vmem>>, vector<1x128xf32>
    %c1 = arith.constant 1 : index
    %c7_6 = arith.constant 7 : index
    %6 = vector.load %arg2[%c1, %c7_6] : memref<8x256xf32, #tpu.memory_space<vmem>>, vector<1x128xf32>
    %7 = vector.broadcast %6 : vector<1x128xf32> to vector<8x128xf32>
    %8 = arith.mulf %4, %7 : vector<8x128xf32>
    %9 = arith.mulf %5, %6 : vector<1x128xf32>
    %10 = vector.broadcast %2 : vector<8x1xf32> to vector<8x128xf32>
    %11 = arith.mulf %10, %8 : vector<8x128xf32>
    %12 = arith.addf %0, %11 : vector<8x128xf32>
    %13 = vector.broadcast %2 : vector<8x1xf32> to vector<8x128xf32>
    %14 = vector.broadcast %9 : vector<1x128xf32> to vector<8x128xf32>
    %15 = arith.mulf %13, %14 : vector<8x128xf32>
    %16 = arith.addf %1, %15 : vector<8x128xf32>
    %c0_7 = arith.constant 0 : index
    %c1_8 = arith.constant 1 : index
    %17 = vector.load %arg3[%c0_7, %c1_8] : memref<8x9xf32, #tpu.memory_space<vmem>>, vector<8x1xf32>
    %c0_9 = arith.constant 0 : index
    %c0_10 = arith.constant 0 : index
    %c8 = arith.constant 8 : index
    %18 = vector.load %arg1[%c0_9, %c0_10, %c8] : memref<1x8x256xf32, #tpu.memory_space<vmem>>, vector<1x8x128xf32>
    %19 = vector.shape_cast %18 : vector<1x8x128xf32> to vector<8x128xf32>
    %c0_11 = arith.constant 0 : index
    %c8_12 = arith.constant 8 : index
    %20 = vector.load %arg2[%c0_11, %c8_12] : memref<8x256xf32, #tpu.memory_space<vmem>>, vector<1x128xf32>
    %21 = vector.broadcast %17 : vector<8x1xf32> to vector<8x128xf32>
    %22 = arith.mulf %21, %19 : vector<8x128xf32>
    %23 = arith.addf %12, %22 : vector<8x128xf32>
    %24 = vector.broadcast %17 : vector<8x1xf32> to vector<8x128xf32>
    %25 = vector.broadcast %20 : vector<1x128xf32> to vector<8x128xf32>
    %26 = arith.mulf %24, %25 : vector<8x128xf32>
    %27 = arith.addf %16, %26 : vector<8x128xf32>
    %c0_13 = arith.constant 0 : index
    %c2 = arith.constant 2 : index
    %28 = vector.load %arg3[%c0_13, %c2] : memref<8x9xf32, #tpu.memory_space<vmem>>, vector<8x1xf32>
    %c0_14 = arith.constant 0 : index
    %c0_15 = arith.constant 0 : index
    %c9 = arith.constant 9 : index
    %29 = vector.load %arg1[%c0_14, %c0_15, %c9] : memref<1x8x256xf32, #tpu.memory_space<vmem>>, vector<1x8x128xf32>
    %30 = vector.shape_cast %29 : vector<1x8x128xf32> to vector<8x128xf32>
    %c0_16 = arith.constant 0 : index
    %c9_17 = arith.constant 9 : index
    %31 = vector.load %arg2[%c0_16, %c9_17] : memref<8x256xf32, #tpu.memory_space<vmem>>, vector<1x128xf32>
    %c2_18 = arith.constant 2 : index
    %c9_19 = arith.constant 9 : index
    %32 = vector.load %arg2[%c2_18, %c9_19] : memref<8x256xf32, #tpu.memory_space<vmem>>, vector<1x128xf32>
    %33 = vector.broadcast %32 : vector<1x128xf32> to vector<8x128xf32>
    %34 = arith.mulf %30, %33 : vector<8x128xf32>
    %35 = arith.mulf %31, %32 : vector<1x128xf32>
    %36 = vector.broadcast %28 : vector<8x1xf32> to vector<8x128xf32>
    %37 = arith.mulf %36, %34 : vector<8x128xf32>
    %38 = arith.addf %23, %37 : vector<8x128xf32>
    %39 = vector.broadcast %28 : vector<8x1xf32> to vector<8x128xf32>
    %40 = vector.broadcast %35 : vector<1x128xf32> to vector<8x128xf32>
    %41 = arith.mulf %39, %40 : vector<8x128xf32>
    %42 = arith.addf %27, %41 : vector<8x128xf32>
    %c0_20 = arith.constant 0 : index
    %c3 = arith.constant 3 : index
    %43 = vector.load %arg3[%c0_20, %c3] : memref<8x9xf32, #tpu.memory_space<vmem>>, vector<8x1xf32>
    %c0_21 = arith.constant 0 : index
    %c0_22 = arith.constant 0 : index
    %c15 = arith.constant 15 : index
    %44 = vector.load %arg1[%c0_21, %c0_22, %c15] : memref<1x8x256xf32, #tpu.memory_space<vmem>>, vector<1x8x128xf32>
    %45 = vector.shape_cast %44 : vector<1x8x128xf32> to vector<8x128xf32>
    %c0_23 = arith.constant 0 : index
    %c15_24 = arith.constant 15 : index
    %46 = vector.load %arg2[%c0_23, %c15_24] : memref<8x256xf32, #tpu.memory_space<vmem>>, vector<1x128xf32>
    %c1_25 = arith.constant 1 : index
    %c15_26 = arith.constant 15 : index
    %47 = vector.load %arg2[%c1_25, %c15_26] : memref<8x256xf32, #tpu.memory_space<vmem>>, vector<1x128xf32>
    %48 = vector.broadcast %47 : vector<1x128xf32> to vector<8x128xf32>
    %49 = arith.mulf %45, %48 : vector<8x128xf32>
    %50 = arith.mulf %46, %47 : vector<1x128xf32>
    %51 = vector.broadcast %43 : vector<8x1xf32> to vector<8x128xf32>
    %52 = arith.mulf %51, %49 : vector<8x128xf32>
    %53 = arith.addf %38, %52 : vector<8x128xf32>
    %54 = vector.broadcast %43 : vector<8x1xf32> to vector<8x128xf32>
    %55 = vector.broadcast %50 : vector<1x128xf32> to vector<8x128xf32>
    %56 = arith.mulf %54, %55 : vector<8x128xf32>
    %57 = arith.addf %42, %56 : vector<8x128xf32>
    %c0_27 = arith.constant 0 : index
    %c4 = arith.constant 4 : index
    %58 = vector.load %arg3[%c0_27, %c4] : memref<8x9xf32, #tpu.memory_space<vmem>>, vector<8x1xf32>
    %c0_28 = arith.constant 0 : index
    %c0_29 = arith.constant 0 : index
    %c16 = arith.constant 16 : index
    %59 = vector.load %arg1[%c0_28, %c0_29, %c16] : memref<1x8x256xf32, #tpu.memory_space<vmem>>, vector<1x8x128xf32>
    %60 = vector.shape_cast %59 : vector<1x8x128xf32> to vector<8x128xf32>
    %c0_30 = arith.constant 0 : index
    %c16_31 = arith.constant 16 : index
    %61 = vector.load %arg2[%c0_30, %c16_31] : memref<8x256xf32, #tpu.memory_space<vmem>>, vector<1x128xf32>
    %62 = vector.broadcast %58 : vector<8x1xf32> to vector<8x128xf32>
    %63 = arith.mulf %62, %60 : vector<8x128xf32>
    %64 = arith.addf %53, %63 : vector<8x128xf32>
    %65 = vector.broadcast %58 : vector<8x1xf32> to vector<8x128xf32>
    %66 = vector.broadcast %61 : vector<1x128xf32> to vector<8x128xf32>
    %67 = arith.mulf %65, %66 : vector<8x128xf32>
    %68 = arith.addf %57, %67 : vector<8x128xf32>
    %c0_32 = arith.constant 0 : index
    %c5 = arith.constant 5 : index
    %69 = vector.load %arg3[%c0_32, %c5] : memref<8x9xf32, #tpu.memory_space<vmem>>, vector<8x1xf32>
    %c0_33 = arith.constant 0 : index
    %c0_34 = arith.constant 0 : index
    %c17 = arith.constant 17 : index
    %70 = vector.load %arg1[%c0_33, %c0_34, %c17] : memref<1x8x256xf32, #tpu.memory_space<vmem>>, vector<1x8x128xf32>
    %71 = vector.shape_cast %70 : vector<1x8x128xf32> to vector<8x128xf32>
    %c0_35 = arith.constant 0 : index
    %c17_36 = arith.constant 17 : index
    %72 = vector.load %arg2[%c0_35, %c17_36] : memref<8x256xf32, #tpu.memory_space<vmem>>, vector<1x128xf32>
    %c2_37 = arith.constant 2 : index
    %c17_38 = arith.constant 17 : index
    %73 = vector.load %arg2[%c2_37, %c17_38] : memref<8x256xf32, #tpu.memory_space<vmem>>, vector<1x128xf32>
    %74 = vector.broadcast %73 : vector<1x128xf32> to vector<8x128xf32>
    %75 = arith.mulf %71, %74 : vector<8x128xf32>
    %76 = arith.mulf %72, %73 : vector<1x128xf32>
    %77 = vector.broadcast %69 : vector<8x1xf32> to vector<8x128xf32>
    %78 = arith.mulf %77, %75 : vector<8x128xf32>
    %79 = arith.addf %64, %78 : vector<8x128xf32>
    %80 = vector.broadcast %69 : vector<8x1xf32> to vector<8x128xf32>
    %81 = vector.broadcast %76 : vector<1x128xf32> to vector<8x128xf32>
    %82 = arith.mulf %80, %81 : vector<8x128xf32>
    %83 = arith.addf %68, %82 : vector<8x128xf32>
    %c0_39 = arith.constant 0 : index
    %c6 = arith.constant 6 : index
    %84 = vector.load %arg3[%c0_39, %c6] : memref<8x9xf32, #tpu.memory_space<vmem>>, vector<8x1xf32>
    %c0_40 = arith.constant 0 : index
    %c0_41 = arith.constant 0 : index
    %c23 = arith.constant 23 : index
    %85 = vector.load %arg1[%c0_40, %c0_41, %c23] : memref<1x8x256xf32, #tpu.memory_space<vmem>>, vector<1x8x128xf32>
    %86 = vector.shape_cast %85 : vector<1x8x128xf32> to vector<8x128xf32>
    %c0_42 = arith.constant 0 : index
    %c23_43 = arith.constant 23 : index
    %87 = vector.load %arg2[%c0_42, %c23_43] : memref<8x256xf32, #tpu.memory_space<vmem>>, vector<1x128xf32>
    %c1_44 = arith.constant 1 : index
    %c23_45 = arith.constant 23 : index
    %88 = vector.load %arg2[%c1_44, %c23_45] : memref<8x256xf32, #tpu.memory_space<vmem>>, vector<1x128xf32>
    %89 = vector.broadcast %88 : vector<1x128xf32> to vector<8x128xf32>
    %90 = arith.mulf %86, %89 : vector<8x128xf32>
    %91 = arith.mulf %87, %88 : vector<1x128xf32>
    %92 = vector.broadcast %84 : vector<8x1xf32> to vector<8x128xf32>
    %93 = arith.mulf %92, %90 : vector<8x128xf32>
    %94 = arith.addf %79, %93 : vector<8x128xf32>
    %95 = vector.broadcast %84 : vector<8x1xf32> to vector<8x128xf32>
    %96 = vector.broadcast %91 : vector<1x128xf32> to vector<8x128xf32>
    %97 = arith.mulf %95, %96 : vector<8x128xf32>
    %98 = arith.addf %83, %97 : vector<8x128xf32>
    %c0_46 = arith.constant 0 : index
    %c7_47 = arith.constant 7 : index
    %99 = vector.load %arg3[%c0_46, %c7_47] : memref<8x9xf32, #tpu.memory_space<vmem>>, vector<8x1xf32>
    %c0_48 = arith.constant 0 : index
    %c0_49 = arith.constant 0 : index
    %c24 = arith.constant 24 : index
    %100 = vector.load %arg1[%c0_48, %c0_49, %c24] : memref<1x8x256xf32, #tpu.memory_space<vmem>>, vector<1x8x128xf32>
    %101 = vector.shape_cast %100 : vector<1x8x128xf32> to vector<8x128xf32>
    %c0_50 = arith.constant 0 : index
    %c24_51 = arith.constant 24 : index
    %102 = vector.load %arg2[%c0_50, %c24_51] : memref<8x256xf32, #tpu.memory_space<vmem>>, vector<1x128xf32>
    %103 = vector.broadcast %99 : vector<8x1xf32> to vector<8x128xf32>
    %104 = arith.mulf %103, %101 : vector<8x128xf32>
    %105 = arith.addf %94, %104 : vector<8x128xf32>
    %106 = vector.broadcast %99 : vector<8x1xf32> to vector<8x128xf32>
    %107 = vector.broadcast %102 : vector<1x128xf32> to vector<8x128xf32>
    %108 = arith.mulf %106, %107 : vector<8x128xf32>
    %109 = arith.addf %98, %108 : vector<8x128xf32>
    %c0_52 = arith.constant 0 : index
    %c8_53 = arith.constant 8 : index
    %110 = vector.load %arg3[%c0_52, %c8_53] : memref<8x9xf32, #tpu.memory_space<vmem>>, vector<8x1xf32>
    %c0_54 = arith.constant 0 : index
    %c0_55 = arith.constant 0 : index
    %c25 = arith.constant 25 : index
    %111 = vector.load %arg1[%c0_54, %c0_55, %c25] : memref<1x8x256xf32, #tpu.memory_space<vmem>>, vector<1x8x128xf32>
    %112 = vector.shape_cast %111 : vector<1x8x128xf32> to vector<8x128xf32>
    %c0_56 = arith.constant 0 : index
    %c25_57 = arith.constant 25 : index
    %113 = vector.load %arg2[%c0_56, %c25_57] : memref<8x256xf32, #tpu.memory_space<vmem>>, vector<1x128xf32>
    %c2_58 = arith.constant 2 : index
    %c25_59 = arith.constant 25 : index
    %114 = vector.load %arg2[%c2_58, %c25_59] : memref<8x256xf32, #tpu.memory_space<vmem>>, vector<1x128xf32>
    %115 = vector.broadcast %114 : vector<1x128xf32> to vector<8x128xf32>
    %116 = arith.mulf %112, %115 : vector<8x128xf32>
    %117 = arith.mulf %113, %114 : vector<1x128xf32>
    %118 = vector.broadcast %110 : vector<8x1xf32> to vector<8x128xf32>
    %119 = arith.mulf %118, %116 : vector<8x128xf32>
    %120 = arith.addf %105, %119 : vector<8x128xf32>
    %121 = vector.broadcast %110 : vector<8x1xf32> to vector<8x128xf32>
    %122 = vector.broadcast %117 : vector<1x128xf32> to vector<8x128xf32>
    %123 = arith.mulf %121, %122 : vector<8x128xf32>
    %124 = arith.addf %109, %123 : vector<8x128xf32>
    %125 = tpu.iota {dimensions = array<i32: 1>} : vector<1x128xi32>
    %c64_i32 = arith.constant 64 : i32
    %126 = vector.broadcast %c64_i32 : i32 to vector<1x128xi32>
    %127 = arith.cmpi slt, %125, %126 : vector<1x128xi32>
    %128 = arith.extui %127 : vector<1x128xi1> to vector<1x128xi32>
    %129 = arith.sitofp %128 : vector<1x128xi32> to vector<1x128xf32>
    %130 = vector.broadcast %129 : vector<1x128xf32> to vector<8x128xf32>
    %131 = arith.mulf %120, %130 : vector<8x128xf32>
    %c0_60 = arith.constant 0 : index
    %c0_61 = arith.constant 0 : index
    %c0_62 = arith.constant 0 : index
    %132 = vector.load %arg1[%c0_60, %c0_61, %c0_62] : memref<1x8x256xf32, #tpu.memory_space<vmem>>, vector<1x8x256xf32>
    %133 = vector.shape_cast %132 : vector<1x8x256xf32> to vector<8x256xf32>
    %cst_63 = arith.constant dense<0.000000e+00> : vector<8xf32>
    %134 = vector.multi_reduction <add>, %133, %cst_63 [1] : vector<8x256xf32> to vector<8xf32>
    %135 = vector.shape_cast %134 : vector<8xf32> to vector<8x1xf32>
    %c0_64 = arith.constant 0 : index
    %c0_65 = arith.constant 0 : index
    %c0_66 = arith.constant 0 : index
    %136 = vector.load %arg4[%c0_64, %c0_65, %c0_66] : memref<1x8x8xf32, #tpu.memory_space<vmem>>, vector<1x8x1xf32>
    %137 = vector.shape_cast %136 : vector<1x8x1xf32> to vector<8x1xf32>
    %138 = vector.shape_cast %135 : vector<8x1xf32> to vector<1x8x1xf32>
    tpu.vector_store %arg4[%c0_64, %c0_65, %c0_66], %138 {strides = array<i32>} : memref<1x8x8xf32, #tpu.memory_space<vmem>>, vector<1x8x1xf32>,
    %139 = arith.mulf %133, %133 : vector<8x256xf32>
    %cst_67 = arith.constant dense<0.000000e+00> : vector<8xf32>
    %140 = vector.multi_reduction <add>, %139, %cst_67 [1] : vector<8x256xf32> to vector<8xf32>
    %141 = vector.shape_cast %140 : vector<8xf32> to vector<8x1xf32>
    %c0_68 = arith.constant 0 : index
    %c0_69 = arith.constant 0 : index
    %c1_70 = arith.constant 1 : index
    %142 = vector.load %arg4[%c0_68, %c0_69, %c1_70] : memref<1x8x8xf32, #tpu.memory_space<vmem>>, vector<1x8x1xf32>
    %143 = vector.shape_cast %142 : vector<1x8x1xf32> to vector<8x1xf32>
    %144 = vector.shape_cast %141 : vector<8x1xf32> to vector<1x8x1xf32>
    tpu.vector_store %arg4[%c0_68, %c0_69, %c1_70], %144 {strides = array<i32>} : memref<1x8x8xf32, #tpu.memory_space<vmem>>, vector<1x8x1xf32>,
    %cst_71 = arith.constant dense<0.000000e+00> : vector<8xf32>
    %145 = vector.multi_reduction <add>, %131, %cst_71 [1] : vector<8x128xf32> to vector<8xf32>
    %146 = vector.shape_cast %145 : vector<8xf32> to vector<8x1xf32>
    %c0_72 = arith.constant 0 : index
    %c0_73 = arith.constant 0 : index
    %c2_74 = arith.constant 2 : index
    %147 = vector.load %arg4[%c0_72, %c0_73, %c2_74] : memref<1x8x8xf32, #tpu.memory_space<vmem>>, vector<1x8x1xf32>
    %148 = vector.shape_cast %147 : vector<1x8x1xf32> to vector<8x1xf32>
    %149 = vector.shape_cast %146 : vector<8x1xf32> to vector<1x8x1xf32>
    tpu.vector_store %arg4[%c0_72, %c0_73, %c2_74], %149 {strides = array<i32>} : memref<1x8x8xf32, #tpu.memory_space<vmem>>, vector<1x8x1xf32>,
    %150 = arith.mulf %131, %120 : vector<8x128xf32>
    %cst_75 = arith.constant dense<0.000000e+00> : vector<8xf32>
    %151 = vector.multi_reduction <add>, %150, %cst_75 [1] : vector<8x128xf32> to vector<8xf32>
    %152 = vector.shape_cast %151 : vector<8xf32> to vector<8x1xf32>
    %c0_76 = arith.constant 0 : index
    %c0_77 = arith.constant 0 : index
    %c3_78 = arith.constant 3 : index
    %153 = vector.load %arg4[%c0_76, %c0_77, %c3_78] : memref<1x8x8xf32, #tpu.memory_space<vmem>>, vector<1x8x1xf32>
    %154 = vector.shape_cast %153 : vector<1x8x1xf32> to vector<8x1xf32>
    %155 = vector.shape_cast %152 : vector<8x1xf32> to vector<1x8x1xf32>
    tpu.vector_store %arg4[%c0_76, %c0_77, %c3_78], %155 {strides = array<i32>} : memref<1x8x8xf32, #tpu.memory_space<vmem>>, vector<1x8x1xf32>,
    %156 = arith.mulf %131, %124 : vector<8x128xf32>
    %cst_79 = arith.constant dense<0.000000e+00> : vector<8xf32>
    %157 = vector.multi_reduction <add>, %156, %cst_79 [1] : vector<8x128xf32> to vector<8xf32>
    %158 = vector.shape_cast %157 : vector<8xf32> to vector<8x1xf32>
    %c0_80 = arith.constant 0 : index
    %c0_81 = arith.constant 0 : index
    %c4_82 = arith.constant 4 : index
    %159 = vector.load %arg4[%c0_80, %c0_81, %c4_82] : memref<1x8x8xf32, #tpu.memory_space<vmem>>, vector<1x8x1xf32>
    %160 = vector.shape_cast %159 : vector<1x8x1xf32> to vector<8x1xf32>
    %161 = vector.shape_cast %158 : vector<8x1xf32> to vector<1x8x1xf32>
    tpu.vector_store %arg4[%c0_80, %c0_81, %c4_82], %161 {strides = array<i32>} : memref<1x8x8xf32, #tpu.memory_space<vmem>>, vector<1x8x1xf32>,
    %cst_83 = arith.constant 0.000000e+00 : f32
    %162 = vector.broadcast %cst_83 : f32 to vector<8x3xf32>
    %c0_84 = arith.constant 0 : index
    %c0_85 = arith.constant 0 : index
    %c5_86 = arith.constant 5 : index
    %163 = vector.load %arg4[%c0_84, %c0_85, %c5_86] : memref<1x8x8xf32, #tpu.memory_space<vmem>>, vector<1x8x3xf32>
    %164 = vector.shape_cast %163 : vector<1x8x3xf32> to vector<8x3xf32>
    %165 = vector.shape_cast %162 : vector<8x3xf32> to vector<1x8x3xf32>
    tpu.vector_store %arg4[%c0_84, %c0_85, %c5_86], %165 {strides = array<i32>} : memref<1x8x8xf32, #tpu.memory_space<vmem>>, vector<1x8x3xf32>,
    return
  }
  func.func @transform_0(%arg0: i32) -> (i32, i32, i32) {
    %c0_i32 = arith.constant 0 : i32
    %c0_i32_0 = arith.constant 0 : i32
    %c0_i32_1 = arith.constant 0 : i32
    return %arg0, %c0_i32, %c0_i32_0 : i32, i32, i32
  }
  func.func @transform_1(%arg0: i32) -> (i32, i32) {
    %c0_i32 = arith.constant 0 : i32
    %c0_i32_0 = arith.constant 0 : i32
    %c0_i32_1 = arith.constant 0 : i32
    return %c0_i32, %c0_i32_0 : i32, i32
  }
  func.func @transform_2(%arg0: i32) -> (i32, i32) {
    %c0_i32 = arith.constant 0 : i32
    %c0_i32_0 = arith.constant 0 : i32
    %c0_i32_1 = arith.constant 0 : i32
    return %c0_i32, %c0_i32_0 : i32, i32
  }
  func.func @transform_3(%arg0: i32) -> (i32, i32, i32) {
    %c0_i32 = arith.constant 0 : i32
    %c0_i32_0 = arith.constant 0 : i32
    %c0_i32_1 = arith.constant 0 : i32
    return %arg0, %c0_i32, %c0_i32_0 : i32, i32, i32
  }
}

module attributes {stable_mosaic.version = 11 : i64} {
  func.func @_apply_kernel(%arg0: i32, %arg1: memref<1x8x256xf32, #tpu.memory_space<vmem>>, %arg2: memref<8x256xf32, #tpu.memory_space<vmem>>, %arg3: memref<8x19xf32, #tpu.memory_space<vmem>>, %arg4: memref<8x8xf32, #tpu.memory_space<vmem>>, %arg5: memref<1x8x128xf32, #tpu.memory_space<vmem>>, %arg6: memref<1x8x8xf32, #tpu.memory_space<vmem>>) attributes {dimension_semantics = [#tpu.dimension_semantics<parallel>], iteration_bounds = array<i64: 2>, scalar_prefetch = 0 : i64, scratch_operands = 0 : i64, tpu.core_type = #tpu.core_type<tc>, window_params = [{transform_indices = @transform_0, window_bounds = array<i64: 1, 8, 256>}, {pipeline_mode = #tpu.pipeline_mode<synchronous>, transform_indices = @transform_1, window_bounds = array<i64: 8, 256>}, {pipeline_mode = #tpu.pipeline_mode<synchronous>, transform_indices = @transform_2, window_bounds = array<i64: 8, 19>}, {pipeline_mode = #tpu.pipeline_mode<synchronous>, transform_indices = @transform_3, window_bounds = array<i64: 8, 8>}, {transform_indices = @transform_4, window_bounds = array<i64: 1, 8, 128>}, {transform_indices = @transform_5, window_bounds = array<i64: 1, 8, 8>}]} {
    %cst = arith.constant 0.000000e+00 : f32
    %0 = vector.broadcast %cst : f32 to vector<8x128xf32>
    %c0 = arith.constant 0 : index
    %c0_0 = arith.constant 0 : index
    %c7 = arith.constant 7 : index
    %1 = vector.load %arg1[%c0, %c0_0, %c7] : memref<1x8x256xf32, #tpu.memory_space<vmem>>, vector<1x8x128xf32>
    %2 = vector.shape_cast %1 : vector<1x8x128xf32> to vector<8x128xf32>
    %c0_1 = arith.constant 0 : index
    %c7_2 = arith.constant 7 : index
    %3 = vector.load %arg2[%c0_1, %c7_2] : memref<8x256xf32, #tpu.memory_space<vmem>>, vector<1x128xf32>
    %c1 = arith.constant 1 : index
    %c7_3 = arith.constant 7 : index
    %4 = vector.load %arg2[%c1, %c7_3] : memref<8x256xf32, #tpu.memory_space<vmem>>, vector<1x128xf32>
    %5 = vector.broadcast %4 : vector<1x128xf32> to vector<8x128xf32>
    %6 = arith.mulf %2, %5 : vector<8x128xf32>
    %7 = arith.mulf %3, %4 : vector<1x128xf32>
    %c0_4 = arith.constant 0 : index
    %c0_5 = arith.constant 0 : index
    %8 = vector.load %arg3[%c0_4, %c0_5] : memref<8x19xf32, #tpu.memory_space<vmem>>, vector<8x1xf32>
    %9 = vector.broadcast %8 : vector<8x1xf32> to vector<8x128xf32>
    %10 = arith.mulf %9, %6 : vector<8x128xf32>
    %11 = arith.addf %0, %10 : vector<8x128xf32>
    %c0_6 = arith.constant 0 : index
    %c9 = arith.constant 9 : index
    %12 = vector.load %arg3[%c0_6, %c9] : memref<8x19xf32, #tpu.memory_space<vmem>>, vector<8x1xf32>
    %13 = vector.broadcast %12 : vector<8x1xf32> to vector<8x128xf32>
    %14 = vector.broadcast %7 : vector<1x128xf32> to vector<8x128xf32>
    %15 = arith.mulf %13, %14 : vector<8x128xf32>
    %16 = arith.addf %11, %15 : vector<8x128xf32>
    %c0_7 = arith.constant 0 : index
    %c0_8 = arith.constant 0 : index
    %c8 = arith.constant 8 : index
    %17 = vector.load %arg1[%c0_7, %c0_8, %c8] : memref<1x8x256xf32, #tpu.memory_space<vmem>>, vector<1x8x128xf32>
    %18 = vector.shape_cast %17 : vector<1x8x128xf32> to vector<8x128xf32>
    %c0_9 = arith.constant 0 : index
    %c8_10 = arith.constant 8 : index
    %19 = vector.load %arg2[%c0_9, %c8_10] : memref<8x256xf32, #tpu.memory_space<vmem>>, vector<1x128xf32>
    %c0_11 = arith.constant 0 : index
    %c1_12 = arith.constant 1 : index
    %20 = vector.load %arg3[%c0_11, %c1_12] : memref<8x19xf32, #tpu.memory_space<vmem>>, vector<8x1xf32>
    %21 = vector.broadcast %20 : vector<8x1xf32> to vector<8x128xf32>
    %22 = arith.mulf %21, %18 : vector<8x128xf32>
    %23 = arith.addf %16, %22 : vector<8x128xf32>
    %c0_13 = arith.constant 0 : index
    %c10 = arith.constant 10 : index
    %24 = vector.load %arg3[%c0_13, %c10] : memref<8x19xf32, #tpu.memory_space<vmem>>, vector<8x1xf32>
    %25 = vector.broadcast %24 : vector<8x1xf32> to vector<8x128xf32>
    %26 = vector.broadcast %19 : vector<1x128xf32> to vector<8x128xf32>
    %27 = arith.mulf %25, %26 : vector<8x128xf32>
    %28 = arith.addf %23, %27 : vector<8x128xf32>
    %c0_14 = arith.constant 0 : index
    %c0_15 = arith.constant 0 : index
    %c9_16 = arith.constant 9 : index
    %29 = vector.load %arg1[%c0_14, %c0_15, %c9_16] : memref<1x8x256xf32, #tpu.memory_space<vmem>>, vector<1x8x128xf32>
    %30 = vector.shape_cast %29 : vector<1x8x128xf32> to vector<8x128xf32>
    %c0_17 = arith.constant 0 : index
    %c9_18 = arith.constant 9 : index
    %31 = vector.load %arg2[%c0_17, %c9_18] : memref<8x256xf32, #tpu.memory_space<vmem>>, vector<1x128xf32>
    %c2 = arith.constant 2 : index
    %c9_19 = arith.constant 9 : index
    %32 = vector.load %arg2[%c2, %c9_19] : memref<8x256xf32, #tpu.memory_space<vmem>>, vector<1x128xf32>
    %33 = vector.broadcast %32 : vector<1x128xf32> to vector<8x128xf32>
    %34 = arith.mulf %30, %33 : vector<8x128xf32>
    %35 = arith.mulf %31, %32 : vector<1x128xf32>
    %c0_20 = arith.constant 0 : index
    %c2_21 = arith.constant 2 : index
    %36 = vector.load %arg3[%c0_20, %c2_21] : memref<8x19xf32, #tpu.memory_space<vmem>>, vector<8x1xf32>
    %37 = vector.broadcast %36 : vector<8x1xf32> to vector<8x128xf32>
    %38 = arith.mulf %37, %34 : vector<8x128xf32>
    %39 = arith.addf %28, %38 : vector<8x128xf32>
    %c0_22 = arith.constant 0 : index
    %c11 = arith.constant 11 : index
    %40 = vector.load %arg3[%c0_22, %c11] : memref<8x19xf32, #tpu.memory_space<vmem>>, vector<8x1xf32>
    %41 = vector.broadcast %40 : vector<8x1xf32> to vector<8x128xf32>
    %42 = vector.broadcast %35 : vector<1x128xf32> to vector<8x128xf32>
    %43 = arith.mulf %41, %42 : vector<8x128xf32>
    %44 = arith.addf %39, %43 : vector<8x128xf32>
    %c0_23 = arith.constant 0 : index
    %c0_24 = arith.constant 0 : index
    %c15 = arith.constant 15 : index
    %45 = vector.load %arg1[%c0_23, %c0_24, %c15] : memref<1x8x256xf32, #tpu.memory_space<vmem>>, vector<1x8x128xf32>
    %46 = vector.shape_cast %45 : vector<1x8x128xf32> to vector<8x128xf32>
    %c0_25 = arith.constant 0 : index
    %c15_26 = arith.constant 15 : index
    %47 = vector.load %arg2[%c0_25, %c15_26] : memref<8x256xf32, #tpu.memory_space<vmem>>, vector<1x128xf32>
    %c1_27 = arith.constant 1 : index
    %c15_28 = arith.constant 15 : index
    %48 = vector.load %arg2[%c1_27, %c15_28] : memref<8x256xf32, #tpu.memory_space<vmem>>, vector<1x128xf32>
    %49 = vector.broadcast %48 : vector<1x128xf32> to vector<8x128xf32>
    %50 = arith.mulf %46, %49 : vector<8x128xf32>
    %51 = arith.mulf %47, %48 : vector<1x128xf32>
    %c0_29 = arith.constant 0 : index
    %c3 = arith.constant 3 : index
    %52 = vector.load %arg3[%c0_29, %c3] : memref<8x19xf32, #tpu.memory_space<vmem>>, vector<8x1xf32>
    %53 = vector.broadcast %52 : vector<8x1xf32> to vector<8x128xf32>
    %54 = arith.mulf %53, %50 : vector<8x128xf32>
    %55 = arith.addf %44, %54 : vector<8x128xf32>
    %c0_30 = arith.constant 0 : index
    %c12 = arith.constant 12 : index
    %56 = vector.load %arg3[%c0_30, %c12] : memref<8x19xf32, #tpu.memory_space<vmem>>, vector<8x1xf32>
    %57 = vector.broadcast %56 : vector<8x1xf32> to vector<8x128xf32>
    %58 = vector.broadcast %51 : vector<1x128xf32> to vector<8x128xf32>
    %59 = arith.mulf %57, %58 : vector<8x128xf32>
    %60 = arith.addf %55, %59 : vector<8x128xf32>
    %c0_31 = arith.constant 0 : index
    %c0_32 = arith.constant 0 : index
    %c16 = arith.constant 16 : index
    %61 = vector.load %arg1[%c0_31, %c0_32, %c16] : memref<1x8x256xf32, #tpu.memory_space<vmem>>, vector<1x8x128xf32>
    %62 = vector.shape_cast %61 : vector<1x8x128xf32> to vector<8x128xf32>
    %c0_33 = arith.constant 0 : index
    %c16_34 = arith.constant 16 : index
    %63 = vector.load %arg2[%c0_33, %c16_34] : memref<8x256xf32, #tpu.memory_space<vmem>>, vector<1x128xf32>
    %c0_35 = arith.constant 0 : index
    %c4 = arith.constant 4 : index
    %64 = vector.load %arg3[%c0_35, %c4] : memref<8x19xf32, #tpu.memory_space<vmem>>, vector<8x1xf32>
    %65 = vector.broadcast %64 : vector<8x1xf32> to vector<8x128xf32>
    %66 = arith.mulf %65, %62 : vector<8x128xf32>
    %67 = arith.addf %60, %66 : vector<8x128xf32>
    %c0_36 = arith.constant 0 : index
    %c13 = arith.constant 13 : index
    %68 = vector.load %arg3[%c0_36, %c13] : memref<8x19xf32, #tpu.memory_space<vmem>>, vector<8x1xf32>
    %69 = vector.broadcast %68 : vector<8x1xf32> to vector<8x128xf32>
    %70 = vector.broadcast %63 : vector<1x128xf32> to vector<8x128xf32>
    %71 = arith.mulf %69, %70 : vector<8x128xf32>
    %72 = arith.addf %67, %71 : vector<8x128xf32>
    %c0_37 = arith.constant 0 : index
    %c0_38 = arith.constant 0 : index
    %c17 = arith.constant 17 : index
    %73 = vector.load %arg1[%c0_37, %c0_38, %c17] : memref<1x8x256xf32, #tpu.memory_space<vmem>>, vector<1x8x128xf32>
    %74 = vector.shape_cast %73 : vector<1x8x128xf32> to vector<8x128xf32>
    %c0_39 = arith.constant 0 : index
    %c17_40 = arith.constant 17 : index
    %75 = vector.load %arg2[%c0_39, %c17_40] : memref<8x256xf32, #tpu.memory_space<vmem>>, vector<1x128xf32>
    %c2_41 = arith.constant 2 : index
    %c17_42 = arith.constant 17 : index
    %76 = vector.load %arg2[%c2_41, %c17_42] : memref<8x256xf32, #tpu.memory_space<vmem>>, vector<1x128xf32>
    %77 = vector.broadcast %76 : vector<1x128xf32> to vector<8x128xf32>
    %78 = arith.mulf %74, %77 : vector<8x128xf32>
    %79 = arith.mulf %75, %76 : vector<1x128xf32>
    %c0_43 = arith.constant 0 : index
    %c5 = arith.constant 5 : index
    %80 = vector.load %arg3[%c0_43, %c5] : memref<8x19xf32, #tpu.memory_space<vmem>>, vector<8x1xf32>
    %81 = vector.broadcast %80 : vector<8x1xf32> to vector<8x128xf32>
    %82 = arith.mulf %81, %78 : vector<8x128xf32>
    %83 = arith.addf %72, %82 : vector<8x128xf32>
    %c0_44 = arith.constant 0 : index
    %c14 = arith.constant 14 : index
    %84 = vector.load %arg3[%c0_44, %c14] : memref<8x19xf32, #tpu.memory_space<vmem>>, vector<8x1xf32>
    %85 = vector.broadcast %84 : vector<8x1xf32> to vector<8x128xf32>
    %86 = vector.broadcast %79 : vector<1x128xf32> to vector<8x128xf32>
    %87 = arith.mulf %85, %86 : vector<8x128xf32>
    %88 = arith.addf %83, %87 : vector<8x128xf32>
    %c0_45 = arith.constant 0 : index
    %c0_46 = arith.constant 0 : index
    %c23 = arith.constant 23 : index
    %89 = vector.load %arg1[%c0_45, %c0_46, %c23] : memref<1x8x256xf32, #tpu.memory_space<vmem>>, vector<1x8x128xf32>
    %90 = vector.shape_cast %89 : vector<1x8x128xf32> to vector<8x128xf32>
    %c0_47 = arith.constant 0 : index
    %c23_48 = arith.constant 23 : index
    %91 = vector.load %arg2[%c0_47, %c23_48] : memref<8x256xf32, #tpu.memory_space<vmem>>, vector<1x128xf32>
    %c1_49 = arith.constant 1 : index
    %c23_50 = arith.constant 23 : index
    %92 = vector.load %arg2[%c1_49, %c23_50] : memref<8x256xf32, #tpu.memory_space<vmem>>, vector<1x128xf32>
    %93 = vector.broadcast %92 : vector<1x128xf32> to vector<8x128xf32>
    %94 = arith.mulf %90, %93 : vector<8x128xf32>
    %95 = arith.mulf %91, %92 : vector<1x128xf32>
    %c0_51 = arith.constant 0 : index
    %c6 = arith.constant 6 : index
    %96 = vector.load %arg3[%c0_51, %c6] : memref<8x19xf32, #tpu.memory_space<vmem>>, vector<8x1xf32>
    %97 = vector.broadcast %96 : vector<8x1xf32> to vector<8x128xf32>
    %98 = arith.mulf %97, %94 : vector<8x128xf32>
    %99 = arith.addf %88, %98 : vector<8x128xf32>
    %c0_52 = arith.constant 0 : index
    %c15_53 = arith.constant 15 : index
    %100 = vector.load %arg3[%c0_52, %c15_53] : memref<8x19xf32, #tpu.memory_space<vmem>>, vector<8x1xf32>
    %101 = vector.broadcast %100 : vector<8x1xf32> to vector<8x128xf32>
    %102 = vector.broadcast %95 : vector<1x128xf32> to vector<8x128xf32>
    %103 = arith.mulf %101, %102 : vector<8x128xf32>
    %104 = arith.addf %99, %103 : vector<8x128xf32>
    %c0_54 = arith.constant 0 : index
    %c0_55 = arith.constant 0 : index
    %c24 = arith.constant 24 : index
    %105 = vector.load %arg1[%c0_54, %c0_55, %c24] : memref<1x8x256xf32, #tpu.memory_space<vmem>>, vector<1x8x128xf32>
    %106 = vector.shape_cast %105 : vector<1x8x128xf32> to vector<8x128xf32>
    %c0_56 = arith.constant 0 : index
    %c24_57 = arith.constant 24 : index
    %107 = vector.load %arg2[%c0_56, %c24_57] : memref<8x256xf32, #tpu.memory_space<vmem>>, vector<1x128xf32>
    %c0_58 = arith.constant 0 : index
    %c7_59 = arith.constant 7 : index
    %108 = vector.load %arg3[%c0_58, %c7_59] : memref<8x19xf32, #tpu.memory_space<vmem>>, vector<8x1xf32>
    %109 = vector.broadcast %108 : vector<8x1xf32> to vector<8x128xf32>
    %110 = arith.mulf %109, %106 : vector<8x128xf32>
    %111 = arith.addf %104, %110 : vector<8x128xf32>
    %c0_60 = arith.constant 0 : index
    %c16_61 = arith.constant 16 : index
    %112 = vector.load %arg3[%c0_60, %c16_61] : memref<8x19xf32, #tpu.memory_space<vmem>>, vector<8x1xf32>
    %113 = vector.broadcast %112 : vector<8x1xf32> to vector<8x128xf32>
    %114 = vector.broadcast %107 : vector<1x128xf32> to vector<8x128xf32>
    %115 = arith.mulf %113, %114 : vector<8x128xf32>
    %116 = arith.addf %111, %115 : vector<8x128xf32>
    %c0_62 = arith.constant 0 : index
    %c0_63 = arith.constant 0 : index
    %c25 = arith.constant 25 : index
    %117 = vector.load %arg1[%c0_62, %c0_63, %c25] : memref<1x8x256xf32, #tpu.memory_space<vmem>>, vector<1x8x128xf32>
    %118 = vector.shape_cast %117 : vector<1x8x128xf32> to vector<8x128xf32>
    %c0_64 = arith.constant 0 : index
    %c25_65 = arith.constant 25 : index
    %119 = vector.load %arg2[%c0_64, %c25_65] : memref<8x256xf32, #tpu.memory_space<vmem>>, vector<1x128xf32>
    %c2_66 = arith.constant 2 : index
    %c25_67 = arith.constant 25 : index
    %120 = vector.load %arg2[%c2_66, %c25_67] : memref<8x256xf32, #tpu.memory_space<vmem>>, vector<1x128xf32>
    %121 = vector.broadcast %120 : vector<1x128xf32> to vector<8x128xf32>
    %122 = arith.mulf %118, %121 : vector<8x128xf32>
    %123 = arith.mulf %119, %120 : vector<1x128xf32>
    %c0_68 = arith.constant 0 : index
    %c8_69 = arith.constant 8 : index
    %124 = vector.load %arg3[%c0_68, %c8_69] : memref<8x19xf32, #tpu.memory_space<vmem>>, vector<8x1xf32>
    %125 = vector.broadcast %124 : vector<8x1xf32> to vector<8x128xf32>
    %126 = arith.mulf %125, %122 : vector<8x128xf32>
    %127 = arith.addf %116, %126 : vector<8x128xf32>
    %c0_70 = arith.constant 0 : index
    %c17_71 = arith.constant 17 : index
    %128 = vector.load %arg3[%c0_70, %c17_71] : memref<8x19xf32, #tpu.memory_space<vmem>>, vector<8x1xf32>
    %129 = vector.broadcast %128 : vector<8x1xf32> to vector<8x128xf32>
    %130 = vector.broadcast %123 : vector<1x128xf32> to vector<8x128xf32>
    %131 = arith.mulf %129, %130 : vector<8x128xf32>
    %132 = arith.addf %127, %131 : vector<8x128xf32>
    %c0_72 = arith.constant 0 : index
    %c18 = arith.constant 18 : index
    %133 = vector.load %arg3[%c0_72, %c18] : memref<8x19xf32, #tpu.memory_space<vmem>>, vector<8x1xf32>
    %134 = vector.broadcast %133 : vector<8x1xf32> to vector<8x128xf32>
    %135 = arith.addf %132, %134 : vector<8x128xf32>
    %cst_73 = arith.constant 5.000000e-01 : f32
    %136 = vector.broadcast %cst_73 : f32 to vector<8x128xf32>
    %137 = arith.mulf %136, %135 : vector<8x128xf32>
    %cst_74 = arith.constant 0.707106769 : f32
    %138 = vector.broadcast %cst_74 : f32 to vector<8x128xf32>
    %139 = arith.mulf %135, %138 : vector<8x128xf32>
    %cst_75 = arith.constant 0.000000e+00 : f32
    %140 = vector.broadcast %cst_75 : f32 to vector<8x128xf32>
    %141 = arith.cmpf oge, %139, %140 : vector<8x128xf32>
    %cst_76 = arith.constant 1.000000e+00 : f32
    %cst_77 = arith.constant -1.000000e+00 : f32
    %142 = vector.broadcast %cst_76 : f32 to vector<8x128xf32>
    %143 = vector.broadcast %cst_77 : f32 to vector<8x128xf32>
    %144 = arith.select %141, %142, %143 : vector<8x128xi1>, vector<8x128xf32>
    %145 = math.absf %139 : vector<8x128xf32>
    %cst_78 = arith.constant 0.327591091 : f32
    %146 = vector.broadcast %cst_78 : f32 to vector<8x128xf32>
    %147 = arith.mulf %146, %145 : vector<8x128xf32>
    %cst_79 = arith.constant 1.000000e+00 : f32
    %148 = vector.broadcast %cst_79 : f32 to vector<8x128xf32>
    %149 = arith.addf %148, %147 : vector<8x128xf32>
    %cst_80 = arith.constant 1.000000e+00 : f32
    %150 = vector.broadcast %cst_80 : f32 to vector<8x128xf32>
    %151 = arith.divf %150, %149 : vector<8x128xf32>
    %cst_81 = arith.constant 1.06140542 : f32
    %152 = vector.broadcast %cst_81 : f32 to vector<8x128xf32>
    %153 = arith.mulf %152, %151 : vector<8x128xf32>
    %cst_82 = arith.constant -1.45315206 : f32
    %154 = vector.broadcast %cst_82 : f32 to vector<8x128xf32>
    %155 = arith.addf %153, %154 : vector<8x128xf32>
    %156 = arith.mulf %155, %151 : vector<8x128xf32>
    %cst_83 = arith.constant 1.42141378 : f32
    %157 = vector.broadcast %cst_83 : f32 to vector<8x128xf32>
    %158 = arith.addf %156, %157 : vector<8x128xf32>
    %159 = arith.mulf %158, %151 : vector<8x128xf32>
    %cst_84 = arith.constant -0.284496725 : f32
    %160 = vector.broadcast %cst_84 : f32 to vector<8x128xf32>
    %161 = arith.addf %159, %160 : vector<8x128xf32>
    %162 = arith.mulf %161, %151 : vector<8x128xf32>
    %cst_85 = arith.constant 0.254829586 : f32
    %163 = vector.broadcast %cst_85 : f32 to vector<8x128xf32>
    %164 = arith.addf %162, %163 : vector<8x128xf32>
    %165 = arith.mulf %164, %151 : vector<8x128xf32>
    %cst_86 = arith.constant 0.000000e+00 : f32
    %166 = vector.broadcast %cst_86 : f32 to vector<8x128xf32>
    %167 = arith.subf %166, %145 : vector<8x128xf32>
    %168 = arith.mulf %167, %145 : vector<8x128xf32>
    %169 = math.exp %168 : vector<8x128xf32>
    %170 = arith.mulf %165, %169 : vector<8x128xf32>
    %cst_87 = arith.constant 1.000000e+00 : f32
    %171 = vector.broadcast %cst_87 : f32 to vector<8x128xf32>
    %172 = arith.subf %171, %170 : vector<8x128xf32>
    %173 = arith.mulf %144, %172 : vector<8x128xf32>
    %cst_88 = arith.constant 1.000000e+00 : f32
    %174 = vector.broadcast %cst_88 : f32 to vector<8x128xf32>
    %175 = arith.addf %174, %173 : vector<8x128xf32>
    %176 = arith.mulf %137, %175 : vector<8x128xf32>
    %c0_89 = arith.constant 0 : index
    %c0_90 = arith.constant 0 : index
    %177 = vector.load %arg4[%c0_89, %c0_90] : memref<8x8xf32, #tpu.memory_space<vmem>>, vector<8x8xf32>
    %cst_91 = arith.constant 0.000000e+00 : f32
    %178 = vector.broadcast %cst_91 : f32 to vector<8x128xf32>
    %179 = vector.extract_strided_slice %177 {offsets = [0, 0], sizes = [8, 1], strides = [1, 1]} : vector<8x8xf32> to vector<8x1xf32>
    %180 = vector.extract_strided_slice %176 {offsets = [0, 0], sizes = [1, 128], strides = [1, 1]} : vector<8x128xf32> to vector<1x128xf32>
    %181 = vector.broadcast %179 : vector<8x1xf32> to vector<8x128xf32>
    %182 = vector.broadcast %180 : vector<1x128xf32> to vector<8x128xf32>
    %183 = arith.mulf %181, %182 : vector<8x128xf32>
    %184 = arith.addf %178, %183 : vector<8x128xf32>
    %185 = vector.extract_strided_slice %177 {offsets = [0, 1], sizes = [8, 1], strides = [1, 1]} : vector<8x8xf32> to vector<8x1xf32>
    %186 = vector.extract_strided_slice %176 {offsets = [1, 0], sizes = [1, 128], strides = [1, 1]} : vector<8x128xf32> to vector<1x128xf32>
    %187 = vector.broadcast %185 : vector<8x1xf32> to vector<8x128xf32>
    %188 = vector.broadcast %186 : vector<1x128xf32> to vector<8x128xf32>
    %189 = arith.mulf %187, %188 : vector<8x128xf32>
    %190 = arith.addf %184, %189 : vector<8x128xf32>
    %191 = vector.extract_strided_slice %177 {offsets = [0, 2], sizes = [8, 1], strides = [1, 1]} : vector<8x8xf32> to vector<8x1xf32>
    %192 = vector.extract_strided_slice %176 {offsets = [2, 0], sizes = [1, 128], strides = [1, 1]} : vector<8x128xf32> to vector<1x128xf32>
    %193 = vector.broadcast %191 : vector<8x1xf32> to vector<8x128xf32>
    %194 = vector.broadcast %192 : vector<1x128xf32> to vector<8x128xf32>
    %195 = arith.mulf %193, %194 : vector<8x128xf32>
    %196 = arith.addf %190, %195 : vector<8x128xf32>
    %197 = vector.extract_strided_slice %177 {offsets = [0, 3], sizes = [8, 1], strides = [1, 1]} : vector<8x8xf32> to vector<8x1xf32>
    %198 = vector.extract_strided_slice %176 {offsets = [3, 0], sizes = [1, 128], strides = [1, 1]} : vector<8x128xf32> to vector<1x128xf32>
    %199 = vector.broadcast %197 : vector<8x1xf32> to vector<8x128xf32>
    %200 = vector.broadcast %198 : vector<1x128xf32> to vector<8x128xf32>
    %201 = arith.mulf %199, %200 : vector<8x128xf32>
    %202 = arith.addf %196, %201 : vector<8x128xf32>
    %203 = vector.extract_strided_slice %177 {offsets = [0, 4], sizes = [8, 1], strides = [1, 1]} : vector<8x8xf32> to vector<8x1xf32>
    %204 = vector.extract_strided_slice %176 {offsets = [4, 0], sizes = [1, 128], strides = [1, 1]} : vector<8x128xf32> to vector<1x128xf32>
    %205 = vector.broadcast %203 : vector<8x1xf32> to vector<8x128xf32>
    %206 = vector.broadcast %204 : vector<1x128xf32> to vector<8x128xf32>
    %207 = arith.mulf %205, %206 : vector<8x128xf32>
    %208 = arith.addf %202, %207 : vector<8x128xf32>
    %209 = vector.extract_strided_slice %177 {offsets = [0, 5], sizes = [8, 1], strides = [1, 1]} : vector<8x8xf32> to vector<8x1xf32>
    %210 = vector.extract_strided_slice %176 {offsets = [5, 0], sizes = [1, 128], strides = [1, 1]} : vector<8x128xf32> to vector<1x128xf32>
    %211 = vector.broadcast %209 : vector<8x1xf32> to vector<8x128xf32>
    %212 = vector.broadcast %210 : vector<1x128xf32> to vector<8x128xf32>
    %213 = arith.mulf %211, %212 : vector<8x128xf32>
    %214 = arith.addf %208, %213 : vector<8x128xf32>
    %215 = vector.extract_strided_slice %177 {offsets = [0, 6], sizes = [8, 1], strides = [1, 1]} : vector<8x8xf32> to vector<8x1xf32>
    %216 = vector.extract_strided_slice %176 {offsets = [6, 0], sizes = [1, 128], strides = [1, 1]} : vector<8x128xf32> to vector<1x128xf32>
    %217 = vector.broadcast %215 : vector<8x1xf32> to vector<8x128xf32>
    %218 = vector.broadcast %216 : vector<1x128xf32> to vector<8x128xf32>
    %219 = arith.mulf %217, %218 : vector<8x128xf32>
    %220 = arith.addf %214, %219 : vector<8x128xf32>
    %221 = vector.extract_strided_slice %177 {offsets = [0, 7], sizes = [8, 1], strides = [1, 1]} : vector<8x8xf32> to vector<8x1xf32>
    %222 = vector.extract_strided_slice %176 {offsets = [7, 0], sizes = [1, 128], strides = [1, 1]} : vector<8x128xf32> to vector<1x128xf32>
    %223 = vector.broadcast %221 : vector<8x1xf32> to vector<8x128xf32>
    %224 = vector.broadcast %222 : vector<1x128xf32> to vector<8x128xf32>
    %225 = arith.mulf %223, %224 : vector<8x128xf32>
    %226 = arith.addf %220, %225 : vector<8x128xf32>
    %c0_92 = arith.constant 0 : index
    %c0_93 = arith.constant 0 : index
    %c0_94 = arith.constant 0 : index
    %227 = vector.load %arg5[%c0_92, %c0_93, %c0_94] : memref<1x8x128xf32, #tpu.memory_space<vmem>>, vector<1x8x128xf32>
    %228 = vector.shape_cast %227 : vector<1x8x128xf32> to vector<8x128xf32>
    %229 = vector.shape_cast %226 : vector<8x128xf32> to vector<1x8x128xf32>
    tpu.vector_store %arg5[%c0_92, %c0_93, %c0_94], %229 {strides = array<i32>} : memref<1x8x128xf32, #tpu.memory_space<vmem>>, vector<1x8x128xf32>,
    %230 = tpu.iota {dimensions = array<i32: 1>} : vector<1x128xi32>
    %c64_i32 = arith.constant 64 : i32
    %231 = vector.broadcast %c64_i32 : i32 to vector<1x128xi32>
    %232 = arith.cmpi slt, %230, %231 : vector<1x128xi32>
    %233 = arith.extui %232 : vector<1x128xi1> to vector<1x128xi32>
    %234 = arith.sitofp %233 : vector<1x128xi32> to vector<1x128xf32>
    %235 = vector.broadcast %234 : vector<1x128xf32> to vector<8x128xf32>
    %236 = arith.mulf %226, %235 : vector<8x128xf32>
    %cst_95 = arith.constant dense<0.000000e+00> : vector<8xf32>
    %237 = vector.multi_reduction <add>, %236, %cst_95 [1] : vector<8x128xf32> to vector<8xf32>
    %238 = vector.shape_cast %237 : vector<8xf32> to vector<8x1xf32>
    %c0_96 = arith.constant 0 : index
    %c0_97 = arith.constant 0 : index
    %c0_98 = arith.constant 0 : index
    %239 = vector.load %arg6[%c0_96, %c0_97, %c0_98] : memref<1x8x8xf32, #tpu.memory_space<vmem>>, vector<1x8x1xf32>
    %240 = vector.shape_cast %239 : vector<1x8x1xf32> to vector<8x1xf32>
    %241 = vector.shape_cast %238 : vector<8x1xf32> to vector<1x8x1xf32>
    tpu.vector_store %arg6[%c0_96, %c0_97, %c0_98], %241 {strides = array<i32>} : memref<1x8x8xf32, #tpu.memory_space<vmem>>, vector<1x8x1xf32>,
    %242 = arith.mulf %236, %226 : vector<8x128xf32>
    %cst_99 = arith.constant dense<0.000000e+00> : vector<8xf32>
    %243 = vector.multi_reduction <add>, %242, %cst_99 [1] : vector<8x128xf32> to vector<8xf32>
    %244 = vector.shape_cast %243 : vector<8xf32> to vector<8x1xf32>
    %c0_100 = arith.constant 0 : index
    %c0_101 = arith.constant 0 : index
    %c1_102 = arith.constant 1 : index
    %245 = vector.load %arg6[%c0_100, %c0_101, %c1_102] : memref<1x8x8xf32, #tpu.memory_space<vmem>>, vector<1x8x1xf32>
    %246 = vector.shape_cast %245 : vector<1x8x1xf32> to vector<8x1xf32>
    %247 = vector.shape_cast %244 : vector<8x1xf32> to vector<1x8x1xf32>
    tpu.vector_store %arg6[%c0_100, %c0_101, %c1_102], %247 {strides = array<i32>} : memref<1x8x8xf32, #tpu.memory_space<vmem>>, vector<1x8x1xf32>,
    %cst_103 = arith.constant 0.000000e+00 : f32
    %248 = vector.broadcast %cst_103 : f32 to vector<8x6xf32>
    %c0_104 = arith.constant 0 : index
    %c0_105 = arith.constant 0 : index
    %c2_106 = arith.constant 2 : index
    %249 = vector.load %arg6[%c0_104, %c0_105, %c2_106] : memref<1x8x8xf32, #tpu.memory_space<vmem>>, vector<1x8x6xf32>
    %250 = vector.shape_cast %249 : vector<1x8x6xf32> to vector<8x6xf32>
    %251 = vector.shape_cast %248 : vector<8x6xf32> to vector<1x8x6xf32>
    tpu.vector_store %arg6[%c0_104, %c0_105, %c2_106], %251 {strides = array<i32>} : memref<1x8x8xf32, #tpu.memory_space<vmem>>, vector<1x8x6xf32>,
    return
  }
  func.func @transform_0(%arg0: i32) -> (i32, i32, i32) {
    %c0_i32 = arith.constant 0 : i32
    %c0_i32_0 = arith.constant 0 : i32
    %c0_i32_1 = arith.constant 0 : i32
    return %arg0, %c0_i32, %c0_i32_0 : i32, i32, i32
  }
  func.func @transform_1(%arg0: i32) -> (i32, i32) {
    %c0_i32 = arith.constant 0 : i32
    %c0_i32_0 = arith.constant 0 : i32
    %c0_i32_1 = arith.constant 0 : i32
    return %c0_i32, %c0_i32_0 : i32, i32
  }
  func.func @transform_2(%arg0: i32) -> (i32, i32) {
    %c0_i32 = arith.constant 0 : i32
    %c0_i32_0 = arith.constant 0 : i32
    %c0_i32_1 = arith.constant 0 : i32
    return %c0_i32, %c0_i32_0 : i32, i32
  }
  func.func @transform_3(%arg0: i32) -> (i32, i32) {
    %c0_i32 = arith.constant 0 : i32
    %c0_i32_0 = arith.constant 0 : i32
    %c0_i32_1 = arith.constant 0 : i32
    return %c0_i32, %c0_i32_0 : i32, i32
  }
  func.func @transform_4(%arg0: i32) -> (i32, i32, i32) {
    %c0_i32 = arith.constant 0 : i32
    %c0_i32_0 = arith.constant 0 : i32
    %c0_i32_1 = arith.constant 0 : i32
    return %arg0, %c0_i32, %c0_i32_0 : i32, i32, i32
  }
  func.func @transform_5(%arg0: i32) -> (i32, i32, i32) {
    %c0_i32 = arith.constant 0 : i32
    %c0_i32_0 = arith.constant 0 : i32
    %c0_i32_1 = arith.constant 0 : i32
    return %arg0, %c0_i32, %c0_i32_0 : i32, i32, i32
  }
}

module attributes {stable_mosaic.version = 11 : i64} {
  func.func @_finalize_kernel(%arg0: i32, %arg1: i32, %arg2: memref<1x8x128xf32, #tpu.memory_space<vmem>>, %arg3: memref<8x2xf32, #tpu.memory_space<vmem>>, %arg4: memref<1x1xf32, #tpu.memory_space<smem>>, %arg5: memref<1x8x128xf32, #tpu.memory_space<vmem>>) attributes {dimension_semantics = [#tpu.dimension_semantics<parallel>, #tpu.dimension_semantics<parallel>], iteration_bounds = array<i64: 2, 1>, scalar_prefetch = 0 : i64, scratch_operands = 0 : i64, tpu.core_type = #tpu.core_type<tc>, window_params = [{transform_indices = @transform_0, window_bounds = array<i64: 1, 8, 128>}, {pipeline_mode = #tpu.pipeline_mode<synchronous>, transform_indices = @transform_1, window_bounds = array<i64: 8, 2>}, {transform_indices = @transform_2, window_bounds = array<i64: 1, 1>}, {transform_indices = @transform_3, window_bounds = array<i64: 1, 8, 128>}]} {
    %c0 = arith.constant 0 : index
    %c0_0 = arith.constant 0 : index
    %0 = memref.load %arg4[%c0, %c0_0] : memref<1x1xf32, #tpu.memory_space<smem>>
    %c0_1 = arith.constant 0 : index
    %c0_2 = arith.constant 0 : index
    %1 = vector.load %arg3[%c0_1, %c0_2] : memref<8x2xf32, #tpu.memory_space<vmem>>, vector<8x1xf32>
    %c0_3 = arith.constant 0 : index
    %c0_4 = arith.constant 0 : index
    %c0_5 = arith.constant 0 : index
    %2 = vector.load %arg2[%c0_3, %c0_4, %c0_5] : memref<1x8x128xf32, #tpu.memory_space<vmem>>, vector<1x8x128xf32>
    %3 = vector.shape_cast %2 : vector<1x8x128xf32> to vector<8x128xf32>
    %4 = vector.broadcast %1 : vector<8x1xf32> to vector<8x128xf32>
    %5 = arith.mulf %4, %3 : vector<8x128xf32>
    %c0_6 = arith.constant 0 : index
    %c1 = arith.constant 1 : index
    %6 = vector.load %arg3[%c0_6, %c1] : memref<8x2xf32, #tpu.memory_space<vmem>>, vector<8x1xf32>
    %7 = vector.broadcast %6 : vector<8x1xf32> to vector<8x128xf32>
    %8 = arith.addf %5, %7 : vector<8x128xf32>
    %cst = arith.constant 0.000000e+00 : f32
    %9 = vector.broadcast %cst : f32 to vector<8x128xf32>
    %10 = arith.cmpf oge, %8, %9 : vector<8x128xf32>
    %11 = vector.broadcast %0 : f32 to vector<8x128xf32>
    %12 = arith.mulf %11, %8 : vector<8x128xf32>
    %13 = arith.select %10, %8, %12 : vector<8x128xi1>, vector<8x128xf32>
    %c0_7 = arith.constant 0 : index
    %c0_8 = arith.constant 0 : index
    %c0_9 = arith.constant 0 : index
    %14 = vector.load %arg5[%c0_7, %c0_8, %c0_9] : memref<1x8x128xf32, #tpu.memory_space<vmem>>, vector<1x8x128xf32>
    %15 = vector.shape_cast %14 : vector<1x8x128xf32> to vector<8x128xf32>
    %16 = vector.shape_cast %13 : vector<8x128xf32> to vector<1x8x128xf32>
    tpu.vector_store %arg5[%c0_7, %c0_8, %c0_9], %16 {strides = array<i32>} : memref<1x8x128xf32, #tpu.memory_space<vmem>>, vector<1x8x128xf32>,
    return
  }
  func.func @transform_0(%arg0: i32, %arg1: i32) -> (i32, i32, i32) {
    %c0_i32 = arith.constant 0 : i32
    %c0_i32_0 = arith.constant 0 : i32
    return %arg0, %c0_i32, %arg1 : i32, i32, i32
  }
  func.func @transform_1(%arg0: i32, %arg1: i32) -> (i32, i32) {
    %c0_i32 = arith.constant 0 : i32
    %c0_i32_0 = arith.constant 0 : i32
    %c0_i32_1 = arith.constant 0 : i32
    return %c0_i32, %c0_i32_0 : i32, i32
  }
  func.func @transform_2(%arg0: i32, %arg1: i32) -> (i32, i32) {
    %c0_i32 = arith.constant 0 : i32
    %c0_i32_0 = arith.constant 0 : i32
    %c0_i32_1 = arith.constant 0 : i32
    return %c0_i32, %c0_i32_0 : i32, i32
  }
  func.func @transform_3(%arg0: i32, %arg1: i32) -> (i32, i32, i32) {
    %c0_i32 = arith.constant 0 : i32
    %c0_i32_0 = arith.constant 0 : i32
    return %arg0, %c0_i32, %arg1 : i32, i32, i32
  }
}

module attributes {stable_mosaic.version = 11 : i64} {
  func.func @_stats_kernel(%arg0: i32, %arg1: memref<1x8x384xf32, #tpu.memory_space<vmem>>, %arg2: memref<8x384xf32, #tpu.memory_space<vmem>>, %arg3: memref<8x9xf32, #tpu.memory_space<vmem>>, %arg4: memref<1x8x8xf32, #tpu.memory_space<vmem>>) attributes {dimension_semantics = [#tpu.dimension_semantics<parallel>], iteration_bounds = array<i64: 2>, scalar_prefetch = 0 : i64, scratch_operands = 0 : i64, tpu.core_type = #tpu.core_type<tc>, window_params = [{transform_indices = @transform_0, window_bounds = array<i64: 1, 8, 384>}, {pipeline_mode = #tpu.pipeline_mode<synchronous>, transform_indices = @transform_1, window_bounds = array<i64: 8, 384>}, {pipeline_mode = #tpu.pipeline_mode<synchronous>, transform_indices = @transform_2, window_bounds = array<i64: 8, 9>}, {transform_indices = @transform_3, window_bounds = array<i64: 1, 8, 8>}]} {
    %cst = arith.constant 0.000000e+00 : f32
    %0 = vector.broadcast %cst : f32 to vector<8x256xf32>
    %cst_0 = arith.constant 0.000000e+00 : f32
    %1 = vector.broadcast %cst_0 : f32 to vector<8x256xf32>
    %c0 = arith.constant 0 : index
    %c0_1 = arith.constant 0 : index
    %2 = vector.load %arg3[%c0, %c0_1] : memref<8x9xf32, #tpu.memory_space<vmem>>, vector<8x1xf32>
    %c0_2 = arith.constant 0 : index
    %c0_3 = arith.constant 0 : index
    %c15 = arith.constant 15 : index
    %3 = vector.load %arg1[%c0_2, %c0_3, %c15] : memref<1x8x384xf32, #tpu.memory_space<vmem>>, vector<1x8x256xf32>
    %4 = vector.shape_cast %3 : vector<1x8x256xf32> to vector<8x256xf32>
    %c0_4 = arith.constant 0 : index
    %c15_5 = arith.constant 15 : index
    %5 = vector.load %arg2[%c0_4, %c15_5] : memref<8x384xf32, #tpu.memory_space<vmem>>, vector<1x256xf32>
    %c1 = arith.constant 1 : index
    %c15_6 = arith.constant 15 : index
    %6 = vector.load %arg2[%c1, %c15_6] : memref<8x384xf32, #tpu.memory_space<vmem>>, vector<1x256xf32>
    %7 = vector.broadcast %6 : vector<1x256xf32> to vector<8x256xf32>
    %8 = arith.mulf %4, %7 : vector<8x256xf32>
    %9 = arith.mulf %5, %6 : vector<1x256xf32>
    %10 = vector.broadcast %2 : vector<8x1xf32> to vector<8x256xf32>
    %11 = arith.mulf %10, %8 : vector<8x256xf32>
    %12 = arith.addf %0, %11 : vector<8x256xf32>
    %13 = vector.broadcast %2 : vector<8x1xf32> to vector<8x256xf32>
    %14 = vector.broadcast %9 : vector<1x256xf32> to vector<8x256xf32>
    %15 = arith.mulf %13, %14 : vector<8x256xf32>
    %16 = arith.addf %1, %15 : vector<8x256xf32>
    %c0_7 = arith.constant 0 : index
    %c1_8 = arith.constant 1 : index
    %17 = vector.load %arg3[%c0_7, %c1_8] : memref<8x9xf32, #tpu.memory_space<vmem>>, vector<8x1xf32>
    %c0_9 = arith.constant 0 : index
    %c0_10 = arith.constant 0 : index
    %c16 = arith.constant 16 : index
    %18 = vector.load %arg1[%c0_9, %c0_10, %c16] : memref<1x8x384xf32, #tpu.memory_space<vmem>>, vector<1x8x256xf32>
    %19 = vector.shape_cast %18 : vector<1x8x256xf32> to vector<8x256xf32>
    %c0_11 = arith.constant 0 : index
    %c16_12 = arith.constant 16 : index
    %20 = vector.load %arg2[%c0_11, %c16_12] : memref<8x384xf32, #tpu.memory_space<vmem>>, vector<1x256xf32>
    %21 = vector.broadcast %17 : vector<8x1xf32> to vector<8x256xf32>
    %22 = arith.mulf %21, %19 : vector<8x256xf32>
    %23 = arith.addf %12, %22 : vector<8x256xf32>
    %24 = vector.broadcast %17 : vector<8x1xf32> to vector<8x256xf32>
    %25 = vector.broadcast %20 : vector<1x256xf32> to vector<8x256xf32>
    %26 = arith.mulf %24, %25 : vector<8x256xf32>
    %27 = arith.addf %16, %26 : vector<8x256xf32>
    %c0_13 = arith.constant 0 : index
    %c2 = arith.constant 2 : index
    %28 = vector.load %arg3[%c0_13, %c2] : memref<8x9xf32, #tpu.memory_space<vmem>>, vector<8x1xf32>
    %c0_14 = arith.constant 0 : index
    %c0_15 = arith.constant 0 : index
    %c17 = arith.constant 17 : index
    %29 = vector.load %arg1[%c0_14, %c0_15, %c17] : memref<1x8x384xf32, #tpu.memory_space<vmem>>, vector<1x8x256xf32>
    %30 = vector.shape_cast %29 : vector<1x8x256xf32> to vector<8x256xf32>
    %c0_16 = arith.constant 0 : index
    %c17_17 = arith.constant 17 : index
    %31 = vector.load %arg2[%c0_16, %c17_17] : memref<8x384xf32, #tpu.memory_space<vmem>>, vector<1x256xf32>
    %c2_18 = arith.constant 2 : index
    %c17_19 = arith.constant 17 : index
    %32 = vector.load %arg2[%c2_18, %c17_19] : memref<8x384xf32, #tpu.memory_space<vmem>>, vector<1x256xf32>
    %33 = vector.broadcast %32 : vector<1x256xf32> to vector<8x256xf32>
    %34 = arith.mulf %30, %33 : vector<8x256xf32>
    %35 = arith.mulf %31, %32 : vector<1x256xf32>
    %36 = vector.broadcast %28 : vector<8x1xf32> to vector<8x256xf32>
    %37 = arith.mulf %36, %34 : vector<8x256xf32>
    %38 = arith.addf %23, %37 : vector<8x256xf32>
    %39 = vector.broadcast %28 : vector<8x1xf32> to vector<8x256xf32>
    %40 = vector.broadcast %35 : vector<1x256xf32> to vector<8x256xf32>
    %41 = arith.mulf %39, %40 : vector<8x256xf32>
    %42 = arith.addf %27, %41 : vector<8x256xf32>
    %c0_20 = arith.constant 0 : index
    %c3 = arith.constant 3 : index
    %43 = vector.load %arg3[%c0_20, %c3] : memref<8x9xf32, #tpu.memory_space<vmem>>, vector<8x1xf32>
    %c0_21 = arith.constant 0 : index
    %c0_22 = arith.constant 0 : index
    %c31 = arith.constant 31 : index
    %44 = vector.load %arg1[%c0_21, %c0_22, %c31] : memref<1x8x384xf32, #tpu.memory_space<vmem>>, vector<1x8x256xf32>
    %45 = vector.shape_cast %44 : vector<1x8x256xf32> to vector<8x256xf32>
    %c0_23 = arith.constant 0 : index
    %c31_24 = arith.constant 31 : index
    %46 = vector.load %arg2[%c0_23, %c31_24] : memref<8x384xf32, #tpu.memory_space<vmem>>, vector<1x256xf32>
    %c1_25 = arith.constant 1 : index
    %c31_26 = arith.constant 31 : index
    %47 = vector.load %arg2[%c1_25, %c31_26] : memref<8x384xf32, #tpu.memory_space<vmem>>, vector<1x256xf32>
    %48 = vector.broadcast %47 : vector<1x256xf32> to vector<8x256xf32>
    %49 = arith.mulf %45, %48 : vector<8x256xf32>
    %50 = arith.mulf %46, %47 : vector<1x256xf32>
    %51 = vector.broadcast %43 : vector<8x1xf32> to vector<8x256xf32>
    %52 = arith.mulf %51, %49 : vector<8x256xf32>
    %53 = arith.addf %38, %52 : vector<8x256xf32>
    %54 = vector.broadcast %43 : vector<8x1xf32> to vector<8x256xf32>
    %55 = vector.broadcast %50 : vector<1x256xf32> to vector<8x256xf32>
    %56 = arith.mulf %54, %55 : vector<8x256xf32>
    %57 = arith.addf %42, %56 : vector<8x256xf32>
    %c0_27 = arith.constant 0 : index
    %c4 = arith.constant 4 : index
    %58 = vector.load %arg3[%c0_27, %c4] : memref<8x9xf32, #tpu.memory_space<vmem>>, vector<8x1xf32>
    %c0_28 = arith.constant 0 : index
    %c0_29 = arith.constant 0 : index
    %c32 = arith.constant 32 : index
    %59 = vector.load %arg1[%c0_28, %c0_29, %c32] : memref<1x8x384xf32, #tpu.memory_space<vmem>>, vector<1x8x256xf32>
    %60 = vector.shape_cast %59 : vector<1x8x256xf32> to vector<8x256xf32>
    %c0_30 = arith.constant 0 : index
    %c32_31 = arith.constant 32 : index
    %61 = vector.load %arg2[%c0_30, %c32_31] : memref<8x384xf32, #tpu.memory_space<vmem>>, vector<1x256xf32>
    %62 = vector.broadcast %58 : vector<8x1xf32> to vector<8x256xf32>
    %63 = arith.mulf %62, %60 : vector<8x256xf32>
    %64 = arith.addf %53, %63 : vector<8x256xf32>
    %65 = vector.broadcast %58 : vector<8x1xf32> to vector<8x256xf32>
    %66 = vector.broadcast %61 : vector<1x256xf32> to vector<8x256xf32>
    %67 = arith.mulf %65, %66 : vector<8x256xf32>
    %68 = arith.addf %57, %67 : vector<8x256xf32>
    %c0_32 = arith.constant 0 : index
    %c5 = arith.constant 5 : index
    %69 = vector.load %arg3[%c0_32, %c5] : memref<8x9xf32, #tpu.memory_space<vmem>>, vector<8x1xf32>
    %c0_33 = arith.constant 0 : index
    %c0_34 = arith.constant 0 : index
    %c33 = arith.constant 33 : index
    %70 = vector.load %arg1[%c0_33, %c0_34, %c33] : memref<1x8x384xf32, #tpu.memory_space<vmem>>, vector<1x8x256xf32>
    %71 = vector.shape_cast %70 : vector<1x8x256xf32> to vector<8x256xf32>
    %c0_35 = arith.constant 0 : index
    %c33_36 = arith.constant 33 : index
    %72 = vector.load %arg2[%c0_35, %c33_36] : memref<8x384xf32, #tpu.memory_space<vmem>>, vector<1x256xf32>
    %c2_37 = arith.constant 2 : index
    %c33_38 = arith.constant 33 : index
    %73 = vector.load %arg2[%c2_37, %c33_38] : memref<8x384xf32, #tpu.memory_space<vmem>>, vector<1x256xf32>
    %74 = vector.broadcast %73 : vector<1x256xf32> to vector<8x256xf32>
    %75 = arith.mulf %71, %74 : vector<8x256xf32>
    %76 = arith.mulf %72, %73 : vector<1x256xf32>
    %77 = vector.broadcast %69 : vector<8x1xf32> to vector<8x256xf32>
    %78 = arith.mulf %77, %75 : vector<8x256xf32>
    %79 = arith.addf %64, %78 : vector<8x256xf32>
    %80 = vector.broadcast %69 : vector<8x1xf32> to vector<8x256xf32>
    %81 = vector.broadcast %76 : vector<1x256xf32> to vector<8x256xf32>
    %82 = arith.mulf %80, %81 : vector<8x256xf32>
    %83 = arith.addf %68, %82 : vector<8x256xf32>
    %c0_39 = arith.constant 0 : index
    %c6 = arith.constant 6 : index
    %84 = vector.load %arg3[%c0_39, %c6] : memref<8x9xf32, #tpu.memory_space<vmem>>, vector<8x1xf32>
    %c0_40 = arith.constant 0 : index
    %c0_41 = arith.constant 0 : index
    %c47 = arith.constant 47 : index
    %85 = vector.load %arg1[%c0_40, %c0_41, %c47] : memref<1x8x384xf32, #tpu.memory_space<vmem>>, vector<1x8x256xf32>
    %86 = vector.shape_cast %85 : vector<1x8x256xf32> to vector<8x256xf32>
    %c0_42 = arith.constant 0 : index
    %c47_43 = arith.constant 47 : index
    %87 = vector.load %arg2[%c0_42, %c47_43] : memref<8x384xf32, #tpu.memory_space<vmem>>, vector<1x256xf32>
    %c1_44 = arith.constant 1 : index
    %c47_45 = arith.constant 47 : index
    %88 = vector.load %arg2[%c1_44, %c47_45] : memref<8x384xf32, #tpu.memory_space<vmem>>, vector<1x256xf32>
    %89 = vector.broadcast %88 : vector<1x256xf32> to vector<8x256xf32>
    %90 = arith.mulf %86, %89 : vector<8x256xf32>
    %91 = arith.mulf %87, %88 : vector<1x256xf32>
    %92 = vector.broadcast %84 : vector<8x1xf32> to vector<8x256xf32>
    %93 = arith.mulf %92, %90 : vector<8x256xf32>
    %94 = arith.addf %79, %93 : vector<8x256xf32>
    %95 = vector.broadcast %84 : vector<8x1xf32> to vector<8x256xf32>
    %96 = vector.broadcast %91 : vector<1x256xf32> to vector<8x256xf32>
    %97 = arith.mulf %95, %96 : vector<8x256xf32>
    %98 = arith.addf %83, %97 : vector<8x256xf32>
    %c0_46 = arith.constant 0 : index
    %c7 = arith.constant 7 : index
    %99 = vector.load %arg3[%c0_46, %c7] : memref<8x9xf32, #tpu.memory_space<vmem>>, vector<8x1xf32>
    %c0_47 = arith.constant 0 : index
    %c0_48 = arith.constant 0 : index
    %c48 = arith.constant 48 : index
    %100 = vector.load %arg1[%c0_47, %c0_48, %c48] : memref<1x8x384xf32, #tpu.memory_space<vmem>>, vector<1x8x256xf32>
    %101 = vector.shape_cast %100 : vector<1x8x256xf32> to vector<8x256xf32>
    %c0_49 = arith.constant 0 : index
    %c48_50 = arith.constant 48 : index
    %102 = vector.load %arg2[%c0_49, %c48_50] : memref<8x384xf32, #tpu.memory_space<vmem>>, vector<1x256xf32>
    %103 = vector.broadcast %99 : vector<8x1xf32> to vector<8x256xf32>
    %104 = arith.mulf %103, %101 : vector<8x256xf32>
    %105 = arith.addf %94, %104 : vector<8x256xf32>
    %106 = vector.broadcast %99 : vector<8x1xf32> to vector<8x256xf32>
    %107 = vector.broadcast %102 : vector<1x256xf32> to vector<8x256xf32>
    %108 = arith.mulf %106, %107 : vector<8x256xf32>
    %109 = arith.addf %98, %108 : vector<8x256xf32>
    %c0_51 = arith.constant 0 : index
    %c8 = arith.constant 8 : index
    %110 = vector.load %arg3[%c0_51, %c8] : memref<8x9xf32, #tpu.memory_space<vmem>>, vector<8x1xf32>
    %c0_52 = arith.constant 0 : index
    %c0_53 = arith.constant 0 : index
    %c49 = arith.constant 49 : index
    %111 = vector.load %arg1[%c0_52, %c0_53, %c49] : memref<1x8x384xf32, #tpu.memory_space<vmem>>, vector<1x8x256xf32>
    %112 = vector.shape_cast %111 : vector<1x8x256xf32> to vector<8x256xf32>
    %c0_54 = arith.constant 0 : index
    %c49_55 = arith.constant 49 : index
    %113 = vector.load %arg2[%c0_54, %c49_55] : memref<8x384xf32, #tpu.memory_space<vmem>>, vector<1x256xf32>
    %c2_56 = arith.constant 2 : index
    %c49_57 = arith.constant 49 : index
    %114 = vector.load %arg2[%c2_56, %c49_57] : memref<8x384xf32, #tpu.memory_space<vmem>>, vector<1x256xf32>
    %115 = vector.broadcast %114 : vector<1x256xf32> to vector<8x256xf32>
    %116 = arith.mulf %112, %115 : vector<8x256xf32>
    %117 = arith.mulf %113, %114 : vector<1x256xf32>
    %118 = vector.broadcast %110 : vector<8x1xf32> to vector<8x256xf32>
    %119 = arith.mulf %118, %116 : vector<8x256xf32>
    %120 = arith.addf %105, %119 : vector<8x256xf32>
    %121 = vector.broadcast %110 : vector<8x1xf32> to vector<8x256xf32>
    %122 = vector.broadcast %117 : vector<1x256xf32> to vector<8x256xf32>
    %123 = arith.mulf %121, %122 : vector<8x256xf32>
    %124 = arith.addf %109, %123 : vector<8x256xf32>
    %125 = tpu.iota {dimensions = array<i32: 1>} : vector<1x256xi32>
    %c256_i32 = arith.constant 256 : i32
    %126 = vector.broadcast %c256_i32 : i32 to vector<1x256xi32>
    %127 = arith.cmpi slt, %125, %126 : vector<1x256xi32>
    %128 = arith.extui %127 : vector<1x256xi1> to vector<1x256xi32>
    %129 = arith.sitofp %128 : vector<1x256xi32> to vector<1x256xf32>
    %130 = vector.broadcast %129 : vector<1x256xf32> to vector<8x256xf32>
    %131 = arith.mulf %120, %130 : vector<8x256xf32>
    %c0_58 = arith.constant 0 : index
    %c0_59 = arith.constant 0 : index
    %c0_60 = arith.constant 0 : index
    %132 = vector.load %arg1[%c0_58, %c0_59, %c0_60] : memref<1x8x384xf32, #tpu.memory_space<vmem>>, vector<1x8x384xf32>
    %133 = vector.shape_cast %132 : vector<1x8x384xf32> to vector<8x384xf32>
    %cst_61 = arith.constant dense<0.000000e+00> : vector<8xf32>
    %134 = vector.multi_reduction <add>, %133, %cst_61 [1] : vector<8x384xf32> to vector<8xf32>
    %135 = vector.shape_cast %134 : vector<8xf32> to vector<8x1xf32>
    %c0_62 = arith.constant 0 : index
    %c0_63 = arith.constant 0 : index
    %c0_64 = arith.constant 0 : index
    %136 = vector.load %arg4[%c0_62, %c0_63, %c0_64] : memref<1x8x8xf32, #tpu.memory_space<vmem>>, vector<1x8x1xf32>
    %137 = vector.shape_cast %136 : vector<1x8x1xf32> to vector<8x1xf32>
    %138 = vector.shape_cast %135 : vector<8x1xf32> to vector<1x8x1xf32>
    tpu.vector_store %arg4[%c0_62, %c0_63, %c0_64], %138 {strides = array<i32>} : memref<1x8x8xf32, #tpu.memory_space<vmem>>, vector<1x8x1xf32>,
    %139 = arith.mulf %133, %133 : vector<8x384xf32>
    %cst_65 = arith.constant dense<0.000000e+00> : vector<8xf32>
    %140 = vector.multi_reduction <add>, %139, %cst_65 [1] : vector<8x384xf32> to vector<8xf32>
    %141 = vector.shape_cast %140 : vector<8xf32> to vector<8x1xf32>
    %c0_66 = arith.constant 0 : index
    %c0_67 = arith.constant 0 : index
    %c1_68 = arith.constant 1 : index
    %142 = vector.load %arg4[%c0_66, %c0_67, %c1_68] : memref<1x8x8xf32, #tpu.memory_space<vmem>>, vector<1x8x1xf32>
    %143 = vector.shape_cast %142 : vector<1x8x1xf32> to vector<8x1xf32>
    %144 = vector.shape_cast %141 : vector<8x1xf32> to vector<1x8x1xf32>
    tpu.vector_store %arg4[%c0_66, %c0_67, %c1_68], %144 {strides = array<i32>} : memref<1x8x8xf32, #tpu.memory_space<vmem>>, vector<1x8x1xf32>,
    %cst_69 = arith.constant dense<0.000000e+00> : vector<8xf32>
    %145 = vector.multi_reduction <add>, %131, %cst_69 [1] : vector<8x256xf32> to vector<8xf32>
    %146 = vector.shape_cast %145 : vector<8xf32> to vector<8x1xf32>
    %c0_70 = arith.constant 0 : index
    %c0_71 = arith.constant 0 : index
    %c2_72 = arith.constant 2 : index
    %147 = vector.load %arg4[%c0_70, %c0_71, %c2_72] : memref<1x8x8xf32, #tpu.memory_space<vmem>>, vector<1x8x1xf32>
    %148 = vector.shape_cast %147 : vector<1x8x1xf32> to vector<8x1xf32>
    %149 = vector.shape_cast %146 : vector<8x1xf32> to vector<1x8x1xf32>
    tpu.vector_store %arg4[%c0_70, %c0_71, %c2_72], %149 {strides = array<i32>} : memref<1x8x8xf32, #tpu.memory_space<vmem>>, vector<1x8x1xf32>,
    %150 = arith.mulf %131, %120 : vector<8x256xf32>
    %cst_73 = arith.constant dense<0.000000e+00> : vector<8xf32>
    %151 = vector.multi_reduction <add>, %150, %cst_73 [1] : vector<8x256xf32> to vector<8xf32>
    %152 = vector.shape_cast %151 : vector<8xf32> to vector<8x1xf32>
    %c0_74 = arith.constant 0 : index
    %c0_75 = arith.constant 0 : index
    %c3_76 = arith.constant 3 : index
    %153 = vector.load %arg4[%c0_74, %c0_75, %c3_76] : memref<1x8x8xf32, #tpu.memory_space<vmem>>, vector<1x8x1xf32>
    %154 = vector.shape_cast %153 : vector<1x8x1xf32> to vector<8x1xf32>
    %155 = vector.shape_cast %152 : vector<8x1xf32> to vector<1x8x1xf32>
    tpu.vector_store %arg4[%c0_74, %c0_75, %c3_76], %155 {strides = array<i32>} : memref<1x8x8xf32, #tpu.memory_space<vmem>>, vector<1x8x1xf32>,
    %156 = arith.mulf %131, %124 : vector<8x256xf32>
    %cst_77 = arith.constant dense<0.000000e+00> : vector<8xf32>
    %157 = vector.multi_reduction <add>, %156, %cst_77 [1] : vector<8x256xf32> to vector<8xf32>
    %158 = vector.shape_cast %157 : vector<8xf32> to vector<8x1xf32>
    %c0_78 = arith.constant 0 : index
    %c0_79 = arith.constant 0 : index
    %c4_80 = arith.constant 4 : index
    %159 = vector.load %arg4[%c0_78, %c0_79, %c4_80] : memref<1x8x8xf32, #tpu.memory_space<vmem>>, vector<1x8x1xf32>
    %160 = vector.shape_cast %159 : vector<1x8x1xf32> to vector<8x1xf32>
    %161 = vector.shape_cast %158 : vector<8x1xf32> to vector<1x8x1xf32>
    tpu.vector_store %arg4[%c0_78, %c0_79, %c4_80], %161 {strides = array<i32>} : memref<1x8x8xf32, #tpu.memory_space<vmem>>, vector<1x8x1xf32>,
    %cst_81 = arith.constant 0.000000e+00 : f32
    %162 = vector.broadcast %cst_81 : f32 to vector<8x3xf32>
    %c0_82 = arith.constant 0 : index
    %c0_83 = arith.constant 0 : index
    %c5_84 = arith.constant 5 : index
    %163 = vector.load %arg4[%c0_82, %c0_83, %c5_84] : memref<1x8x8xf32, #tpu.memory_space<vmem>>, vector<1x8x3xf32>
    %164 = vector.shape_cast %163 : vector<1x8x3xf32> to vector<8x3xf32>
    %165 = vector.shape_cast %162 : vector<8x3xf32> to vector<1x8x3xf32>
    tpu.vector_store %arg4[%c0_82, %c0_83, %c5_84], %165 {strides = array<i32>} : memref<1x8x8xf32, #tpu.memory_space<vmem>>, vector<1x8x3xf32>,
    return
  }
  func.func @transform_0(%arg0: i32) -> (i32, i32, i32) {
    %c0_i32 = arith.constant 0 : i32
    %c0_i32_0 = arith.constant 0 : i32
    %c0_i32_1 = arith.constant 0 : i32
    return %arg0, %c0_i32, %c0_i32_0 : i32, i32, i32
  }
  func.func @transform_1(%arg0: i32) -> (i32, i32) {
    %c0_i32 = arith.constant 0 : i32
    %c0_i32_0 = arith.constant 0 : i32
    %c0_i32_1 = arith.constant 0 : i32
    return %c0_i32, %c0_i32_0 : i32, i32
  }
  func.func @transform_2(%arg0: i32) -> (i32, i32) {
    %c0_i32 = arith.constant 0 : i32
    %c0_i32_0 = arith.constant 0 : i32
    %c0_i32_1 = arith.constant 0 : i32
    return %c0_i32, %c0_i32_0 : i32, i32
  }
  func.func @transform_3(%arg0: i32) -> (i32, i32, i32) {
    %c0_i32 = arith.constant 0 : i32
    %c0_i32_0 = arith.constant 0 : i32
    %c0_i32_1 = arith.constant 0 : i32
    return %arg0, %c0_i32, %c0_i32_0 : i32, i32, i32
  }
}

module attributes {stable_mosaic.version = 11 : i64} {
  func.func @_apply_kernel(%arg0: i32, %arg1: memref<1x8x384xf32, #tpu.memory_space<vmem>>, %arg2: memref<8x384xf32, #tpu.memory_space<vmem>>, %arg3: memref<8x19xf32, #tpu.memory_space<vmem>>, %arg4: memref<8x8xf32, #tpu.memory_space<vmem>>, %arg5: memref<1x8x256xf32, #tpu.memory_space<vmem>>, %arg6: memref<1x8x8xf32, #tpu.memory_space<vmem>>) attributes {dimension_semantics = [#tpu.dimension_semantics<parallel>], iteration_bounds = array<i64: 2>, scalar_prefetch = 0 : i64, scratch_operands = 0 : i64, tpu.core_type = #tpu.core_type<tc>, window_params = [{transform_indices = @transform_0, window_bounds = array<i64: 1, 8, 384>}, {pipeline_mode = #tpu.pipeline_mode<synchronous>, transform_indices = @transform_1, window_bounds = array<i64: 8, 384>}, {pipeline_mode = #tpu.pipeline_mode<synchronous>, transform_indices = @transform_2, window_bounds = array<i64: 8, 19>}, {pipeline_mode = #tpu.pipeline_mode<synchronous>, transform_indices = @transform_3, window_bounds = array<i64: 8, 8>}, {transform_indices = @transform_4, window_bounds = array<i64: 1, 8, 256>}, {transform_indices = @transform_5, window_bounds = array<i64: 1, 8, 8>}]} {
    %cst = arith.constant 0.000000e+00 : f32
    %0 = vector.broadcast %cst : f32 to vector<8x256xf32>
    %c0 = arith.constant 0 : index
    %c0_0 = arith.constant 0 : index
    %c15 = arith.constant 15 : index
    %1 = vector.load %arg1[%c0, %c0_0, %c15] : memref<1x8x384xf32, #tpu.memory_space<vmem>>, vector<1x8x256xf32>
    %2 = vector.shape_cast %1 : vector<1x8x256xf32> to vector<8x256xf32>
    %c0_1 = arith.constant 0 : index
    %c15_2 = arith.constant 15 : index
    %3 = vector.load %arg2[%c0_1, %c15_2] : memref<8x384xf32, #tpu.memory_space<vmem>>, vector<1x256xf32>
    %c1 = arith.constant 1 : index
    %c15_3 = arith.constant 15 : index
    %4 = vector.load %arg2[%c1, %c15_3] : memref<8x384xf32, #tpu.memory_space<vmem>>, vector<1x256xf32>
    %5 = vector.broadcast %4 : vector<1x256xf32> to vector<8x256xf32>
    %6 = arith.mulf %2, %5 : vector<8x256xf32>
    %7 = arith.mulf %3, %4 : vector<1x256xf32>
    %c0_4 = arith.constant 0 : index
    %c0_5 = arith.constant 0 : index
    %8 = vector.load %arg3[%c0_4, %c0_5] : memref<8x19xf32, #tpu.memory_space<vmem>>, vector<8x1xf32>
    %9 = vector.broadcast %8 : vector<8x1xf32> to vector<8x256xf32>
    %10 = arith.mulf %9, %6 : vector<8x256xf32>
    %11 = arith.addf %0, %10 : vector<8x256xf32>
    %c0_6 = arith.constant 0 : index
    %c9 = arith.constant 9 : index
    %12 = vector.load %arg3[%c0_6, %c9] : memref<8x19xf32, #tpu.memory_space<vmem>>, vector<8x1xf32>
    %13 = vector.broadcast %12 : vector<8x1xf32> to vector<8x256xf32>
    %14 = vector.broadcast %7 : vector<1x256xf32> to vector<8x256xf32>
    %15 = arith.mulf %13, %14 : vector<8x256xf32>
    %16 = arith.addf %11, %15 : vector<8x256xf32>
    %c0_7 = arith.constant 0 : index
    %c0_8 = arith.constant 0 : index
    %c16 = arith.constant 16 : index
    %17 = vector.load %arg1[%c0_7, %c0_8, %c16] : memref<1x8x384xf32, #tpu.memory_space<vmem>>, vector<1x8x256xf32>
    %18 = vector.shape_cast %17 : vector<1x8x256xf32> to vector<8x256xf32>
    %c0_9 = arith.constant 0 : index
    %c16_10 = arith.constant 16 : index
    %19 = vector.load %arg2[%c0_9, %c16_10] : memref<8x384xf32, #tpu.memory_space<vmem>>, vector<1x256xf32>
    %c0_11 = arith.constant 0 : index
    %c1_12 = arith.constant 1 : index
    %20 = vector.load %arg3[%c0_11, %c1_12] : memref<8x19xf32, #tpu.memory_space<vmem>>, vector<8x1xf32>
    %21 = vector.broadcast %20 : vector<8x1xf32> to vector<8x256xf32>
    %22 = arith.mulf %21, %18 : vector<8x256xf32>
    %23 = arith.addf %16, %22 : vector<8x256xf32>
    %c0_13 = arith.constant 0 : index
    %c10 = arith.constant 10 : index
    %24 = vector.load %arg3[%c0_13, %c10] : memref<8x19xf32, #tpu.memory_space<vmem>>, vector<8x1xf32>
    %25 = vector.broadcast %24 : vector<8x1xf32> to vector<8x256xf32>
    %26 = vector.broadcast %19 : vector<1x256xf32> to vector<8x256xf32>
    %27 = arith.mulf %25, %26 : vector<8x256xf32>
    %28 = arith.addf %23, %27 : vector<8x256xf32>
    %c0_14 = arith.constant 0 : index
    %c0_15 = arith.constant 0 : index
    %c17 = arith.constant 17 : index
    %29 = vector.load %arg1[%c0_14, %c0_15, %c17] : memref<1x8x384xf32, #tpu.memory_space<vmem>>, vector<1x8x256xf32>
    %30 = vector.shape_cast %29 : vector<1x8x256xf32> to vector<8x256xf32>
    %c0_16 = arith.constant 0 : index
    %c17_17 = arith.constant 17 : index
    %31 = vector.load %arg2[%c0_16, %c17_17] : memref<8x384xf32, #tpu.memory_space<vmem>>, vector<1x256xf32>
    %c2 = arith.constant 2 : index
    %c17_18 = arith.constant 17 : index
    %32 = vector.load %arg2[%c2, %c17_18] : memref<8x384xf32, #tpu.memory_space<vmem>>, vector<1x256xf32>
    %33 = vector.broadcast %32 : vector<1x256xf32> to vector<8x256xf32>
    %34 = arith.mulf %30, %33 : vector<8x256xf32>
    %35 = arith.mulf %31, %32 : vector<1x256xf32>
    %c0_19 = arith.constant 0 : index
    %c2_20 = arith.constant 2 : index
    %36 = vector.load %arg3[%c0_19, %c2_20] : memref<8x19xf32, #tpu.memory_space<vmem>>, vector<8x1xf32>
    %37 = vector.broadcast %36 : vector<8x1xf32> to vector<8x256xf32>
    %38 = arith.mulf %37, %34 : vector<8x256xf32>
    %39 = arith.addf %28, %38 : vector<8x256xf32>
    %c0_21 = arith.constant 0 : index
    %c11 = arith.constant 11 : index
    %40 = vector.load %arg3[%c0_21, %c11] : memref<8x19xf32, #tpu.memory_space<vmem>>, vector<8x1xf32>
    %41 = vector.broadcast %40 : vector<8x1xf32> to vector<8x256xf32>
    %42 = vector.broadcast %35 : vector<1x256xf32> to vector<8x256xf32>
    %43 = arith.mulf %41, %42 : vector<8x256xf32>
    %44 = arith.addf %39, %43 : vector<8x256xf32>
    %c0_22 = arith.constant 0 : index
    %c0_23 = arith.constant 0 : index
    %c31 = arith.constant 31 : index
    %45 = vector.load %arg1[%c0_22, %c0_23, %c31] : memref<1x8x384xf32, #tpu.memory_space<vmem>>, vector<1x8x256xf32>
    %46 = vector.shape_cast %45 : vector<1x8x256xf32> to vector<8x256xf32>
    %c0_24 = arith.constant 0 : index
    %c31_25 = arith.constant 31 : index
    %47 = vector.load %arg2[%c0_24, %c31_25] : memref<8x384xf32, #tpu.memory_space<vmem>>, vector<1x256xf32>
    %c1_26 = arith.constant 1 : index
    %c31_27 = arith.constant 31 : index
    %48 = vector.load %arg2[%c1_26, %c31_27] : memref<8x384xf32, #tpu.memory_space<vmem>>, vector<1x256xf32>
    %49 = vector.broadcast %48 : vector<1x256xf32> to vector<8x256xf32>
    %50 = arith.mulf %46, %49 : vector<8x256xf32>
    %51 = arith.mulf %47, %48 : vector<1x256xf32>
    %c0_28 = arith.constant 0 : index
    %c3 = arith.constant 3 : index
    %52 = vector.load %arg3[%c0_28, %c3] : memref<8x19xf32, #tpu.memory_space<vmem>>, vector<8x1xf32>
    %53 = vector.broadcast %52 : vector<8x1xf32> to vector<8x256xf32>
    %54 = arith.mulf %53, %50 : vector<8x256xf32>
    %55 = arith.addf %44, %54 : vector<8x256xf32>
    %c0_29 = arith.constant 0 : index
    %c12 = arith.constant 12 : index
    %56 = vector.load %arg3[%c0_29, %c12] : memref<8x19xf32, #tpu.memory_space<vmem>>, vector<8x1xf32>
    %57 = vector.broadcast %56 : vector<8x1xf32> to vector<8x256xf32>
    %58 = vector.broadcast %51 : vector<1x256xf32> to vector<8x256xf32>
    %59 = arith.mulf %57, %58 : vector<8x256xf32>
    %60 = arith.addf %55, %59 : vector<8x256xf32>
    %c0_30 = arith.constant 0 : index
    %c0_31 = arith.constant 0 : index
    %c32 = arith.constant 32 : index
    %61 = vector.load %arg1[%c0_30, %c0_31, %c32] : memref<1x8x384xf32, #tpu.memory_space<vmem>>, vector<1x8x256xf32>
    %62 = vector.shape_cast %61 : vector<1x8x256xf32> to vector<8x256xf32>
    %c0_32 = arith.constant 0 : index
    %c32_33 = arith.constant 32 : index
    %63 = vector.load %arg2[%c0_32, %c32_33] : memref<8x384xf32, #tpu.memory_space<vmem>>, vector<1x256xf32>
    %c0_34 = arith.constant 0 : index
    %c4 = arith.constant 4 : index
    %64 = vector.load %arg3[%c0_34, %c4] : memref<8x19xf32, #tpu.memory_space<vmem>>, vector<8x1xf32>
    %65 = vector.broadcast %64 : vector<8x1xf32> to vector<8x256xf32>
    %66 = arith.mulf %65, %62 : vector<8x256xf32>
    %67 = arith.addf %60, %66 : vector<8x256xf32>
    %c0_35 = arith.constant 0 : index
    %c13 = arith.constant 13 : index
    %68 = vector.load %arg3[%c0_35, %c13] : memref<8x19xf32, #tpu.memory_space<vmem>>, vector<8x1xf32>
    %69 = vector.broadcast %68 : vector<8x1xf32> to vector<8x256xf32>
    %70 = vector.broadcast %63 : vector<1x256xf32> to vector<8x256xf32>
    %71 = arith.mulf %69, %70 : vector<8x256xf32>
    %72 = arith.addf %67, %71 : vector<8x256xf32>
    %c0_36 = arith.constant 0 : index
    %c0_37 = arith.constant 0 : index
    %c33 = arith.constant 33 : index
    %73 = vector.load %arg1[%c0_36, %c0_37, %c33] : memref<1x8x384xf32, #tpu.memory_space<vmem>>, vector<1x8x256xf32>
    %74 = vector.shape_cast %73 : vector<1x8x256xf32> to vector<8x256xf32>
    %c0_38 = arith.constant 0 : index
    %c33_39 = arith.constant 33 : index
    %75 = vector.load %arg2[%c0_38, %c33_39] : memref<8x384xf32, #tpu.memory_space<vmem>>, vector<1x256xf32>
    %c2_40 = arith.constant 2 : index
    %c33_41 = arith.constant 33 : index
    %76 = vector.load %arg2[%c2_40, %c33_41] : memref<8x384xf32, #tpu.memory_space<vmem>>, vector<1x256xf32>
    %77 = vector.broadcast %76 : vector<1x256xf32> to vector<8x256xf32>
    %78 = arith.mulf %74, %77 : vector<8x256xf32>
    %79 = arith.mulf %75, %76 : vector<1x256xf32>
    %c0_42 = arith.constant 0 : index
    %c5 = arith.constant 5 : index
    %80 = vector.load %arg3[%c0_42, %c5] : memref<8x19xf32, #tpu.memory_space<vmem>>, vector<8x1xf32>
    %81 = vector.broadcast %80 : vector<8x1xf32> to vector<8x256xf32>
    %82 = arith.mulf %81, %78 : vector<8x256xf32>
    %83 = arith.addf %72, %82 : vector<8x256xf32>
    %c0_43 = arith.constant 0 : index
    %c14 = arith.constant 14 : index
    %84 = vector.load %arg3[%c0_43, %c14] : memref<8x19xf32, #tpu.memory_space<vmem>>, vector<8x1xf32>
    %85 = vector.broadcast %84 : vector<8x1xf32> to vector<8x256xf32>
    %86 = vector.broadcast %79 : vector<1x256xf32> to vector<8x256xf32>
    %87 = arith.mulf %85, %86 : vector<8x256xf32>
    %88 = arith.addf %83, %87 : vector<8x256xf32>
    %c0_44 = arith.constant 0 : index
    %c0_45 = arith.constant 0 : index
    %c47 = arith.constant 47 : index
    %89 = vector.load %arg1[%c0_44, %c0_45, %c47] : memref<1x8x384xf32, #tpu.memory_space<vmem>>, vector<1x8x256xf32>
    %90 = vector.shape_cast %89 : vector<1x8x256xf32> to vector<8x256xf32>
    %c0_46 = arith.constant 0 : index
    %c47_47 = arith.constant 47 : index
    %91 = vector.load %arg2[%c0_46, %c47_47] : memref<8x384xf32, #tpu.memory_space<vmem>>, vector<1x256xf32>
    %c1_48 = arith.constant 1 : index
    %c47_49 = arith.constant 47 : index
    %92 = vector.load %arg2[%c1_48, %c47_49] : memref<8x384xf32, #tpu.memory_space<vmem>>, vector<1x256xf32>
    %93 = vector.broadcast %92 : vector<1x256xf32> to vector<8x256xf32>
    %94 = arith.mulf %90, %93 : vector<8x256xf32>
    %95 = arith.mulf %91, %92 : vector<1x256xf32>
    %c0_50 = arith.constant 0 : index
    %c6 = arith.constant 6 : index
    %96 = vector.load %arg3[%c0_50, %c6] : memref<8x19xf32, #tpu.memory_space<vmem>>, vector<8x1xf32>
    %97 = vector.broadcast %96 : vector<8x1xf32> to vector<8x256xf32>
    %98 = arith.mulf %97, %94 : vector<8x256xf32>
    %99 = arith.addf %88, %98 : vector<8x256xf32>
    %c0_51 = arith.constant 0 : index
    %c15_52 = arith.constant 15 : index
    %100 = vector.load %arg3[%c0_51, %c15_52] : memref<8x19xf32, #tpu.memory_space<vmem>>, vector<8x1xf32>
    %101 = vector.broadcast %100 : vector<8x1xf32> to vector<8x256xf32>
    %102 = vector.broadcast %95 : vector<1x256xf32> to vector<8x256xf32>
    %103 = arith.mulf %101, %102 : vector<8x256xf32>
    %104 = arith.addf %99, %103 : vector<8x256xf32>
    %c0_53 = arith.constant 0 : index
    %c0_54 = arith.constant 0 : index
    %c48 = arith.constant 48 : index
    %105 = vector.load %arg1[%c0_53, %c0_54, %c48] : memref<1x8x384xf32, #tpu.memory_space<vmem>>, vector<1x8x256xf32>
    %106 = vector.shape_cast %105 : vector<1x8x256xf32> to vector<8x256xf32>
    %c0_55 = arith.constant 0 : index
    %c48_56 = arith.constant 48 : index
    %107 = vector.load %arg2[%c0_55, %c48_56] : memref<8x384xf32, #tpu.memory_space<vmem>>, vector<1x256xf32>
    %c0_57 = arith.constant 0 : index
    %c7 = arith.constant 7 : index
    %108 = vector.load %arg3[%c0_57, %c7] : memref<8x19xf32, #tpu.memory_space<vmem>>, vector<8x1xf32>
    %109 = vector.broadcast %108 : vector<8x1xf32> to vector<8x256xf32>
    %110 = arith.mulf %109, %106 : vector<8x256xf32>
    %111 = arith.addf %104, %110 : vector<8x256xf32>
    %c0_58 = arith.constant 0 : index
    %c16_59 = arith.constant 16 : index
    %112 = vector.load %arg3[%c0_58, %c16_59] : memref<8x19xf32, #tpu.memory_space<vmem>>, vector<8x1xf32>
    %113 = vector.broadcast %112 : vector<8x1xf32> to vector<8x256xf32>
    %114 = vector.broadcast %107 : vector<1x256xf32> to vector<8x256xf32>
    %115 = arith.mulf %113, %114 : vector<8x256xf32>
    %116 = arith.addf %111, %115 : vector<8x256xf32>
    %c0_60 = arith.constant 0 : index
    %c0_61 = arith.constant 0 : index
    %c49 = arith.constant 49 : index
    %117 = vector.load %arg1[%c0_60, %c0_61, %c49] : memref<1x8x384xf32, #tpu.memory_space<vmem>>, vector<1x8x256xf32>
    %118 = vector.shape_cast %117 : vector<1x8x256xf32> to vector<8x256xf32>
    %c0_62 = arith.constant 0 : index
    %c49_63 = arith.constant 49 : index
    %119 = vector.load %arg2[%c0_62, %c49_63] : memref<8x384xf32, #tpu.memory_space<vmem>>, vector<1x256xf32>
    %c2_64 = arith.constant 2 : index
    %c49_65 = arith.constant 49 : index
    %120 = vector.load %arg2[%c2_64, %c49_65] : memref<8x384xf32, #tpu.memory_space<vmem>>, vector<1x256xf32>
    %121 = vector.broadcast %120 : vector<1x256xf32> to vector<8x256xf32>
    %122 = arith.mulf %118, %121 : vector<8x256xf32>
    %123 = arith.mulf %119, %120 : vector<1x256xf32>
    %c0_66 = arith.constant 0 : index
    %c8 = arith.constant 8 : index
    %124 = vector.load %arg3[%c0_66, %c8] : memref<8x19xf32, #tpu.memory_space<vmem>>, vector<8x1xf32>
    %125 = vector.broadcast %124 : vector<8x1xf32> to vector<8x256xf32>
    %126 = arith.mulf %125, %122 : vector<8x256xf32>
    %127 = arith.addf %116, %126 : vector<8x256xf32>
    %c0_67 = arith.constant 0 : index
    %c17_68 = arith.constant 17 : index
    %128 = vector.load %arg3[%c0_67, %c17_68] : memref<8x19xf32, #tpu.memory_space<vmem>>, vector<8x1xf32>
    %129 = vector.broadcast %128 : vector<8x1xf32> to vector<8x256xf32>
    %130 = vector.broadcast %123 : vector<1x256xf32> to vector<8x256xf32>
    %131 = arith.mulf %129, %130 : vector<8x256xf32>
    %132 = arith.addf %127, %131 : vector<8x256xf32>
    %c0_69 = arith.constant 0 : index
    %c18 = arith.constant 18 : index
    %133 = vector.load %arg3[%c0_69, %c18] : memref<8x19xf32, #tpu.memory_space<vmem>>, vector<8x1xf32>
    %134 = vector.broadcast %133 : vector<8x1xf32> to vector<8x256xf32>
    %135 = arith.addf %132, %134 : vector<8x256xf32>
    %cst_70 = arith.constant 5.000000e-01 : f32
    %136 = vector.broadcast %cst_70 : f32 to vector<8x256xf32>
    %137 = arith.mulf %136, %135 : vector<8x256xf32>
    %cst_71 = arith.constant 0.707106769 : f32
    %138 = vector.broadcast %cst_71 : f32 to vector<8x256xf32>
    %139 = arith.mulf %135, %138 : vector<8x256xf32>
    %cst_72 = arith.constant 0.000000e+00 : f32
    %140 = vector.broadcast %cst_72 : f32 to vector<8x256xf32>
    %141 = arith.cmpf oge, %139, %140 : vector<8x256xf32>
    %cst_73 = arith.constant 1.000000e+00 : f32
    %cst_74 = arith.constant -1.000000e+00 : f32
    %142 = vector.broadcast %cst_73 : f32 to vector<8x256xf32>
    %143 = vector.broadcast %cst_74 : f32 to vector<8x256xf32>
    %144 = arith.select %141, %142, %143 : vector<8x256xi1>, vector<8x256xf32>
    %145 = math.absf %139 : vector<8x256xf32>
    %cst_75 = arith.constant 0.327591091 : f32
    %146 = vector.broadcast %cst_75 : f32 to vector<8x256xf32>
    %147 = arith.mulf %146, %145 : vector<8x256xf32>
    %cst_76 = arith.constant 1.000000e+00 : f32
    %148 = vector.broadcast %cst_76 : f32 to vector<8x256xf32>
    %149 = arith.addf %148, %147 : vector<8x256xf32>
    %cst_77 = arith.constant 1.000000e+00 : f32
    %150 = vector.broadcast %cst_77 : f32 to vector<8x256xf32>
    %151 = arith.divf %150, %149 : vector<8x256xf32>
    %cst_78 = arith.constant 1.06140542 : f32
    %152 = vector.broadcast %cst_78 : f32 to vector<8x256xf32>
    %153 = arith.mulf %152, %151 : vector<8x256xf32>
    %cst_79 = arith.constant -1.45315206 : f32
    %154 = vector.broadcast %cst_79 : f32 to vector<8x256xf32>
    %155 = arith.addf %153, %154 : vector<8x256xf32>
    %156 = arith.mulf %155, %151 : vector<8x256xf32>
    %cst_80 = arith.constant 1.42141378 : f32
    %157 = vector.broadcast %cst_80 : f32 to vector<8x256xf32>
    %158 = arith.addf %156, %157 : vector<8x256xf32>
    %159 = arith.mulf %158, %151 : vector<8x256xf32>
    %cst_81 = arith.constant -0.284496725 : f32
    %160 = vector.broadcast %cst_81 : f32 to vector<8x256xf32>
    %161 = arith.addf %159, %160 : vector<8x256xf32>
    %162 = arith.mulf %161, %151 : vector<8x256xf32>
    %cst_82 = arith.constant 0.254829586 : f32
    %163 = vector.broadcast %cst_82 : f32 to vector<8x256xf32>
    %164 = arith.addf %162, %163 : vector<8x256xf32>
    %165 = arith.mulf %164, %151 : vector<8x256xf32>
    %cst_83 = arith.constant 0.000000e+00 : f32
    %166 = vector.broadcast %cst_83 : f32 to vector<8x256xf32>
    %167 = arith.subf %166, %145 : vector<8x256xf32>
    %168 = arith.mulf %167, %145 : vector<8x256xf32>
    %169 = math.exp %168 : vector<8x256xf32>
    %170 = arith.mulf %165, %169 : vector<8x256xf32>
    %cst_84 = arith.constant 1.000000e+00 : f32
    %171 = vector.broadcast %cst_84 : f32 to vector<8x256xf32>
    %172 = arith.subf %171, %170 : vector<8x256xf32>
    %173 = arith.mulf %144, %172 : vector<8x256xf32>
    %cst_85 = arith.constant 1.000000e+00 : f32
    %174 = vector.broadcast %cst_85 : f32 to vector<8x256xf32>
    %175 = arith.addf %174, %173 : vector<8x256xf32>
    %176 = arith.mulf %137, %175 : vector<8x256xf32>
    %c0_86 = arith.constant 0 : index
    %c0_87 = arith.constant 0 : index
    %177 = vector.load %arg4[%c0_86, %c0_87] : memref<8x8xf32, #tpu.memory_space<vmem>>, vector<8x8xf32>
    %cst_88 = arith.constant 0.000000e+00 : f32
    %178 = vector.broadcast %cst_88 : f32 to vector<8x256xf32>
    %179 = vector.extract_strided_slice %177 {offsets = [0, 0], sizes = [8, 1], strides = [1, 1]} : vector<8x8xf32> to vector<8x1xf32>
    %180 = vector.extract_strided_slice %176 {offsets = [0, 0], sizes = [1, 256], strides = [1, 1]} : vector<8x256xf32> to vector<1x256xf32>
    %181 = vector.broadcast %179 : vector<8x1xf32> to vector<8x256xf32>
    %182 = vector.broadcast %180 : vector<1x256xf32> to vector<8x256xf32>
    %183 = arith.mulf %181, %182 : vector<8x256xf32>
    %184 = arith.addf %178, %183 : vector<8x256xf32>
    %185 = vector.extract_strided_slice %177 {offsets = [0, 1], sizes = [8, 1], strides = [1, 1]} : vector<8x8xf32> to vector<8x1xf32>
    %186 = vector.extract_strided_slice %176 {offsets = [1, 0], sizes = [1, 256], strides = [1, 1]} : vector<8x256xf32> to vector<1x256xf32>
    %187 = vector.broadcast %185 : vector<8x1xf32> to vector<8x256xf32>
    %188 = vector.broadcast %186 : vector<1x256xf32> to vector<8x256xf32>
    %189 = arith.mulf %187, %188 : vector<8x256xf32>
    %190 = arith.addf %184, %189 : vector<8x256xf32>
    %191 = vector.extract_strided_slice %177 {offsets = [0, 2], sizes = [8, 1], strides = [1, 1]} : vector<8x8xf32> to vector<8x1xf32>
    %192 = vector.extract_strided_slice %176 {offsets = [2, 0], sizes = [1, 256], strides = [1, 1]} : vector<8x256xf32> to vector<1x256xf32>
    %193 = vector.broadcast %191 : vector<8x1xf32> to vector<8x256xf32>
    %194 = vector.broadcast %192 : vector<1x256xf32> to vector<8x256xf32>
    %195 = arith.mulf %193, %194 : vector<8x256xf32>
    %196 = arith.addf %190, %195 : vector<8x256xf32>
    %197 = vector.extract_strided_slice %177 {offsets = [0, 3], sizes = [8, 1], strides = [1, 1]} : vector<8x8xf32> to vector<8x1xf32>
    %198 = vector.extract_strided_slice %176 {offsets = [3, 0], sizes = [1, 256], strides = [1, 1]} : vector<8x256xf32> to vector<1x256xf32>
    %199 = vector.broadcast %197 : vector<8x1xf32> to vector<8x256xf32>
    %200 = vector.broadcast %198 : vector<1x256xf32> to vector<8x256xf32>
    %201 = arith.mulf %199, %200 : vector<8x256xf32>
    %202 = arith.addf %196, %201 : vector<8x256xf32>
    %203 = vector.extract_strided_slice %177 {offsets = [0, 4], sizes = [8, 1], strides = [1, 1]} : vector<8x8xf32> to vector<8x1xf32>
    %204 = vector.extract_strided_slice %176 {offsets = [4, 0], sizes = [1, 256], strides = [1, 1]} : vector<8x256xf32> to vector<1x256xf32>
    %205 = vector.broadcast %203 : vector<8x1xf32> to vector<8x256xf32>
    %206 = vector.broadcast %204 : vector<1x256xf32> to vector<8x256xf32>
    %207 = arith.mulf %205, %206 : vector<8x256xf32>
    %208 = arith.addf %202, %207 : vector<8x256xf32>
    %209 = vector.extract_strided_slice %177 {offsets = [0, 5], sizes = [8, 1], strides = [1, 1]} : vector<8x8xf32> to vector<8x1xf32>
    %210 = vector.extract_strided_slice %176 {offsets = [5, 0], sizes = [1, 256], strides = [1, 1]} : vector<8x256xf32> to vector<1x256xf32>
    %211 = vector.broadcast %209 : vector<8x1xf32> to vector<8x256xf32>
    %212 = vector.broadcast %210 : vector<1x256xf32> to vector<8x256xf32>
    %213 = arith.mulf %211, %212 : vector<8x256xf32>
    %214 = arith.addf %208, %213 : vector<8x256xf32>
    %215 = vector.extract_strided_slice %177 {offsets = [0, 6], sizes = [8, 1], strides = [1, 1]} : vector<8x8xf32> to vector<8x1xf32>
    %216 = vector.extract_strided_slice %176 {offsets = [6, 0], sizes = [1, 256], strides = [1, 1]} : vector<8x256xf32> to vector<1x256xf32>
    %217 = vector.broadcast %215 : vector<8x1xf32> to vector<8x256xf32>
    %218 = vector.broadcast %216 : vector<1x256xf32> to vector<8x256xf32>
    %219 = arith.mulf %217, %218 : vector<8x256xf32>
    %220 = arith.addf %214, %219 : vector<8x256xf32>
    %221 = vector.extract_strided_slice %177 {offsets = [0, 7], sizes = [8, 1], strides = [1, 1]} : vector<8x8xf32> to vector<8x1xf32>
    %222 = vector.extract_strided_slice %176 {offsets = [7, 0], sizes = [1, 256], strides = [1, 1]} : vector<8x256xf32> to vector<1x256xf32>
    %223 = vector.broadcast %221 : vector<8x1xf32> to vector<8x256xf32>
    %224 = vector.broadcast %222 : vector<1x256xf32> to vector<8x256xf32>
    %225 = arith.mulf %223, %224 : vector<8x256xf32>
    %226 = arith.addf %220, %225 : vector<8x256xf32>
    %c0_89 = arith.constant 0 : index
    %c0_90 = arith.constant 0 : index
    %c0_91 = arith.constant 0 : index
    %227 = vector.load %arg5[%c0_89, %c0_90, %c0_91] : memref<1x8x256xf32, #tpu.memory_space<vmem>>, vector<1x8x256xf32>
    %228 = vector.shape_cast %227 : vector<1x8x256xf32> to vector<8x256xf32>
    %229 = vector.shape_cast %226 : vector<8x256xf32> to vector<1x8x256xf32>
    tpu.vector_store %arg5[%c0_89, %c0_90, %c0_91], %229 {strides = array<i32>} : memref<1x8x256xf32, #tpu.memory_space<vmem>>, vector<1x8x256xf32>,
    %230 = tpu.iota {dimensions = array<i32: 1>} : vector<1x256xi32>
    %c256_i32 = arith.constant 256 : i32
    %231 = vector.broadcast %c256_i32 : i32 to vector<1x256xi32>
    %232 = arith.cmpi slt, %230, %231 : vector<1x256xi32>
    %233 = arith.extui %232 : vector<1x256xi1> to vector<1x256xi32>
    %234 = arith.sitofp %233 : vector<1x256xi32> to vector<1x256xf32>
    %235 = vector.broadcast %234 : vector<1x256xf32> to vector<8x256xf32>
    %236 = arith.mulf %226, %235 : vector<8x256xf32>
    %cst_92 = arith.constant dense<0.000000e+00> : vector<8xf32>
    %237 = vector.multi_reduction <add>, %236, %cst_92 [1] : vector<8x256xf32> to vector<8xf32>
    %238 = vector.shape_cast %237 : vector<8xf32> to vector<8x1xf32>
    %c0_93 = arith.constant 0 : index
    %c0_94 = arith.constant 0 : index
    %c0_95 = arith.constant 0 : index
    %239 = vector.load %arg6[%c0_93, %c0_94, %c0_95] : memref<1x8x8xf32, #tpu.memory_space<vmem>>, vector<1x8x1xf32>
    %240 = vector.shape_cast %239 : vector<1x8x1xf32> to vector<8x1xf32>
    %241 = vector.shape_cast %238 : vector<8x1xf32> to vector<1x8x1xf32>
    tpu.vector_store %arg6[%c0_93, %c0_94, %c0_95], %241 {strides = array<i32>} : memref<1x8x8xf32, #tpu.memory_space<vmem>>, vector<1x8x1xf32>,
    %242 = arith.mulf %236, %226 : vector<8x256xf32>
    %cst_96 = arith.constant dense<0.000000e+00> : vector<8xf32>
    %243 = vector.multi_reduction <add>, %242, %cst_96 [1] : vector<8x256xf32> to vector<8xf32>
    %244 = vector.shape_cast %243 : vector<8xf32> to vector<8x1xf32>
    %c0_97 = arith.constant 0 : index
    %c0_98 = arith.constant 0 : index
    %c1_99 = arith.constant 1 : index
    %245 = vector.load %arg6[%c0_97, %c0_98, %c1_99] : memref<1x8x8xf32, #tpu.memory_space<vmem>>, vector<1x8x1xf32>
    %246 = vector.shape_cast %245 : vector<1x8x1xf32> to vector<8x1xf32>
    %247 = vector.shape_cast %244 : vector<8x1xf32> to vector<1x8x1xf32>
    tpu.vector_store %arg6[%c0_97, %c0_98, %c1_99], %247 {strides = array<i32>} : memref<1x8x8xf32, #tpu.memory_space<vmem>>, vector<1x8x1xf32>,
    %cst_100 = arith.constant 0.000000e+00 : f32
    %248 = vector.broadcast %cst_100 : f32 to vector<8x6xf32>
    %c0_101 = arith.constant 0 : index
    %c0_102 = arith.constant 0 : index
    %c2_103 = arith.constant 2 : index
    %249 = vector.load %arg6[%c0_101, %c0_102, %c2_103] : memref<1x8x8xf32, #tpu.memory_space<vmem>>, vector<1x8x6xf32>
    %250 = vector.shape_cast %249 : vector<1x8x6xf32> to vector<8x6xf32>
    %251 = vector.shape_cast %248 : vector<8x6xf32> to vector<1x8x6xf32>
    tpu.vector_store %arg6[%c0_101, %c0_102, %c2_103], %251 {strides = array<i32>} : memref<1x8x8xf32, #tpu.memory_space<vmem>>, vector<1x8x6xf32>,
    return
  }
  func.func @transform_0(%arg0: i32) -> (i32, i32, i32) {
    %c0_i32 = arith.constant 0 : i32
    %c0_i32_0 = arith.constant 0 : i32
    %c0_i32_1 = arith.constant 0 : i32
    return %arg0, %c0_i32, %c0_i32_0 : i32, i32, i32
  }
  func.func @transform_1(%arg0: i32) -> (i32, i32) {
    %c0_i32 = arith.constant 0 : i32
    %c0_i32_0 = arith.constant 0 : i32
    %c0_i32_1 = arith.constant 0 : i32
    return %c0_i32, %c0_i32_0 : i32, i32
  }
  func.func @transform_2(%arg0: i32) -> (i32, i32) {
    %c0_i32 = arith.constant 0 : i32
    %c0_i32_0 = arith.constant 0 : i32
    %c0_i32_1 = arith.constant 0 : i32
    return %c0_i32, %c0_i32_0 : i32, i32
  }
  func.func @transform_3(%arg0: i32) -> (i32, i32) {
    %c0_i32 = arith.constant 0 : i32
    %c0_i32_0 = arith.constant 0 : i32
    %c0_i32_1 = arith.constant 0 : i32
    return %c0_i32, %c0_i32_0 : i32, i32
  }
  func.func @transform_4(%arg0: i32) -> (i32, i32, i32) {
    %c0_i32 = arith.constant 0 : i32
    %c0_i32_0 = arith.constant 0 : i32
    %c0_i32_1 = arith.constant 0 : i32
    return %arg0, %c0_i32, %c0_i32_0 : i32, i32, i32
  }
  func.func @transform_5(%arg0: i32) -> (i32, i32, i32) {
    %c0_i32 = arith.constant 0 : i32
    %c0_i32_0 = arith.constant 0 : i32
    %c0_i32_1 = arith.constant 0 : i32
    return %arg0, %c0_i32, %c0_i32_0 : i32, i32, i32
  }
}

module attributes {stable_mosaic.version = 11 : i64} {
  func.func @_finalize_kernel(%arg0: i32, %arg1: i32, %arg2: memref<1x8x256xf32, #tpu.memory_space<vmem>>, %arg3: memref<8x2xf32, #tpu.memory_space<vmem>>, %arg4: memref<1x1xf32, #tpu.memory_space<smem>>, %arg5: memref<1x8x256xf32, #tpu.memory_space<vmem>>) attributes {dimension_semantics = [#tpu.dimension_semantics<parallel>, #tpu.dimension_semantics<parallel>], iteration_bounds = array<i64: 2, 1>, scalar_prefetch = 0 : i64, scratch_operands = 0 : i64, tpu.core_type = #tpu.core_type<tc>, window_params = [{transform_indices = @transform_0, window_bounds = array<i64: 1, 8, 256>}, {pipeline_mode = #tpu.pipeline_mode<synchronous>, transform_indices = @transform_1, window_bounds = array<i64: 8, 2>}, {transform_indices = @transform_2, window_bounds = array<i64: 1, 1>}, {transform_indices = @transform_3, window_bounds = array<i64: 1, 8, 256>}]} {
    %c0 = arith.constant 0 : index
    %c0_0 = arith.constant 0 : index
    %0 = memref.load %arg4[%c0, %c0_0] : memref<1x1xf32, #tpu.memory_space<smem>>
    %c0_1 = arith.constant 0 : index
    %c0_2 = arith.constant 0 : index
    %1 = vector.load %arg3[%c0_1, %c0_2] : memref<8x2xf32, #tpu.memory_space<vmem>>, vector<8x1xf32>
    %c0_3 = arith.constant 0 : index
    %c0_4 = arith.constant 0 : index
    %c0_5 = arith.constant 0 : index
    %2 = vector.load %arg2[%c0_3, %c0_4, %c0_5] : memref<1x8x256xf32, #tpu.memory_space<vmem>>, vector<1x8x256xf32>
    %3 = vector.shape_cast %2 : vector<1x8x256xf32> to vector<8x256xf32>
    %4 = vector.broadcast %1 : vector<8x1xf32> to vector<8x256xf32>
    %5 = arith.mulf %4, %3 : vector<8x256xf32>
    %c0_6 = arith.constant 0 : index
    %c1 = arith.constant 1 : index
    %6 = vector.load %arg3[%c0_6, %c1] : memref<8x2xf32, #tpu.memory_space<vmem>>, vector<8x1xf32>
    %7 = vector.broadcast %6 : vector<8x1xf32> to vector<8x256xf32>
    %8 = arith.addf %5, %7 : vector<8x256xf32>
    %cst = arith.constant 0.000000e+00 : f32
    %9 = vector.broadcast %cst : f32 to vector<8x256xf32>
    %10 = arith.cmpf oge, %8, %9 : vector<8x256xf32>
    %11 = vector.broadcast %0 : f32 to vector<8x256xf32>
    %12 = arith.mulf %11, %8 : vector<8x256xf32>
    %13 = arith.select %10, %8, %12 : vector<8x256xi1>, vector<8x256xf32>
    %c0_7 = arith.constant 0 : index
    %c0_8 = arith.constant 0 : index
    %c0_9 = arith.constant 0 : index
    %14 = vector.load %arg5[%c0_7, %c0_8, %c0_9] : memref<1x8x256xf32, #tpu.memory_space<vmem>>, vector<1x8x256xf32>
    %15 = vector.shape_cast %14 : vector<1x8x256xf32> to vector<8x256xf32>
    %16 = vector.shape_cast %13 : vector<8x256xf32> to vector<1x8x256xf32>
    tpu.vector_store %arg5[%c0_7, %c0_8, %c0_9], %16 {strides = array<i32>} : memref<1x8x256xf32, #tpu.memory_space<vmem>>, vector<1x8x256xf32>,
    return
  }
  func.func @transform_0(%arg0: i32, %arg1: i32) -> (i32, i32, i32) {
    %c0_i32 = arith.constant 0 : i32
    %c0_i32_0 = arith.constant 0 : i32
    return %arg0, %c0_i32, %arg1 : i32, i32, i32
  }
  func.func @transform_1(%arg0: i32, %arg1: i32) -> (i32, i32) {
    %c0_i32 = arith.constant 0 : i32
    %c0_i32_0 = arith.constant 0 : i32
    %c0_i32_1 = arith.constant 0 : i32
    return %c0_i32, %c0_i32_0 : i32, i32
  }
  func.func @transform_2(%arg0: i32, %arg1: i32) -> (i32, i32) {
    %c0_i32 = arith.constant 0 : i32
    %c0_i32_0 = arith.constant 0 : i32
    %c0_i32_1 = arith.constant 0 : i32
    return %c0_i32, %c0_i32_0 : i32, i32
  }
  func.func @transform_3(%arg0: i32, %arg1: i32) -> (i32, i32, i32) {
    %c0_i32 = arith.constant 0 : i32
    %c0_i32_0 = arith.constant 0 : i32
    return %arg0, %c0_i32, %arg1 : i32, i32, i32
  }
}

</mosaic_0001>

<bundles_post_ra>
// kernel: first_octave_conv.9
= control target key start
LH: loop header
LB: loop body
LE: loop exit
PB: predicated region body
PF: predicated region fallthrough
CT: control target
= control target key end

     0   :  { %s664_s12 = smov 0   ;;  %s793_s0 = inlined_call_operand.vmem [shape: f32[2,8,256], index: 0, kind: input, shape index: {}]   ;;  %s794_s1 = inlined_call_operand.vmem [shape: f32[8,256], index: 1, kind: input, shape index: {}]   ;;  %s795_s2 = inlined_call_operand.vmem [shape: f32[8,9], index: 2, kind: input, shape index: {}]   ;;  %s796_s3 = inlined_call_operand.vmem [shape: f32[2,8,8], index: 3, kind: output, shape index: {}]  }
   0x1 LB: > { %s566_s13 = sadd.s32 4294967295, %s622_s12   ;;  %p570_p0 = scmp.ge.s32.totalorder %s622_s12, 1  ;;  %s622_s12 = sphi %s664_s12, %s13_s12  }
   0x2   : > { %p137_p1 = scmp.lt.s32.totalorder %s622_s12, 3 }
   0x4   : > { %p138_p2 = pnand %p570_p0, %p137_p1 }
   0x5   : > { %v169_v0 = vld [vmem:[%s795_s2] sm:$0xff] (!%p138_p2)  ;;  %v624_v1 = vmov (!%p138_p2), 1   ;;  %v625_v2 = vmov (!%p138_p2), 3   ;;  %v626_v3 = vmov (!%p138_p2), 2   ;;  %v627_v4 = vmov (!%p138_p2), 4   ;;  %p160_p3 = scmp.lt.s32.totalorder (!%p138_p2), %s566_s13, 1 }
   0x6   : > { %141 = sbr.rel (%p138_p2) target bundleno = 587 (0x24b), region = 32  ;;  %606 = vset.pattern.permute.xlu0 (!%p138_p2), %v624_v1  ;;  %608 = vset.pattern.permute.xlu1 (!%p138_p2), %v625_v2  ;;  %v628_v5 = vmov (!%p138_p2), 5   ;;  %v629_v6 = vmov (!%p138_p2), 6   ;;  %v630_v7 = vmov (!%p138_p2), 7   ;;  %v631_v8 = vmov (!%p138_p2), 0   ;;  %s633_s24 = smov (!%p138_p2), 127  }
   0x7   : > { %194 = vperm.xlu0 (!%p138_p2), %606, %v169_v0   ;;  %262 = vperm.xlu1 (!%p138_p2), %608, %v169_v0   ;;  %v632_v9 = vmov (!%p138_p2), 8   ;;  %v224_v11 = vld [vmem:[%s794_s1 + $0x2] ss:$0 sm:$0xff] (!%p138_p2)  ;;  %v225_v16 = vld [vmem:[%s794_s1 + $0xa] ss:$0 sm:$0xff] (!%p138_p2)  ;;  %s634_s29 = smov (!%p138_p2), 126   ;;  %v447_v61 = vlaneseq (!%p138_p2) }
   0x8   : > { %v174_v20 = vld [vmem:[%s794_s1 + $0x1] ss:$0 sm:$0xff] (!%p138_p2)  ;;  %v710_v22 = vld [vmem:[%s794_s1] ss:$0 sm:$0xff] (!%p138_p2)  ;;  %v720_v27 = vld [vmem:[%s794_s1 + $0x8] ss:$0 sm:$0xff] (!%p138_p2) }
   0x9   : > { %v175_v28 = vld [vmem:[%s794_s1 + $0x9] ss:$0 sm:$0xff] (!%p138_p2)  ;;  %v731_v32 = vmul.f32 (!%p138_p2), %v224_v11, %v710_v22  ;;  %s635_s7 = smov (!%p138_p2), 120   ;;  %v229_v35 = vmul.f32 (!%p138_p2), %v225_v16, %v720_v27  ;;  %v738_v39 = vmul.f32 (!%p138_p2), %v174_v20, %v710_v22  ;;  %s636_s8 = smov (!%p138_p2), 119   ;;  %vm205_vm1 = vcmask (!%p138_p2), 1039360  }
   0xa   : > { %v742_v42 = vmul.f32 (!%p138_p2), %v175_v28, %v720_v27  ;;  %s637_s9 = smov (!%p138_p2), 118   ;;  %s638_s10 = smov (!%p138_p2), 112   ;;  %vm242_vm2 = vcmask (!%p138_p2), 1031168   ;;  %vm273_vm3 = vcmask (!%p138_p2), 982016   ;;  %vm304_vm4 = vcmask (!%p138_p2), 973824  }
   0xb   : > { %607 = vset.pattern.permute.xlu0 (!%p138_p2), %v626_v3  ;;  %609 = vset.pattern.permute.xlu1 (!%p138_p2), %v627_v4  ;;  %s639_s11 = smov (!%p138_p2), 111   ;;  %s640_s14 = smov (!%p138_p2), 110   ;;  %v641_v4 = vmov (!%p138_p2), 0.0   ;;  %vm335_vm5 = vcmask (!%p138_p2), 965632   ;;  %vm366_vm6 = vcmask (!%p138_p2), 916480   ;;  %vm397_vm7 = vcmask (!%p138_p2), 908288  }
   0xc   : > { %231 = vperm.xlu0 (!%p138_p2), %607, %v169_v0   ;;  %293 = vperm.xlu1 (!%p138_p2), %609, %v169_v0   ;;  %s642_s15 = smov (!%p138_p2), 7   ;;  %vm428_vm8 = vcmask (!%p138_p2), 900096   ;;  %vm476_vm9 = vcmask (!%p138_p2), 990208   ;;  %vm461_vm10 = vcmask (!%p138_p2), 7168   ;;  %vm468_vm11 = vcmask (!%p138_p2), 15368  }
   0xd   : > { %s798_s13 = smov (!%p160_p3, %s566_s13), 1  ;;  %vm481_vm12 = vcmask 23568   ;;  %vm495_vm13 = vcmask 31768   ;;  %vm509_vm14 = vcmask 39968   ;;  %vm511_vm15 = vcmask 64552  }
   0xe   : > { %s577_s16 = sshll.u32 %s798_s13, 4  ;;  %s573_s17 = sshll.u32 %s798_s13, 3 }
   0xf   : > { %s164_s19 = scalar_lea.vmem %s793_s0, %s577_s16  ;;  %s643_s16 = smov 121  }
  0x10   : > { %610 = vset.pattern.permute.xlu1 %v628_v5  ;;  %611 = vset.pattern.permute.xlu0 %v629_v6  ;;  %v685_v10 = vld [vmem:[%s164_s19] sm:$0xff]  ;;  %v691_v14 = vld [vmem:[%s164_s19 + $0x8] sm:$0xff]  ;;  %s168_s20 = scalar_lea.vmem %s796_s3, %s573_s17 }
  0x11   : > { %324 = vperm.xlu1 %610, %v169_v0   ;;  %355 = vperm.xlu0 %611, %v169_v0   ;;  %v694_v15 = vmul.f32 %v224_v11, %v685_v10  ;;  %v701_v19 = vmul.f32 %v225_v16, %v691_v14  ;;  %v713_v23 = vmul.f32 %v174_v20, %v685_v10 }
  0x12   : > { %v728_v31 = vmul.f32 %v175_v28, %v691_v14 }
  0x15   : > { %612 = vset.pattern.permute.xlu1 %v630_v7  ;;  %614 = vset.pattern.permute.xlu0 %v631_v8 }
  0x16   : > { %386 = vperm.xlu1 %612, %v169_v0   ;;  %182 = vperm.xlu0 %614, %v169_v0  }
  0x1a   : > { %613 = vset.pattern.permute.xlu1 %v632_v9  ;;  %615 = vset.pattern.permute.xlu0 %v632_v9 }
  0x1b   : > { %417 = vperm.xlu1 %613, %v169_v0   ;;  %v448_v0 = vand.u32 127, %v447_v61 }
  0x1d   : > { %vm449_vm0 = vcmp.lt.s32.totalorder %v448_v0, 64 }
  0x1e   : > { %v574_v5 = vsel %vm449_vm0, 1.0, %v641_v4 }
  0x86   : > { %v195_v12 = vpop.permute.xlu0 %194  ;;  %v263_v25 = vpop.permute.xlu1 %262 }
  0x87   : > { %v197_v13 = vmul.f32 %v195_v12, %v685_v10  ;;  %v198_v18 = vmul.f32 %v195_v12, %v691_v14  ;;  %v211_v26 = vmul.f32 %v195_v12, %v710_v22  ;;  %v265_v29 = vmul.f32 %v263_v25, %v713_v23 }
  0x88   : > { %v212_v30 = vmul.f32 %v195_v12, %v720_v27  ;;  %v266_v33 = vmul.f32 %v263_v25, %v728_v31  ;;  %v279_v43 = vmul.f32 %v263_v25, %v738_v39  ;;  %v280_v45 = vmul.f32 %v263_v25, %v742_v42 }
  0x89   : > { %201 = vrot.lane.b32.xlu1 %v197_v13, %s633_s24 }
  0x8b   : > { %v232_v17 = vpop.permute.xlu0 %231  ;;  %v294_v34 = vpop.permute.xlu1 %293 }
  0x8c   : > { %v234_v21 = vmul.f32 %v232_v17, %v694_v15  ;;  %v235_v24 = vmul.f32 %v232_v17, %v701_v19  ;;  %v248_v36 = vmul.f32 %v232_v17, %v731_v32  ;;  %v296_v37 = vmul.f32 %v294_v34, %v685_v10 }
  0x8d   : > { %203 = vrot.lane.b32.xlu1 %v198_v18, %s633_s24  ;;  %v249_v38 = vmul.f32 %v232_v17, %v229_v35  ;;  %v297_v40 = vmul.f32 %v294_v34, %v691_v14  ;;  %v310_v48 = vmul.f32 %v294_v34, %v710_v22  ;;  %v311_v50 = vmul.f32 %v294_v34, %v720_v27 }
  0x8e   : > { %238 = vrot.lane.b32.xlu0 %v234_v21, %s634_s29 }
  0x90   : > { %v325_v41 = vpop.permute.xlu1 %324  ;;  %v356_v47 = vpop.permute.xlu0 %355 }
  0x91   : > { %240 = vrot.lane.b32.xlu1 %v235_v24, %s634_s29  ;;  %v327_v44 = vmul.f32 %v325_v41, %v694_v15  ;;  %v328_v46 = vmul.f32 %v325_v41, %v701_v19  ;;  %v358_v49 = vmul.f32 %v356_v47, %v713_v23  ;;  %v359_v51 = vmul.f32 %v356_v47, %v728_v31 }
  0x92   : > { %215 = vrot.lane.b32.xlu0 %v211_v26, %s633_s24  ;;  %v341_v53 = vmul.f32 %v325_v41, %v731_v32  ;;  %v342_v55 = vmul.f32 %v325_v41, %v229_v35  ;;  %v372_v58 = vmul.f32 %v356_v47, %v738_v39  ;;  %v373_v60 = vmul.f32 %v356_v47, %v742_v42 }
  0x95   : > { %217 = vrot.lane.b32.xlu1 %v212_v30, %s633_s24  ;;  %v387_v52 = vpop.permute.xlu1 %386  ;;  %v183_v6 = vpop.permute.xlu0 %182 }
  0x96   : > { %269 = vrot.lane.b32.xlu0 %v265_v29, %s635_s7  ;;  %v389_v54 = vmul.f32 %v387_v52, %v685_v10  ;;  %v390_v56 = vmul.f32 %v387_v52, %v691_v14  ;;  %v403_v63 = vmul.f32 %v387_v52, %v710_v22  ;;  %v404_v1 = vmul.f32 %v387_v52, %v720_v27 }
  0x97   : > { %v186_v34 = vmul.f32 %v183_v6, %v728_v31 }
  0x99   : > { %271 = vrot.lane.b32.xlu1 %v266_v33, %s635_s7 }
  0x9a   : > { %252 = vrot.lane.b32.xlu0 %v248_v36, %s634_s29  ;;  %v418_v57 = vpop.permute.xlu1 %417  ;;  %v185_v36 = vmul.f32 %v183_v6, %v713_v23 }
  0x9b   : > { %v420_v59 = vmul.f32 %v418_v57, %v694_v15  ;;  %v421_v62 = vmul.f32 %v418_v57, %v701_v19  ;;  %v434_v2 = vmul.f32 %v418_v57, %v731_v32  ;;  %v435_v3 = vmul.f32 %v418_v57, %v229_v35 }
  0x9d   : > { %254 = vrot.lane.b32.xlu1 %v249_v38, %s634_s29 }
  0x9e   : > { %300 = vrot.lane.b32.xlu0 %v296_v37, %s636_s8 }
  0xa1   : > { %302 = vrot.lane.b32.xlu1 %v297_v40, %s636_s8  ;;  %v190_v40 = vmul.f32 %v183_v6, %v742_v42 }
  0xa2   : > { %283 = vrot.lane.b32.xlu0 %v279_v43, %s635_s7 }
  0xa5   : > { %285 = vrot.lane.b32.xlu1 %v280_v45, %s635_s7 }
  0xa6   : > { %331 = vrot.lane.b32.xlu0 %v327_v44, %s637_s9 }
  0xa9   : > { %333 = vrot.lane.b32.xlu1 %v328_v46, %s637_s9  ;;  %v189_v46 = vmul.f32 %v183_v6, %v738_v39 }
  0xaa   : > { %314 = vrot.lane.b32.xlu0 %v310_v48, %s636_s8 }
  0xad   : > { %316 = vrot.lane.b32.xlu1 %v311_v50, %s636_s8 }
  0xae   : > { %362 = vrot.lane.b32.xlu0 %v358_v49, %s638_s10 }
  0xb1   : > { %364 = vrot.lane.b32.xlu1 %v359_v51, %s638_s10 }
  0xb2   : > { %345 = vrot.lane.b32.xlu0 %v341_v53, %s637_s9 }
  0xb5   : > { %347 = vrot.lane.b32.xlu1 %v342_v55, %s637_s9 }
  0xb6   : > { %393 = vrot.lane.b32.xlu0 %v389_v54, %s639_s11 }
  0xb9   : > { %395 = vrot.lane.b32.xlu1 %v390_v56, %s639_s11 }
  0xba   : > { %376 = vrot.lane.b32.xlu0 %v372_v58, %s638_s10 }
  0xbd   : > { %378 = vrot.lane.b32.xlu1 %v373_v60, %s638_s10 }
  0xbe   : > { %424 = vrot.lane.b32.xlu0 %v420_v59, %s640_s14 }
  0xc1   : > { %426 = vrot.lane.b32.xlu1 %v421_v62, %s640_s14 }
  0xc2   : > { %407 = vrot.lane.b32.xlu0 %v403_v63, %s639_s11 }
  0xc5   : > { %409 = vrot.lane.b32.xlu1 %v404_v1, %s639_s11 }
  0xc6   : > { %438 = vrot.lane.b32.xlu0 %v434_v2, %s640_s14 }
  0xc9   : > { %440 = vrot.lane.b32.xlu1 %v435_v3, %s640_s14 }
  0xca   : > { %453 = vrot.lane.b32.xlu0 %v574_v5, %s642_s15 }
  0xfb   : > { %v202_v7 = vpop.permute.xlu1 %201 }
  0xff   : > { %v204_v8 = vpop.permute.xlu1 %203 }
 0x100   : > { %v239_v9 = vpop.permute.xlu0 %238  ;;  %v206_v35 = vsel %vm205_vm1, %v202_v7, %v204_v8  ;;  %v210_v45 = vadd.f32 %v204_v8, %v186_v34 }
 0x101   : > { %v209_v44 = vadd.f32 %v206_v35, %v185_v36 }
 0x103   : > { %v241_v11 = vpop.permute.xlu1 %240 }
 0x104   : > { %v216_v12 = vpop.permute.xlu0 %215  ;;  %v243_v38 = vsel %vm242_vm2, %v239_v9, %v241_v11  ;;  %v247_v50 = vadd.f32 %v241_v11, %v210_v45 }
 0x105   : > { %v246_v49 = vadd.f32 %v243_v38, %v209_v44  ;;  %v464_v44 = vmul.f32 %v691_v14, %v691_v14 }
 0x107   : > { %v218_v13 = vpop.permute.xlu1 %217 }
 0x108   : > { %v270_v15 = vpop.permute.xlu0 %269  ;;  %v219_v41 = vsel %vm205_vm1, %v216_v12, %v218_v13  ;;  %v223_v47 = vadd.f32 %v218_v13, %v190_v40 }
 0x109   : > { %v222_v51 = vadd.f32 %v219_v41, %v189_v46  ;;  %v458_v46 = vadd.f32 %v691_v14, %v685_v10 }
 0x10b   : > { %v272_v16 = vpop.permute.xlu1 %271 }
 0x10c   : > { %v253_v17 = vpop.permute.xlu0 %252  ;;  %v274_v48 = vsel %vm273_vm3, %v270_v15, %v272_v16  ;;  %v278_v56 = vadd.f32 %v272_v16, %v247_v50 }
 0x10d   : > { %v277_v55 = vadd.f32 %v274_v48, %v246_v49 }
 0x10f   : > { %v255_v18 = vpop.permute.xlu1 %254 }
 0x110   : > { %v301_v19 = vpop.permute.xlu0 %300  ;;  %v256_v31 = vsel %vm242_vm2, %v253_v17, %v255_v18  ;;  %v260_v52 = vadd.f32 %v255_v18, %v223_v47 }
 0x111   : > { %v259_v57 = vadd.f32 %v256_v31, %v222_v51 }
 0x113   : > { %v303_v20 = vpop.permute.xlu1 %302 }
 0x114   : > { %v284_v21 = vpop.permute.xlu0 %283  ;;  %v305_v53 = vsel %vm304_vm4, %v301_v19, %v303_v20  ;;  %v309_v61 = vadd.f32 %v303_v20, %v278_v56 }
 0x115   : > { %v308_v60 = vadd.f32 %v305_v53, %v277_v55 }
 0x117   : > { %v286_v22 = vpop.permute.xlu1 %285 }
 0x118   : > { %v332_v24 = vpop.permute.xlu0 %331  ;;  %v287_v42 = vsel %vm273_vm3, %v284_v21, %v286_v22  ;;  %v291_v39 = vadd.f32 %v286_v22, %v260_v52 }
 0x119   : > { %v290_v62 = vadd.f32 %v287_v42, %v259_v57 }
 0x11b   : > { %v334_v25 = vpop.permute.xlu1 %333 }
 0x11c   : > { %v315_v26 = vpop.permute.xlu0 %314  ;;  %v336_v58 = vsel %vm335_vm5, %v332_v24, %v334_v25  ;;  %v340_v6 = vadd.f32 %v334_v25, %v309_v61 }
 0x11d   : > { %v339_v5 = vadd.f32 %v336_v58, %v308_v60 }
 0x11f   : > { %v317_v27 = vpop.permute.xlu1 %316 }
 0x120   : > { %v363_v28 = vpop.permute.xlu0 %362  ;;  %v318_v59 = vsel %vm304_vm4, %v315_v26, %v317_v27  ;;  %v322_v0 = vadd.f32 %v317_v27, %v291_v39 }
 0x121   : > { %v321_v7 = vadd.f32 %v318_v59, %v290_v62 }
 0x123   : > { %v365_v29 = vpop.permute.xlu1 %364 }
 0x124   : > { %v346_v30 = vpop.permute.xlu0 %345  ;;  %v367_v1 = vsel %vm366_vm6, %v363_v28, %v365_v29  ;;  %v371_v13 = vadd.f32 %v365_v29, %v340_v6 }
 0x125   : > { %v370_v12 = vadd.f32 %v367_v1, %v339_v5 }
 0x127   : > { %v348_v32 = vpop.permute.xlu1 %347 }
 0x128   : > { %v394_v33 = vpop.permute.xlu0 %393  ;;  %v349_v2 = vsel %vm335_vm5, %v346_v30, %v348_v32  ;;  %v353_v8 = vadd.f32 %v348_v32, %v322_v0 }
 0x129   : > { %v352_v15 = vadd.f32 %v349_v2, %v321_v7 }
 0x12b   : > { %v396_v37 = vpop.permute.xlu1 %395 }
 0x12c   : > { %v377_v43 = vpop.permute.xlu0 %376  ;;  %v398_v9 = vsel %vm397_vm7, %v394_v33, %v396_v37  ;;  %v402_v22 = vadd.f32 %v396_v37, %v371_v13 }
 0x12d   : > { %v401_v21 = vadd.f32 %v398_v9, %v370_v12 }
 0x12f   : > { %v379_v23 = vpop.permute.xlu1 %378 }
 0x130   : > { %v425_v54 = vpop.permute.xlu0 %424  ;;  %v380_v11 = vsel %vm366_vm6, %v377_v43, %v379_v23  ;;  %v384_v17 = vadd.f32 %v379_v23, %v353_v8  ;;  %v463_v43 = vmul.f32 %v685_v10, %v685_v10 }
 0x131   : > { %v383_v24 = vadd.f32 %v380_v11, %v352_v15 }
 0x132   : > { %v465_v45 = vadd.f32 %v464_v44, %v463_v43 }
 0x133   : > { %v427_v63 = vpop.permute.xlu1 %426 }
 0x134   : > { %v408_v3 = vpop.permute.xlu0 %407  ;;  %v429_v18 = vsel %vm428_vm8, %v425_v54, %v427_v63  ;;  %v433_v27 = vadd.f32 %v427_v63, %v402_v22 }
 0x135   : > { %v432_v26 = vadd.f32 %v429_v18, %v401_v21 }
 0x137   : > { %v410_v16 = vpop.permute.xlu1 %409 }
 0x138   : > { %v411_v19 = vsel %vm397_vm7, %v408_v3, %v410_v16  ;;  %v439_v20 = vpop.permute.xlu0 %438  ;;  %v415_v25 = vadd.f32 %v410_v16, %v384_v17 }
 0x139   : > { %v414_v28 = vadd.f32 %v411_v19, %v383_v24 }
 0x13b   : > { %v441_v30 = vpop.permute.xlu1 %440 }
 0x13c   : > { %v442_v32 = vsel %vm428_vm8, %v439_v20, %v441_v30  ;;  %v446_v33 = vadd.f32 %v441_v30, %v415_v25  ;;  %v454_v29 = vpop.permute.xlu0 %453 }
 0x13d   : > { %v445_v34 = vadd.f32 %v442_v32, %v414_v28  ;;  %v456_v35 = vmul.f32 %v454_v29, %v432_v26  ;;  %v457_v36 = vmul.f32 %v454_v29, %v433_v27 }
 0x13f   : > { %474 = vrot.lane.b32.xlu0 %v457_v36, %s643_s16  ;;  %472 = vrot.lane.b32.xlu1 %v456_v35, %s643_s16  ;;  %v498_v38 = vmul.f32 %v457_v36, %v446_v33  ;;  %v497_v40 = vmul.f32 %v456_v35, %v445_v34  ;;  %v484_v41 = vmul.f32 %v457_v36, %v433_v27 }
 0x140   : > { %v483_v37 = vmul.f32 %v456_v35, %v432_v26 }
 0x143   : > { %489 = vrot.lane.b32.xlu0 %v484_v41, %s643_s16  ;;  %487 = vrot.lane.b32.xlu1 %v483_v37, %s643_s16 }
 0x147   : > { %503 = vrot.lane.b32.xlu0 %v498_v38, %s643_s16  ;;  %501 = vrot.lane.b32.xlu1 %v497_v40, %s643_s16 }
 0x166   : > { %466 = vadd.xlane.f32.xlu0 %v465_v45 }
 0x16b   : > { %459 = vadd.xlane.f32.xlu1 %v458_v46 }
 0x1b1   : > { %v475_v47 = vpop.permute.xlu0 %474  ;;  %v473_v48 = vpop.permute.xlu1 %472 }
 0x1b2   : > { %v477_v31 = vsel %vm476_vm9, %v473_v48, %v475_v47 }
 0x1b3   : > { %479 = vadd.xlane.f32.xlu0 %v477_v31 }
 0x1b5   : > { %v490_v49 = vpop.permute.xlu0 %489  ;;  %v488_v50 = vpop.permute.xlu1 %487 }
 0x1b6   : > { %v491_v51 = vsel %vm476_vm9, %v488_v50, %v490_v49 }
 0x1b7   : > { %493 = vadd.xlane.f32.xlu1 %v491_v51 }
 0x1b9   : > { %v504_v23 = vpop.permute.xlu0 %503  ;;  %v502_v52 = vpop.permute.xlu1 %501 }
 0x1ba   : > { %v505_v53 = vsel %vm476_vm9, %v502_v52, %v504_v23 }
 0x1bb   : > { %507 = vadd.xlane.f32.xlu0 %v505_v53 }
 0x1f3   : > { %v467_v14 = vpop.xlane.xlu0 %466 }
 0x1f8   : > { %v460_v10 = vpop.xlane.xlu1 %459 }
 0x1f9   : > { %462 = vst.msk [vmem:[%s168_s20] sm:$0xff] %vm461_vm10, %v460_v10 }
 0x1fa   : > { %469 = vst.msk [vmem:[%s168_s20] sm:$0xff] %vm468_vm11, %v467_v14 }
 0x240   : > { %v480_v42 = vpop.xlane.xlu0 %479 }
 0x241   : > { %482 = vst.msk [vmem:[%s168_s20] sm:$0xff] %vm481_vm12, %v480_v42 }
 0x244   : > { %v494_v54 = vpop.xlane.xlu1 %493 }
 0x245   : > { %496 = vst.msk [vmem:[%s168_s20] sm:$0xff] %vm495_vm13, %v494_v54 }
 0x248   : > { %v508_v55 = vpop.xlane.xlu0 %507 }
 0x249   : > { %510 = vst.msk [vmem:[%s168_s20] sm:$0xff] %vm509_vm14, %v508_v55 }
 0x24a   : > { %512 = vst.msk [vmem:[%s168_s20] sm:$0xff] %vm511_vm15, %v641_v4 }
 0x24b PF: > { %s13_s12 = sadd.s32 1, %s622_s12  }
 0x24c   : > { %p10_p4 = scmp.ge.s32.totalorder %s13_s12, 4  }
 0x24e   :  { %12 = sbr.rel (!%p10_p4) target bundleno = 1 (0x1), region = 62 }

// kernel: first_octave_conv.10
= control target key start
LH: loop header
LB: loop body
LE: loop exit
PB: predicated region body
PF: predicated region fallthrough
CT: control target
= control target key end

     0   :  { %s1028_s18 = smov 0   ;;  %s1155_s0 = inlined_call_operand.vmem [shape: f32[2,8,256], index: 0, kind: input, shape index: {}]   ;;  %s1156_s1 = inlined_call_operand.vmem [shape: f32[8,256], index: 1, kind: input, shape index: {}]   ;;  %s1157_s2 = inlined_call_operand.vmem [shape: f32[8,19], index: 2, kind: input, shape index: {}]   ;;  %s1158_s3 = inlined_call_operand.vmem [shape: f32[8,8], index: 3, kind: input, shape index: {}]   ;;  %s1159_s4 = inlined_call_operand.vmem [shape: f32[2,8,128], index: 4, kind: output, shape index: {0}]   ;;  %s1160_s5 = inlined_call_operand.vmem [shape: f32[2,8,8], index: 5, kind: output, shape index: {1}]  }
   0x1 LB: > { %s871_s19 = sadd.s32 4294967295, %s965_s18   ;;  %p875_p0 = scmp.ge.s32.totalorder %s965_s18, 1  ;;  %s965_s18 = sphi %s1028_s18, %s16_s18  }
   0x2   : > { %p190_p1 = scmp.lt.s32.totalorder %s965_s18, 3 }
   0x4   : > { %p191_p2 = pnand %p875_p0, %p190_p1 }
   0x5   : > { %v244_v0 = vld [vmem:[%s1157_s2] sm:$0xff] (!%p191_p2)  ;;  %v967_v1 = vmov (!%p191_p2), 1   ;;  %v968_v2 = vmov (!%p191_p2), 2   ;;  %v969_v3 = vmov (!%p191_p2), 10   ;;  %v970_v4 = vmov (!%p191_p2), 11   ;;  %p221_p3 = scmp.lt.s32.totalorder (!%p191_p2), %s871_s19, 1 }
   0x6   : > { %194 = sbr.rel (%p191_p2) target bundleno = 660 (0x294), region = 36  ;;  %923 = vset.pattern.permute.xlu0 (!%p191_p2), %v967_v1  ;;  %925 = vset.pattern.permute.xlu1 (!%p191_p2), %v968_v2  ;;  %v971_v5 = vmov (!%p191_p2), 3   ;;  %v972_v6 = vmov (!%p191_p2), 12   ;;  %v973_v7 = vmov (!%p191_p2), 4   ;;  %v974_v8 = vmov (!%p191_p2), 5   ;;  %s986_s28 = smov (!%p191_p2), 127  }
   0x7   : > { %263 = vperm.xlu0 (!%p191_p2), %923, %v244_v0   ;;  %304 = vperm.xlu1 (!%p191_p2), %925, %v244_v0   ;;  %v975_v9 = vmov (!%p191_p2), 13   ;;  %v976_v10 = vmov (!%p191_p2), 15   ;;  %v977_v11 = vmov (!%p191_p2), 14   ;;  %v978_v12 = vmov (!%p191_p2), 8   ;;  %v297_v24 = vld [vmem:[%s1156_s1 + $0x2] ss:$0 sm:$0xff] (!%p191_p2) }
   0x8   : > { %v979_v13 = vmov (!%p191_p2), 6   ;;  %v980_v14 = vmov (!%p191_p2), 9   ;;  %v981_v15 = vmov (!%p191_p2), 7   ;;  %v982_v16 = vmov (!%p191_p2), 18   ;;  %v1066_v26 = vld [vmem:[%s1156_s1] ss:$0 sm:$0xff] (!%p191_p2) }
   0x9   : > { %v983_v17 = vmov (!%p191_p2), 16   ;;  %v984_v18 = vmov (!%p191_p2), 0   ;;  %v985_v19 = vmov (!%p191_p2), 17   ;;  %v1071_v27 = vld [vmem:[%s1156_s1 + $0x8] ss:$0 sm:$0xff] (!%p191_p2)  ;;  %v1084_v36 = vmul.f32 (!%p191_p2), %v297_v24, %v1066_v26  ;;  %s987_s12 = smov (!%p191_p2), 126  }
   0xa   : > { %v298_v32 = vld [vmem:[%s1156_s1 + $0xa] ss:$0 sm:$0xff] (!%p191_p2)  ;;  %v238_v38 = vld [vmem:[%s1156_s1 + $0x1] ss:$0 sm:$0xff] (!%p191_p2)  ;;  %v239_v42 = vld [vmem:[%s1156_s1 + $0x9] ss:$0 sm:$0xff] (!%p191_p2) }
   0xb   : > { %924 = vset.pattern.permute.xlu0 (!%p191_p2), %v969_v3  ;;  %926 = vset.pattern.permute.xlu1 (!%p191_p2), %v970_v4  ;;  %v1093_v39 = vmul.f32 (!%p191_p2), %v298_v32, %v1071_v27  ;;  %v242_v48 = vmul.f32 (!%p191_p2), %v238_v38, %v1066_v26  ;;  %v243_v52 = vmul.f32 (!%p191_p2), %v239_v42, %v1071_v27  ;;  %s988_s15 = smov (!%p191_p2), 120   ;;  %s989_s16 = smov (!%p191_p2), 119   ;;  %vm274_vm1 = vcmask (!%p191_p2), 1039360  }
   0xc   : > { %281 = vperm.xlu0 (!%p191_p2), %924, %v244_v0   ;;  %322 = vperm.xlu1 (!%p191_p2), %926, %v244_v0   ;;  %s990_s17 = smov (!%p191_p2), 118   ;;  %s991_s20 = smov (!%p191_p2), 112   ;;  %vm315_vm2 = vcmask (!%p191_p2), 1031168   ;;  %vm350_vm3 = vcmask (!%p191_p2), 982016   ;;  %vm385_vm4 = vcmask (!%p191_p2), 973824   ;;  %vm420_vm5 = vcmask (!%p191_p2), 965632  }
   0xd   : > { %s1162_s19 = smov (!%p221_p3, %s871_s19), 1  ;;  %s992_s21 = smov 111   ;;  %vm455_vm6 = vcmask 916480   ;;  %vm490_vm7 = vcmask 908288   ;;  %vm525_vm8 = vcmask 900096   ;;  %vm744_vm11 = vcmask 990208  }
   0xe   : > { %s883_s22 = sshll.u32 %s1162_s19, 4  ;;  %s997_s26 = smov 121   ;;  %vm769_vm12 = vcmask 7168   ;;  %vm783_vm13 = vcmask 15368   ;;  %vm785_vm14 = vcmask 64528  }
   0xf   : > { %s225_s25 = scalar_lea.vmem %s1155_s0, %s883_s22  ;;  %s993_s22 = smov 110  }
  0x10   : > { %927 = vset.pattern.permute.xlu1 %v971_v5  ;;  %928 = vset.pattern.permute.xlu0 %v972_v6  ;;  %v1055_v20 = vld [vmem:[%s225_s25] sm:$0xff]  ;;  %v1061_v25 = vld [vmem:[%s225_s25 + $0x8] sm:$0xff]  ;;  %s995_s25 = smov 7   ;;  %s878_s27 = sshll.u32 %s1162_s19, 3 }
  0x11   : > { %339 = vperm.xlu1 %927, %v244_v0   ;;  %357 = vperm.xlu0 %928, %v244_v0   ;;  %v1074_v28 = vmul.f32 %v297_v24, %v1055_v20  ;;  %v1087_v37 = vmul.f32 %v298_v32, %v1061_v25  ;;  %v240_v43 = vmul.f32 %v238_v38, %v1055_v20  ;;  %s233_s30 = scalar_lea.vmem %s1160_s5, %s878_s27  ;;  %s229_s8 = scalar_lea.vmem %s1159_s4, %s878_s27 }
  0x12   : > { %v241_v46 = vmul.f32 %v239_v42, %v1061_v25 }
  0x15   : > { %929 = vset.pattern.permute.xlu1 %v973_v7  ;;  %931 = vset.pattern.permute.xlu0 %v974_v8 }
  0x16   : > { %374 = vperm.xlu1 %929, %v244_v0   ;;  %409 = vperm.xlu0 %931, %v244_v0  }
  0x1a   : > { %930 = vset.pattern.permute.xlu1 %v975_v9  ;;  %934 = vset.pattern.permute.xlu0 %v976_v10 }
  0x1b   : > { %392 = vperm.xlu1 %930, %v244_v0   ;;  %462 = vperm.xlu0 %934, %v244_v0  }
  0x1f   : > { %932 = vset.pattern.permute.xlu1 %v977_v11  ;;  %937 = vset.pattern.permute.xlu0 %v978_v12 }
  0x20   : > { %427 = vperm.xlu1 %932, %v244_v0   ;;  %514 = vperm.xlu0 %937, %v244_v0  }
  0x24   : > { %933 = vset.pattern.permute.xlu1 %v979_v13  ;;  %940 = vset.pattern.permute.xlu0 %v980_v14 }
  0x25   : > { %444 = vperm.xlu1 %933, %v244_v0   ;;  %255 = vperm.xlu0 %940, %v244_v0  }
  0x29   : > { %935 = vset.pattern.permute.xlu1 %v981_v15  ;;  %941 = vset.pattern.permute.xlu0 %v982_v16 }
  0x2a   : > { %479 = vperm.xlu1 %935, %v244_v0   ;;  %549 = vperm.xlu0 %941, %v244_v0  }
  0x2e   : > { %936 = vset.pattern.permute.xlu1 %v983_v17  ;;  %942 = vset.pattern.permute.xlu0 %v984_v18 }
  0x2f   : > { %497 = vperm.xlu1 %936, %v244_v0  }
  0x33   : > { %938 = vset.pattern.permute.xlu1 %v985_v19 }
  0x34   : > { %532 = vperm.xlu1 %938, %v244_v0  }
  0x38   : > { %939 = vset.pattern.permute.xlu1 %v984_v18 }
  0x39   : > { %247 = vperm.xlu1 %939, %v244_v0  }
  0x3d   : > { %943 = vset.pattern.permute.xlu1 %v967_v1 }
  0x86   : > { %v264_v21 = vpop.permute.xlu0 %263  ;;  %v305_v22 = vpop.permute.xlu1 %304 }
  0x87   : > { %v266_v23 = vmul.f32 %v264_v21, %v1055_v20  ;;  %v267_v29 = vmul.f32 %v264_v21, %v1061_v25  ;;  %v307_v35 = vmul.f32 %v305_v22, %v1074_v28  ;;  %v308_v44 = vmul.f32 %v305_v22, %v1087_v37 }
  0x89   : > { %270 = vrot.lane.b32.xlu1 %v266_v23, %s986_s28 }
  0x8b   : > { %v282_v30 = vpop.permute.xlu0 %281  ;;  %v323_v33 = vpop.permute.xlu1 %322 }
  0x8c   : > { %v284_v31 = vmul.f32 %v282_v30, %v1066_v26  ;;  %v285_v34 = vmul.f32 %v282_v30, %v1071_v27  ;;  %v325_v40 = vmul.f32 %v323_v33, %v1084_v36  ;;  %v326_v45 = vmul.f32 %v323_v33, %v1093_v39 }
  0x8d   : > { %272 = vrot.lane.b32.xlu1 %v267_v29, %s986_s28 }
  0x8e   : > { %288 = vrot.lane.b32.xlu0 %v284_v31, %s986_s28 }
  0x90   : > { %v340_v41 = vpop.permute.xlu1 %339  ;;  %v358_v50 = vpop.permute.xlu0 %357 }
  0x91   : > { %290 = vrot.lane.b32.xlu1 %v285_v34, %s986_s28  ;;  %v342_v47 = vmul.f32 %v340_v41, %v240_v43  ;;  %v343_v51 = vmul.f32 %v340_v41, %v241_v46  ;;  %v360_v53 = vmul.f32 %v358_v50, %v242_v48  ;;  %v361_v55 = vmul.f32 %v358_v50, %v243_v52 }
  0x92   : > { %311 = vrot.lane.b32.xlu0 %v307_v35, %s987_s12 }
  0x95   : > { %313 = vrot.lane.b32.xlu1 %v308_v44, %s987_s12  ;;  %v375_v49 = vpop.permute.xlu1 %374  ;;  %v410_v60 = vpop.permute.xlu0 %409 }
  0x96   : > { %329 = vrot.lane.b32.xlu0 %v325_v40, %s987_s12  ;;  %v377_v56 = vmul.f32 %v375_v49, %v1055_v20  ;;  %v378_v58 = vmul.f32 %v375_v49, %v1061_v25  ;;  %v412_v62 = vmul.f32 %v410_v60, %v1074_v28  ;;  %v413_v0 = vmul.f32 %v410_v60, %v1087_v37 }
  0x99   : > { %331 = vrot.lane.b32.xlu1 %v326_v45, %s987_s12 }
  0x9a   : > { %346 = vrot.lane.b32.xlu0 %v342_v47, %s988_s15  ;;  %v393_v54 = vpop.permute.xlu1 %392  ;;  %v463_v4 = vpop.permute.xlu0 %462 }
  0x9b   : > { %v395_v59 = vmul.f32 %v393_v54, %v1066_v26  ;;  %v396_v61 = vmul.f32 %v393_v54, %v1071_v27  ;;  %v465_v14 = vmul.f32 %v463_v4, %v242_v48  ;;  %v466_v18 = vmul.f32 %v463_v4, %v243_v52 }
  0x9d   : > { %348 = vrot.lane.b32.xlu1 %v343_v51, %s988_s15 }
  0x9e   : > { %364 = vrot.lane.b32.xlu0 %v360_v53, %s988_s15 }
  0x9f   : > { %v428_v57 = vpop.permute.xlu1 %427  ;;  %v515_v11 = vpop.permute.xlu0 %514 }
  0xa0   : > { %v430_v1 = vmul.f32 %v428_v57, %v1084_v36  ;;  %v431_v6 = vmul.f32 %v428_v57, %v1093_v39  ;;  %v517_v35 = vmul.f32 %v515_v11, %v1074_v28 }
  0xa1   : > { %366 = vrot.lane.b32.xlu1 %v361_v55, %s988_s15 }
  0xa2   : > { %381 = vrot.lane.b32.xlu0 %v377_v56, %s989_s16 }
  0xa4   : > { %v445_v63 = vpop.permute.xlu1 %444  ;;  %v256_v17 = vpop.permute.xlu0 %255 }
  0xa5   : > { %383 = vrot.lane.b32.xlu1 %v378_v58, %s989_s16  ;;  %v447_v9 = vmul.f32 %v445_v63, %v240_v43  ;;  %v448_v12 = vmul.f32 %v445_v63, %v241_v46  ;;  %v258_v21 = vmul.f32 %v256_v17, %v242_v48  ;;  %v259_v22 = vmul.f32 %v256_v17, %v243_v52 }
  0xa6   : > { %399 = vrot.lane.b32.xlu0 %v395_v59, %s989_s16 }
  0xa9   : > { %401 = vrot.lane.b32.xlu1 %v396_v61, %s989_s16  ;;  %v480_v3 = vpop.permute.xlu1 %479 }
  0xaa   : > { %416 = vrot.lane.b32.xlu0 %v412_v62, %s990_s17  ;;  %v482_v19 = vmul.f32 %v480_v3, %v1055_v20  ;;  %v483_v24 = vmul.f32 %v480_v3, %v1061_v25  ;;  %v608_v25 = vld [vmem:[%s1158_s3] sm:$0xff] }
  0xad   : > { %418 = vrot.lane.b32.xlu1 %v413_v0, %s990_s17 }
  0xae   : > { %434 = vrot.lane.b32.xlu0 %v430_v1, %s990_s17  ;;  %v498_v10 = vpop.permute.xlu1 %497 }
  0xaf   : > { %v500_v31 = vmul.f32 %v498_v10, %v1066_v26  ;;  %v501_v34 = vmul.f32 %v498_v10, %v1071_v27  ;;  %v518_v26 = vmul.f32 %v515_v11, %v1087_v37  ;;  %v614_v27 = vlaneseq }
  0xb1   : > { %436 = vrot.lane.b32.xlu1 %v431_v6, %s990_s17  ;;  %v749_v28 = vand.u32 127, %v614_v27 }
  0xb2   : > { %451 = vrot.lane.b32.xlu0 %v447_v9, %s991_s20 }
  0xb3   : > { %v533_v16 = vpop.permute.xlu1 %532  ;;  %vm750_vm0 = vcmp.lt.s32.totalorder %v749_v28, 64 }
  0xb4   : > { %v535_v20 = vmul.f32 %v533_v16, %v1084_v36  ;;  %v536_v38 = vmul.f32 %v533_v16, %v1093_v39 }
  0xb5   : > { %453 = vrot.lane.b32.xlu1 %v448_v12, %s991_s20 }
  0xb6   : > { %469 = vrot.lane.b32.xlu0 %v465_v14, %s991_s20 }
  0xb8   : > { %v248_v23 = vpop.permute.xlu1 %247 }
  0xb9   : > { %471 = vrot.lane.b32.xlu1 %v466_v18, %s991_s20  ;;  %v250_v29 = vmul.f32 %v248_v23, %v240_v43  ;;  %v251_v30 = vmul.f32 %v248_v23, %v241_v46 }
  0xba   : > { %486 = vrot.lane.b32.xlu0 %v482_v19, %s992_s21 }
  0xbb   : > { %v1116_v32 = vadd.f32 %v258_v21, %v250_v29  ;;  %v261_v33 = vadd.f32 %v259_v22, %v251_v30 }
  0xbd   : > { %488 = vrot.lane.b32.xlu1 %v483_v24, %s992_s21 }
  0xbe   : > { %504 = vrot.lane.b32.xlu0 %v500_v31, %s992_s21 }
  0xc1   : > { %506 = vrot.lane.b32.xlu1 %v501_v34, %s992_s21 }
  0xc2   : > { %539 = vrot.lane.b32.xlu0 %v535_v20, %s993_s22 }
  0xc5   : > { %521 = vrot.lane.b32.xlu1 %v517_v35, %s993_s22 }
  0xc6   : > { %611 = vperm.xlu0 %942, %v608_v25  }
  0xc9   : > { %523 = vrot.lane.b32.xlu1 %v518_v26, %s993_s22 }
  0xca   : > { %945 = vset.pattern.permute.xlu0 %v971_v5  ;;  %v994_v5 = vmov 0.0  }
  0xcb   : > { %659 = vperm.xlu0 %945, %v608_v25  }
  0xcd   : > { %541 = vrot.lane.b32.xlu1 %v536_v38, %s993_s22 }
  0xcf   : > { %948 = vset.pattern.permute.xlu0 %v979_v13  ;;  %v880_v13 = vsel %vm750_vm0, 1.0, %v994_v5 }
  0xd0   : > { %707 = vperm.xlu0 %948, %v608_v25  }
  0xd1   : > { %627 = vperm.xlu1 %943, %v608_v25  }
  0xd4   : > { %950 = vset.pattern.permute.xlu0 %v981_v15 }
  0xd5   : > { %944 = vset.pattern.permute.xlu1 %v968_v2  ;;  %v1135_v2 = vpop.permute.xlu0 %549 }
  0xd6   : > { %643 = vperm.xlu1 %944, %v608_v25  }
  0xda   : > { %946 = vset.pattern.permute.xlu1 %v973_v7 }
  0xdb   : > { %675 = vperm.xlu1 %946, %v608_v25  }
  0xdf   : > { %947 = vset.pattern.permute.xlu1 %v974_v8 }
  0xe0   : > { %691 = vperm.xlu1 %947, %v608_v25  }
  0xe4   : > { %949 = vset.pattern.permute.xlu1 %v981_v15 }
  0xe5   : > { %723 = vperm.xlu1 %949, %v608_v25  }
  0xe9   : > { %754 = vrot.lane.b32.xlu1 %v880_v13, %s995_s25 }
  0xfb   : > { %v271_v36 = vpop.permute.xlu1 %270 }
  0xff   : > { %v273_v7 = vpop.permute.xlu1 %272 }
 0x100   : > { %v289_v37 = vpop.permute.xlu0 %288  ;;  %v275_v52 = vsel %vm274_vm1, %v271_v36, %v273_v7  ;;  %v279_v54 = vadd.f32 %v273_v7, %v261_v33 }
 0x101   : > { %v278_v56 = vadd.f32 %v275_v52, %v1116_v32 }
 0x103   : > { %v291_v39 = vpop.permute.xlu1 %290 }
 0x104   : > { %v312_v40 = vpop.permute.xlu0 %311  ;;  %v292_v55 = vsel %vm274_vm1, %v289_v37, %v291_v39  ;;  %v296_v58 = vadd.f32 %v291_v39, %v279_v54 }
 0x105   : > { %v295_v60 = vadd.f32 %v292_v55, %v278_v56 }
 0x107   : > { %v314_v8 = vpop.permute.xlu1 %313 }
 0x108   : > { %v330_v41 = vpop.permute.xlu0 %329  ;;  %v316_v59 = vsel %vm315_vm2, %v312_v40, %v314_v8  ;;  %v320_v62 = vadd.f32 %v314_v8, %v296_v58 }
 0x109   : > { %v319_v0 = vadd.f32 %v316_v59, %v295_v60 }
 0x10b   : > { %v332_v42 = vpop.permute.xlu1 %331 }
 0x10c   : > { %v347_v43 = vpop.permute.xlu0 %346  ;;  %v333_v63 = vsel %vm315_vm2, %v330_v41, %v332_v42  ;;  %v337_v3 = vadd.f32 %v332_v42, %v320_v62 }
 0x10d   : > { %v336_v6 = vadd.f32 %v333_v63, %v319_v0 }
 0x10f   : > { %v349_v44 = vpop.permute.xlu1 %348 }
 0x110   : > { %v365_v45 = vpop.permute.xlu0 %364  ;;  %v351_v4 = vsel %vm350_vm3, %v347_v43, %v349_v44  ;;  %v355_v9 = vadd.f32 %v349_v44, %v337_v3 }
 0x111   : > { %v354_v11 = vadd.f32 %v351_v4, %v336_v6 }
 0x113   : > { %v367_v15 = vpop.permute.xlu1 %366 }
 0x114   : > { %v382_v46 = vpop.permute.xlu0 %381  ;;  %v368_v10 = vsel %vm350_vm3, %v365_v45, %v367_v15  ;;  %v372_v16 = vadd.f32 %v367_v15, %v355_v9 }
 0x115   : > { %v371_v18 = vadd.f32 %v368_v10, %v354_v11 }
 0x117   : > { %v384_v47 = vpop.permute.xlu1 %383 }
 0x118   : > { %v400_v48 = vpop.permute.xlu0 %399  ;;  %v386_v17 = vsel %vm385_vm4, %v382_v46, %v384_v47  ;;  %v390_v19 = vadd.f32 %v384_v47, %v372_v16 }
 0x119   : > { %v389_v22 = vadd.f32 %v386_v17, %v371_v18 }
 0x11b   : > { %v402_v49 = vpop.permute.xlu1 %401 }
 0x11c   : > { %v417_v50 = vpop.permute.xlu0 %416  ;;  %v403_v21 = vsel %vm385_vm4, %v400_v48, %v402_v49  ;;  %v407_v24 = vadd.f32 %v402_v49, %v390_v19 }
 0x11d   : > { %v406_v30 = vadd.f32 %v403_v21, %v389_v22 }
 0x11f   : > { %v419_v51 = vpop.permute.xlu1 %418 }
 0x120   : > { %v435_v53 = vpop.permute.xlu0 %434  ;;  %v421_v29 = vsel %vm420_vm5, %v417_v50, %v419_v51  ;;  %v425_v32 = vadd.f32 %v419_v51, %v407_v24 }
 0x121   : > { %v424_v34 = vadd.f32 %v421_v29, %v406_v30 }
 0x123   : > { %v437_v57 = vpop.permute.xlu1 %436 }
 0x124   : > { %v452_v61 = vpop.permute.xlu0 %451  ;;  %v438_v33 = vsel %vm420_vm5, %v435_v53, %v437_v57  ;;  %v442_v35 = vadd.f32 %v437_v57, %v425_v32 }
 0x125   : > { %v441_v26 = vadd.f32 %v438_v33, %v424_v34 }
 0x127   : > { %v454_v1 = vpop.permute.xlu1 %453 }
 0x128   : > { %v470_v12 = vpop.permute.xlu0 %469  ;;  %v456_v25 = vsel %vm455_vm6, %v452_v61, %v454_v1  ;;  %v460_v38 = vadd.f32 %v454_v1, %v442_v35 }
 0x129   : > { %v459_v13 = vadd.f32 %v456_v25, %v441_v26 }
 0x12b   : > { %v472_v14 = vpop.permute.xlu1 %471 }
 0x12c   : > { %v487_v31 = vpop.permute.xlu0 %486  ;;  %v473_v28 = vsel %vm455_vm6, %v470_v12, %v472_v14  ;;  %v477_v37 = vadd.f32 %v472_v14, %v460_v38  ;;  %v615_v38 = vshrl.u32 %v614_v27, 7 }
 0x12d   : > { %v476_v40 = vadd.f32 %v473_v28, %v459_v13 }
 0x12f   : > { %v489_v23 = vpop.permute.xlu1 %488 }
 0x130   : > { %v505_v36 = vpop.permute.xlu0 %504  ;;  %v491_v39 = vsel %vm490_vm7, %v487_v31, %v489_v23  ;;  %v495_v8 = vadd.f32 %v489_v23, %v477_v37 }
 0x131   : > { %v494_v42 = vadd.f32 %v491_v39, %v476_v40 }
 0x133   : > { %v507_v20 = vpop.permute.xlu1 %506 }
 0x134   : > { %v508_v41 = vsel %vm490_vm7, %v505_v36, %v507_v20  ;;  %v512_v44 = vadd.f32 %v507_v20, %v495_v8  ;;  %v540_v46 = vpop.permute.xlu0 %539  ;;  %v996_v36 = vmov -1.0  }
 0x135   : > { %v511_v15 = vadd.f32 %v508_v41, %v494_v42  ;;  %v632_v42 = vsub.s32 1, %v615_v38 }
 0x137   : > { %v522_v7 = vpop.permute.xlu1 %521 }
 0x13b   : > { %v524_v43 = vpop.permute.xlu1 %523 }
 0x13c   : > { %v526_v45 = vsel %vm525_vm8, %v522_v7, %v524_v43  ;;  %v530_v47 = vadd.f32 %v524_v43, %v512_v44  ;;  %v648_v43 = vsub.s32 2, %v615_v38 }
 0x13d   : > { %v529_v48 = vadd.f32 %v526_v45, %v511_v15  ;;  %v680_v15 = vsub.s32 4, %v615_v38 }
 0x13f   : > { %v542_v49 = vpop.permute.xlu1 %541 }
 0x140   : > { %v547_v50 = vadd.f32 %v542_v49, %v530_v47  ;;  %v543_v51 = vsel %vm525_vm8, %v540_v46, %v542_v49  ;;  %v616_v46 = vsub.s32 0, %v615_v38 }
 0x141   : > { %v546_v52 = vadd.f32 %v543_v51, %v529_v48 }
 0x142   : > { %v553_v53 = vadd.f32 %v1135_v2, %v547_v50 }
 0x143   : > { %v552_v54 = vadd.f32 %v1135_v2, %v546_v52  ;;  %v696_v52 = vsub.s32 5, %v615_v38 }
 0x144   : > { %v557_v55 = vmul.f32 0.70710677, %v553_v53  ;;  %v555_v44 = vmul.f32 0.5, %v553_v53 }
 0x145   : > { %v556_v56 = vmul.f32 0.70710677, %v552_v54  ;;  %v554_v47 = vmul.f32 0.5, %v552_v54  ;;  %v612_v49 = vpop.permute.xlu0 %611 }
 0x146   : > { %v563_v57 = vand.u32 2147483647, %v557_v55  ;;  %vm559_vm9 = vcmp.ge.f32.partialorder %v557_v55, 0.0  ;;  %v664_v55 = vsub.s32 3, %v615_v38 }
 0x147   : > { %v562_v58 = vand.u32 2147483647, %v556_v56  ;;  %vm558_vm10 = vcmp.ge.f32.partialorder %v556_v56, 0.0  ;;  %v561_v7 = vsel %vm559_vm9, 1.0, %v996_v36  ;;  %v728_v56 = vsub.s32 7, %v615_v38 }
 0x148   : > { %v565_v59 = vmul.f32 0.3275911, %v563_v57  ;;  %v591_v63 = vsub.f32 0.0, %v563_v57  ;;  %v560_v8 = vsel %vm558_vm10, 1.0, %v996_v36 }
 0x149   : > { %v564_v60 = vmul.f32 0.3275911, %v562_v58  ;;  %v590_v0 = vsub.f32 0.0, %v562_v58 }
 0x14a   : > { %v567_v61 = vadd.f32 1.0, %v565_v59  ;;  %v593_v3 = vmul.f32 %v591_v63, %v563_v57 }
 0x14b   : > { %v566_v62 = vadd.f32 1.0, %v564_v60  ;;  %v592_v9 = vmul.f32 %v590_v0, %v562_v58 }
 0x14c   : > { %951 = vrcp.f32 %v567_v61  ;;  %v596_v2 = vmul.f32 1.442695, %v593_v3  ;;  %v712_v3 = vsub.s32 6, %v615_v38 }
 0x14d   : > { %953 = vrcp.f32 %v566_v62  ;;  %v594_v16 = vmul.f32 1.442695, %v592_v9 }
 0x14e   : > { %955 = vpow2.f32 %v596_v2 }
 0x14f   : > { %957 = vpow2.f32 %v594_v16 }
 0x150   : > { %v628_v33 = vpop.permute.xlu1 %627 }
 0x155   : > { %v644_v39 = vpop.permute.xlu1 %643 }
 0x156   : > { %v952_v1 = vpop.eup %951 }
 0x157   : > { %v954_v4 = vpop.eup %953  ;;  %v573_v6 = vmul.f32 1.0614054, %v952_v1 }
 0x158   : > { %v572_v10 = vmul.f32 1.0614054, %v954_v4  ;;  %v956_v20 = vpop.eup %955 }
 0x159   : > { %v575_v11 = vadd.f32 -1.4531521, %v573_v6  ;;  %v958_v25 = vpop.eup %957 }
 0x15a   : > { %v574_v12 = vadd.f32 -1.4531521, %v572_v10  ;;  %v676_v51 = vpop.permute.xlu1 %675  ;;  %v660_v10 = vpop.permute.xlu0 %659 }
 0x15b   : > { %v577_v14 = vmul.f32 %v952_v1, %v575_v11 }
 0x15c   : > { %v576_v17 = vmul.f32 %v954_v4, %v574_v12 }
 0x15d   : > { %v579_v18 = vadd.f32 1.4214138, %v577_v14 }
 0x15e   : > { %v578_v19 = vadd.f32 1.4214138, %v576_v17 }
 0x15f   : > { %v581_v21 = vmul.f32 %v952_v1, %v579_v18  ;;  %v692_v17 = vpop.permute.xlu1 %691 }
 0x160   : > { %v580_v22 = vmul.f32 %v954_v4, %v578_v19 }
 0x161   : > { %v583_v23 = vadd.f32 -0.28449672, %v581_v21 }
 0x162   : > { %v582_v24 = vadd.f32 -0.28449672, %v580_v22 }
 0x163   : > { %v585_v29 = vmul.f32 %v952_v1, %v583_v23 }
 0x164   : > { %v584_v30 = vmul.f32 %v954_v4, %v582_v24 }
 0x165   : > { %v587_v31 = vadd.f32 0.2548296, %v585_v29 }
 0x166   : > { %v586_v32 = vadd.f32 0.2548296, %v584_v30 }
 0x167   : > { %v589_v34 = vmul.f32 %v952_v1, %v587_v31 }
 0x168   : > { %v588_v35 = vmul.f32 %v954_v4, %v586_v32 }
 0x169   : > { %v599_v26 = vmul.f32 %v956_v20, %v589_v34 }
 0x16a   : > { %v598_v28 = vmul.f32 %v958_v25, %v588_v35  ;;  %v708_v35 = vpop.permute.xlu0 %707 }
 0x16b   : > { %v601_v13 = vsub.f32 1.0, %v599_v26 }
 0x16c   : > { %v600_v37 = vsub.f32 1.0, %v598_v28 }
 0x16d   : > { %v603_v40 = vmul.f32 %v601_v13, %v561_v7  ;;  %v724_v13 = vpop.permute.xlu1 %723 }
 0x16e   : > { %v602_v41 = vmul.f32 %v600_v37, %v560_v8 }
 0x16f   : > { %v605_v45 = vadd.f32 1.0, %v603_v40 }
 0x170   : > { %v604_v48 = vadd.f32 1.0, %v602_v41 }
 0x171   : > { %v607_v27 = vmul.f32 %v605_v45, %v555_v44 }
 0x172   : > { %v606_v50 = vmul.f32 %v604_v48, %v554_v47 }
 0x173   : > { %v637_v57 = vrot.slane %v607_v27, %v632_v42  ;;  %v653_v58 = vrot.slane %v607_v27, %v648_v43  ;;  %v685_v59 = vrot.slane %v607_v27, %v680_v15  ;;  %v621_v60 = vrot.slane %v607_v27, %v616_v46 }
 0x174   : > { %v633_v61 = vrot.slane %v606_v50, %v632_v42  ;;  %v649_v62 = vrot.slane %v606_v50, %v648_v43  ;;  %v681_v63 = vrot.slane %v606_v50, %v680_v15  ;;  %v617_v53 = vrot.slane %v606_v50, %v616_v46  ;;  %v755_v43 = vpop.permute.xlu1 %754 }
 0x175   : > { %v639_v0 = vmul.f32 %v637_v57, %v628_v33  ;;  %v623_v1 = vmul.f32 %v621_v60, %v612_v49  ;;  %v655_v6 = vmul.f32 %v653_v58, %v644_v39  ;;  %v701_v2 = vrot.slane %v607_v27, %v696_v52 }
 0x176   : > { %v638_v54 = vmul.f32 %v633_v61, %v628_v33  ;;  %v654_v4 = vmul.f32 %v649_v62, %v644_v39  ;;  %v622_v9 = vmul.f32 %v617_v53, %v612_v49  ;;  %v697_v12 = vrot.slane %v606_v50, %v696_v52 }
 0x177   : > { %v641_v11 = vadd.f32 %v639_v0, %v623_v1  ;;  %v669_v14 = vrot.slane %v607_v27, %v664_v55  ;;  %v665_v18 = vrot.slane %v606_v50, %v664_v55  ;;  %v733_v19 = vrot.slane %v607_v27, %v728_v56 }
 0x178   : > { %v640_v16 = vadd.f32 %v638_v54, %v622_v9  ;;  %v729_v21 = vrot.slane %v606_v50, %v728_v56  ;;  %v687_v30 = vmul.f32 %v685_v59, %v676_v51  ;;  %v717_v32 = vrot.slane %v607_v27, %v712_v3 }
 0x179   : > { %v657_v22 = vadd.f32 %v655_v6, %v641_v11  ;;  %v671_v23 = vmul.f32 %v669_v14, %v660_v10  ;;  %v670_v29 = vmul.f32 %v665_v18, %v660_v10  ;;  %v713_v33 = vrot.slane %v606_v50, %v712_v3 }
 0x17a   : > { %v656_v24 = vadd.f32 %v654_v4, %v640_v16  ;;  %v686_v34 = vmul.f32 %v681_v63, %v676_v51  ;;  %v703_v25 = vmul.f32 %v701_v2, %v692_v17  ;;  %v702_v38 = vmul.f32 %v697_v12, %v692_v17 }
 0x17b   : > { %v673_v31 = vadd.f32 %v671_v23, %v657_v22  ;;  %v719_v7 = vmul.f32 %v717_v32, %v708_v35  ;;  %v718_v39 = vmul.f32 %v713_v33, %v708_v35  ;;  %v735_v40 = vmul.f32 %v733_v19, %v724_v13 }
 0x17c   : > { %v672_v20 = vadd.f32 %v670_v29, %v656_v24  ;;  %v734_v41 = vmul.f32 %v729_v21, %v724_v13 }
 0x17d   : > { %v689_v26 = vadd.f32 %v687_v30, %v673_v31 }
 0x17e   : > { %v688_v28 = vadd.f32 %v686_v34, %v672_v20 }
 0x17f   : > { %v705_v36 = vadd.f32 %v703_v25, %v689_v26 }
 0x180   : > { %v704_v37 = vadd.f32 %v702_v38, %v688_v28 }
 0x181   : > { %v721_v8 = vadd.f32 %v719_v7, %v705_v36 }
 0x182   : > { %v720_v42 = vadd.f32 %v718_v39, %v704_v37 }
 0x183   : > { %v737_v44 = vadd.f32 %v735_v40, %v721_v8 }
 0x184   : > { %v736_v45 = vadd.f32 %v734_v41, %v720_v42 }
 0x185   : > { %v758_v15 = vmul.f32 %v755_v43, %v737_v44 }
 0x186   : > { %v757_v46 = vmul.f32 %v755_v43, %v736_v45 }
 0x187   : > { %763 = vrot.lane.b32.xlu1 %v758_v15, %s997_s26  ;;  %v772_v47 = vmul.f32 %v758_v15, %v737_v44 }
 0x188   : > { %761 = vrot.lane.b32.xlu0 %v757_v46, %s997_s26  ;;  %v771_v48 = vmul.f32 %v757_v46, %v736_v45 }
 0x18b   : > { %777 = vrot.lane.b32.xlu1 %v772_v47, %s997_s26 }
 0x18c   : > { %775 = vrot.lane.b32.xlu0 %v771_v48, %s997_s26 }
 0x1f9   : > { %v764_v49 = vpop.permute.xlu1 %763 }
 0x1fa   : > { %v762_v27 = vpop.permute.xlu0 %761 }
 0x1fb   : > { %v765_v50 = vsel %vm744_vm11, %v762_v27, %v764_v49 }
 0x1fc   : > { %767 = vadd.xlane.f32.xlu0 %v765_v50 }
 0x1fd   : > { %v778_v51 = vpop.permute.xlu1 %777 }
 0x1fe   : > { %v776_v52 = vpop.permute.xlu0 %775 }
 0x1ff   : > { %v779_v55 = vsel %vm744_vm11, %v776_v52, %v778_v51 }
 0x200   : > { %781 = vadd.xlane.f32.xlu1 %v779_v55 }
 0x211   : > { %742 = vrot.lane.b32.xlu1 %v737_v44, %s997_s26 }
 0x212   : > { %740 = vrot.lane.b32.xlu0 %v736_v45, %s997_s26 }
 0x289   : > { %v768_v56 = vpop.xlane.xlu0 %767 }
 0x28a   : > { %770 = vst.msk [vmem:[%s233_s30] sm:$0xff] %vm769_vm12, %v768_v56 }
 0x28d   : > { %v782_v57 = vpop.xlane.xlu1 %781  ;;  %v741_v58 = vpop.permute.xlu0 %740 }
 0x28e   : > { %784 = vst.msk [vmem:[%s233_s30] sm:$0xff] %vm783_vm13, %v782_v57 }
 0x28f   : > { %786 = vst.msk [vmem:[%s233_s30] sm:$0xff] %vm785_vm14, %v994_v5 }
 0x291   : > { %v743_v59 = vpop.permute.xlu1 %742 }
 0x292   : > { %v745_v60 = vsel %vm744_vm11, %v741_v58, %v743_v59 }
 0x293   : > { %747 = vst [vmem:[%s229_s8] sm:$0xff] %v745_v60 }
 0x294 PF: > { %s16_s18 = sadd.s32 1, %s965_s18  }
 0x295   : > { %p13_p4 = scmp.ge.s32.totalorder %s16_s18, 4  }
 0x297   :  { %15 = sbr.rel (!%p13_p4) target bundleno = 1 (0x1), region = 78 }

// kernel: first_octave_conv.11
= control target key start
LH: loop header
LB: loop body
LE: loop exit
PB: predicated region body
PF: predicated region fallthrough
CT: control target
= control target key end

     0   :  { %s377_s14 = smov 0   ;;  %s379_s15 = smov 0   ;;  %s413_s0 = inlined_call_operand.vmem [shape: f32[2,8,128], index: 0, kind: input, shape index: {}]   ;;  %s414_s1 = inlined_call_operand.vmem [shape: f32[8,2], index: 1, kind: input, shape index: {}]   ;;  %s415_s2 = inlined_call_operand.<no memory space> [shape: f32[1,1], index: 2, kind: input, shape index: {}]   ;;  %s416_s3 = inlined_call_operand.vmem [shape: f32[2,8,128], index: 3, kind: output, shape index: {}]  }
   0x1   :  { %8 = sst [smem:[#allocation2]] %s415_s2  ;;  %s381_s16 = smov 0  }
   0x2 LB: > { %s26_s2 = sadd.s32 1, %s346_s15  ;;  %p295_p0 = scmp.ge.s32.totalorder %s350_s16, 1  ;;  %s350_s16 = sphi %s381_s16, %s14_s16   ;;  %s346_s15 = sphi %s379_s15, %s418_s15   ;;  %s342_s14 = sphi %s377_s14, %s417_s14  }
   0x3   : > { %p28_p1 = scmp.ge.s32.totalorder %s26_s2, 2  ;;  %p156_p2 = scmp.lt.s32.totalorder %s350_s16, 3 }
   0x5   : > { %s420_s2 = smov (%p28_p1, %s26_s2), 0  ;;  %p157_p3 = pnand %p295_p0, %p156_p2 }
   0x6   : > { %v199_v0 = vld [vmem:[%s414_s1] sm:$0xff] (!%p157_p3)  ;;  %v352_v1 = vmov (!%p157_p3), 0   ;;  %v353_v2 = vmov (!%p157_p3), 1   ;;  %p184_p4 = scmp.lt.s32.totalorder (!%p157_p3), %s342_s14, 1  ;;  %s198_s20 = sld [smem:[#allocation2]] (!%p157_p3) }
   0x7   : > { %160 = sbr.rel (%p157_p3) target bundleno = 147 (0x93), region = 32  ;;  %326 = vset.pattern.permute.xlu0 (!%p157_p3), %v352_v1 }
   0x8   : > { %203 = vperm.xlu0 (!%p157_p3), %326, %v199_v0  }
   0xc   : > { %327 = vset.pattern.permute.xlu0 (!%p157_p3), %v353_v2  ;;  %v213_v7 = vstv (!%p157_p3), %s198_s20 }
   0xd   : > { %208 = vperm.xlu0 (!%p157_p3), %327, %v199_v0  }
   0xe   : > { %s422_s14 = smov (!%p184_p4, %s342_s14), 1 }
   0xf   : > { %s296_s19 = sshll.u32 %s422_s14, 3 }
  0x10   : > { %s190_s23 = scalar_lea.vmem %s413_s0, %s296_s19  ;;  %s197_s26 = scalar_lea.vmem %s416_s3, %s296_s19 }
  0x11   : > { %v200_v4 = vld [vmem:[%s190_s23] sm:$0xff] }
  0x87   : > { %v204_v3 = vpop.permute.xlu0 %203 }
  0x88   : > { %v206_v5 = vmul.f32 %v204_v3, %v200_v4 }
  0x8c   : > { %v209_v6 = vpop.permute.xlu0 %208 }
  0x8d   : > { %v211_v8 = vadd.f32 %v209_v6, %v206_v5 }
  0x8f   : > { %vm212_vm0 = vcmp.ge.f32.partialorder %v211_v8, 0.0  ;;  %v214_v9 = vmul.f32 %v213_v7, %v211_v8 }
  0x91   : > { %v215_v10 = vsel %vm212_vm0, %v211_v8, %v214_v9 }
  0x92   : > { %216 = vst [vmem:[%s197_s26] sm:$0xff] %v215_v10 }
  0x93 PF: > { %s14_s16 = sadd.s32 1, %s350_s16   ;;  %s417_s14 = smov %s346_s15 }
  0x94   : > { %p11_p5 = scmp.ge.s32.totalorder %s14_s16, 4   ;;  %s418_s15 = smov %s420_s2 }
  0x96   :  { %13 = sbr.rel (!%p11_p5) target bundleno = 2 (0x2), region = 62 }

// kernel: first_octave_conv.8
= control target key start
LH: loop header
LB: loop body
LE: loop exit
PB: predicated region body
PF: predicated region fallthrough
CT: control target
= control target key end

     0   :  { %s414_s14 = smov 0   ;;  %s416_s15 = smov 0   ;;  %s450_s0 = inlined_call_operand.vmem [shape: f32[2,8,256], index: 0, kind: input, shape index: {}]   ;;  %s451_s1 = inlined_call_operand.vmem [shape: f32[8,2], index: 1, kind: input, shape index: {}]   ;;  %s452_s2 = inlined_call_operand.<no memory space> [shape: f32[1,1], index: 2, kind: input, shape index: {}]   ;;  %s453_s3 = inlined_call_operand.vmem [shape: f32[2,8,256], index: 3, kind: output, shape index: {}]  }
   0x1   :  { %8 = sst [smem:[#allocation2]] %s452_s2  ;;  %s418_s16 = smov 0  }
   0x2 LB: > { %s26_s2 = sadd.s32 1, %s383_s15  ;;  %p328_p0 = scmp.ge.s32.totalorder %s387_s16, 1  ;;  %s387_s16 = sphi %s418_s16, %s14_s16   ;;  %s383_s15 = sphi %s416_s15, %s455_s15   ;;  %s379_s14 = sphi %s414_s14, %s454_s14  }
   0x3   : > { %p28_p1 = scmp.ge.s32.totalorder %s26_s2, 2  ;;  %p159_p2 = scmp.lt.s32.totalorder %s387_s16, 3 }
   0x5   : > { %s457_s2 = smov (%p28_p1, %s26_s2), 0  ;;  %p160_p3 = pnand %p328_p0, %p159_p2 }
   0x6   : > { %v212_v0 = vld [vmem:[%s451_s1] sm:$0xff] (!%p160_p3)  ;;  %v389_v1 = vmov (!%p160_p3), 0   ;;  %v390_v2 = vmov (!%p160_p3), 1   ;;  %p192_p4 = scmp.lt.s32.totalorder (!%p160_p3), %s379_s14, 1  ;;  %s211_s20 = sld [smem:[#allocation2]] (!%p160_p3) }
   0x7   : > { %163 = sbr.rel (%p160_p3) target bundleno = 147 (0x93), region = 32  ;;  %363 = vset.pattern.permute.xlu0 (!%p160_p3), %v389_v1 }
   0x8   : > { %217 = vperm.xlu0 (!%p160_p3), %363, %v212_v0  }
   0xc   : > { %364 = vset.pattern.permute.xlu0 (!%p160_p3), %v390_v2  ;;  %v230_v9 = vstv (!%p160_p3), %s211_s20 }
   0xd   : > { %223 = vperm.xlu0 (!%p160_p3), %364, %v212_v0  }
   0xe   : > { %s459_s14 = smov (!%p192_p4, %s379_s14), 1 }
   0xf   : > { %s335_s19 = sshll.u32 %s459_s14, 4 }
  0x10   : > { %s199_s23 = scalar_lea.vmem %s450_s0, %s335_s19  ;;  %s209_s26 = scalar_lea.vmem %s453_s3, %s335_s19 }
  0x11   : > { %v213_v4 = vld [vmem:[%s199_s23] sm:$0xff]  ;;  %v214_v5 = vld [vmem:[%s199_s23 + $0x8] sm:$0xff] }
  0x87   : > { %v218_v3 = vpop.permute.xlu0 %217 }
  0x88   : > { %v220_v6 = vmul.f32 %v218_v3, %v213_v4  ;;  %v221_v7 = vmul.f32 %v218_v3, %v214_v5 }
  0x8c   : > { %v224_v8 = vpop.permute.xlu0 %223 }
  0x8d   : > { %v226_v10 = vadd.f32 %v224_v8, %v220_v6  ;;  %v227_v11 = vadd.f32 %v224_v8, %v221_v7 }
  0x8f   : > { %vm228_vm0 = vcmp.ge.f32.partialorder %v226_v10, 0.0  ;;  %vm229_vm1 = vcmp.ge.f32.partialorder %v227_v11, 0.0  ;;  %v231_v12 = vmul.f32 %v230_v9, %v226_v10  ;;  %v232_v13 = vmul.f32 %v230_v9, %v227_v11 }
  0x91   : > { %v233_v14 = vsel %vm228_vm0, %v226_v10, %v231_v12  ;;  %v234_v15 = vsel %vm229_vm1, %v227_v11, %v232_v13 }
  0x92   : > { %235 = vst [vmem:[%s209_s26] sm:$0xff] %v233_v14  ;;  %236 = vst [vmem:[%s209_s26 + $0x8] sm:$0xff] %v234_v15 }
  0x93 PF: > { %s14_s16 = sadd.s32 1, %s387_s16   ;;  %s454_s14 = smov %s383_s15 }
  0x94   : > { %p11_p5 = scmp.ge.s32.totalorder %s14_s16, 4   ;;  %s455_s15 = smov %s457_s2 }
  0x96   :  { %13 = sbr.rel (!%p11_p5) target bundleno = 2 (0x2), region = 62 }

// kernel: first_octave_conv.6
= control target key start
LH: loop header
LB: loop body
LE: loop exit
PB: predicated region body
PF: predicated region fallthrough
CT: control target
= control target key end

     0   :  { %s902_s12 = smov 0   ;;  %s1151_s0 = inlined_call_operand.vmem [shape: f32[2,8,384], index: 0, kind: input, shape index: {}]   ;;  %s1152_s1 = inlined_call_operand.vmem [shape: f32[8,384], index: 1, kind: input, shape index: {}]   ;;  %s1153_s2 = inlined_call_operand.vmem [shape: f32[8,9], index: 2, kind: input, shape index: {}]   ;;  %s1154_s3 = inlined_call_operand.vmem [shape: f32[2,8,8], index: 3, kind: output, shape index: {}]  }
   0x1 LB: > { %s797_s13 = sadd.s32 4294967295, %s859_s12   ;;  %p801_p0 = scmp.ge.s32.totalorder %s859_s12, 1  ;;  %s859_s12 = sphi %s902_s12, %s13_s12  }
   0x2   : > { %p137_p1 = scmp.lt.s32.totalorder %s859_s12, 3 }
   0x4   : > { %p138_p2 = pnand %p801_p0, %p137_p1 }
   0x5   : > { %v169_v0 = vld [vmem:[%s1153_s2] sm:$0xff] (!%p138_p2)  ;;  %v861_v1 = vmov (!%p138_p2), 1   ;;  %v862_v2 = vmov (!%p138_p2), 3   ;;  %v863_v3 = vmov (!%p138_p2), 2   ;;  %v864_v4 = vmov (!%p138_p2), 4   ;;  %s871_s16 = smov (!%p138_p2), 15  }
   0x6   : > { %141 = sbr.rel (%p138_p2) target bundleno = 618 (0x26a), region = 32  ;;  %838 = vset.pattern.permute.xlu0 (!%p138_p2), %v861_v1  ;;  %840 = vset.pattern.permute.xlu1 (!%p138_p2), %v862_v2  ;;  %v865_v5 = vmov (!%p138_p2), 5   ;;  %v866_v6 = vmov (!%p138_p2), 6   ;;  %v867_v7 = vmov (!%p138_p2), 7   ;;  %v868_v8 = vmov (!%p138_p2), 0   ;;  %p160_p3 = scmp.lt.s32.totalorder (!%p138_p2), %s797_s13, 1 }
   0x7   : > { %230 = vperm.xlu0 (!%p138_p2), %838, %v169_v0   ;;  %374 = vperm.xlu1 (!%p138_p2), %840, %v169_v0   ;;  %v869_v9 = vmov (!%p138_p2), 8   ;;  %v870_v10 = vmov (!%p138_p2), 1.0|1.0   ;;  %v177_v11 = vlaneseq (!%p138_p2)  ;;  %v805_v13 = vld [vmem:[%s1152_s1 + $0x2] ss:$8 sm:$0x7] (!%p138_p2) }
   0x8   : > { %s872_s23 = smov (!%p138_p2), 127   ;;  %v173_v26 = vld [vmem:[%s1152_s1] ss:$8 sm:$0x7] (!%p138_p2)  ;;  %s873_s28 = smov (!%p138_p2), 126   ;;  %vm245_vm0 = vcmask (!%p138_p2), 1039360  }
   0x9   : > { %v178_v12 = vshrl.u32 (!%p138_p2), %v177_v11, 7  ;;  %v804_v31 = vld [vmem:[%s1152_s1 + $0x1] ss:$8 sm:$0x7] (!%p138_p2)  ;;  %v311_v45 = vmul.f32 (!%p138_p2), %v805_v13, %v173_v26  ;;  %s874_s29 = smov (!%p138_p2), 112   ;;  %s875_s30 = smov (!%p138_p2), 111  }
   0xa   : > { %v195_v59 = vmul.f32 (!%p138_p2), %v804_v31, %v173_v26  ;;  %s876_s4 = smov (!%p138_p2), 110   ;;  %s877_s5 = smov (!%p138_p2), 96   ;;  %vm328_vm1 = vcmask (!%p138_p2), 1031168   ;;  %vm389_vm2 = vcmask (!%p138_p2), 916480   ;;  %vm658_vm3 = vcmask (!%p138_p2), 121856  }
   0xb   : > { %839 = vset.pattern.permute.xlu0 (!%p138_p2), %v863_v3  ;;  %841 = vset.pattern.permute.xlu1 (!%p138_p2), %v864_v4  ;;  %v926_v14 = vsub.s32 (!%p138_p2), 1, %v178_v12  ;;  %v928_v15 = vsub.s32 (!%p138_p2), 0, %v178_v12  ;;  %v187_v27 = vsub.s32 (!%p138_p2), 2, %v178_v12  ;;  %s878_s6 = smov (!%p138_p2), 95   ;;  %s879_s7 = smov (!%p138_p2), 94   ;;  %vm434_vm4 = vcmask (!%p138_p2), 908288  }
   0xc   : > { %313 = vperm.xlu0 (!%p138_p2), %839, %v169_v0   ;;  %419 = vperm.xlu1 (!%p138_p2), %841, %v169_v0   ;;  %vm479_vm5 = vcmask (!%p138_p2), 900096   ;;  %vm524_vm6 = vcmask (!%p138_p2), 785408   ;;  %vm569_vm7 = vcmask (!%p138_p2), 777216   ;;  %vm614_vm8 = vcmask (!%p138_p2), 769024   ;;  %s880_s8 = smov (!%p138_p2), 113  }
   0xd   : > { %s1156_s13 = smov (!%p160_p3, %s797_s13), 1  ;;  %v300_v18 = vrot.slane %v805_v13, %v926_v14  ;;  %v296_v19 = vrot.slane %v805_v13, %v928_v15  ;;  %v304_v30 = vrot.slane %v805_v13, %v187_v27  ;;  %v957_v33 = vrot.slane %v173_v26, %v928_v15 }
   0xe   : > { %s808_s17 = smul.u32 24, %s1156_s13  ;;  %v184_v35 = vrot.slane %v804_v31, %v926_v14  ;;  %v967_v38 = vrot.slane %v173_v26, %v187_v27  ;;  %v180_v39 = vrot.slane %v804_v31, %v928_v15  ;;  %v977_v43 = vrot.slane %v173_v26, %v926_v14  ;;  %s803_s9 = sshll.u32 %s1156_s13, 3 }
   0xf   : > { %v188_v49 = vrot.slane %v804_v31, %v187_v27  ;;  %v988_v50 = vrot.slane %v311_v45, %v928_v15  ;;  %v997_v54 = vrot.slane %v311_v45, %v187_v27  ;;  %v1003_v57 = vrot.slane %v311_v45, %v926_v14  ;;  %s168_s14 = scalar_lea.vmem %s1154_s3, %s803_s9 }
  0x10   : > { %842 = vset.pattern.permute.xlu1 %v865_v5  ;;  %843 = vset.pattern.permute.xlu0 %v866_v6  ;;  %s164_s20 = scalar_lea.vmem %s1151_s0, %s808_s17  ;;  %v1011_v62 = vrot.slane %v195_v59, %v928_v15  ;;  %v1016_v1 = vrot.slane %v195_v59, %v187_v27  ;;  %v1021_v4 = vrot.slane %v195_v59, %v926_v14  ;;  %vm690_vm9 = vcmask 924672  }
  0x11   : > { %464 = vperm.xlu1 %842, %v169_v0   ;;  %509 = vperm.xlu0 %843, %v169_v0   ;;  %v930_v16 = vld [vmem:[%s164_s20 + $0x10] sm:$0xff]  ;;  %v932_v17 = vld [vmem:[%s164_s20] sm:$0xff]  ;;  %v938_v23 = vld [vmem:[%s164_s20 + $0x8] sm:$0xff]  ;;  %vm670_vm10 = vcmask 7168   ;;  %vm679_vm11 = vcmask 15368   ;;  %vm698_vm12 = vcmask 23568  }
  0x12   : > { %v941_v24 = vmul.f32 %v300_v18, %v938_v23  ;;  %v946_v25 = vmul.f32 %v296_v19, %v932_v17  ;;  %v964_v36 = vmul.f32 %v304_v30, %v930_v16  ;;  %v973_v40 = vmul.f32 %v184_v35, %v938_v23 }
  0x13   : > { %v982_v46 = vmul.f32 %v180_v39, %v932_v17  ;;  %v994_v52 = vmul.f32 %v188_v49, %v930_v16  ;;  %vm719_vm13 = vcmask 31768   ;;  %vm740_vm14 = vcmask 39968  }
  0x14   : > { %vm742_vm15 = vcmask 64552  }
  0x15   : > { %844 = vset.pattern.permute.xlu1 %v867_v7  ;;  %846 = vset.pattern.permute.xlu0 %v868_v8 }
  0x16   : > { %554 = vperm.xlu1 %844, %v169_v0   ;;  %198 = vperm.xlu0 %846, %v169_v0  }
  0x1a   : > { %845 = vset.pattern.permute.xlu1 %v869_v9  ;;  %852 = vset.pattern.permute.xlu0 %v869_v9 }
  0x1b   : > { %599 = vperm.xlu1 %845, %v169_v0  }
  0x1f   : > { %848 = vrot.lane.b32.xlu1 %v870_v10, %s871_s16 }
  0x86   : > { %v231_v20 = vpop.permute.xlu0 %230  ;;  %v375_v42 = vpop.permute.xlu1 %374 }
  0x87   : > { %v235_v21 = vmul.f32 %v231_v20, %v930_v16  ;;  %v233_v22 = vmul.f32 %v231_v20, %v932_v17  ;;  %v234_v29 = vmul.f32 %v231_v20, %v938_v23  ;;  %v270_v37 = vmul.f32 %v957_v33, %v231_v20 }
  0x88   : > { %v272_v44 = vmul.f32 %v967_v38, %v231_v20  ;;  %v378_v47 = vmul.f32 %v375_v42, %v973_v40  ;;  %v271_v48 = vmul.f32 %v977_v43, %v231_v20  ;;  %v377_v51 = vmul.f32 %v375_v42, %v982_v46 }
  0x89   : > { %243 = vrot.lane.b32.xlu0 %v235_v21, %s872_s23  ;;  %239 = vrot.lane.b32.xlu1 %v233_v22, %s872_s23  ;;  %v379_v55 = vmul.f32 %v375_v42, %v994_v52  ;;  %v398_v0 = vmul.f32 %v375_v42, %v1011_v62  ;;  %v400_v5 = vmul.f32 %v375_v42, %v1016_v1 }
  0x8a   : > { %v399_v7 = vmul.f32 %v375_v42, %v1021_v4 }
  0x8b   : > { %v314_v28 = vpop.permute.xlu0 %313  ;;  %v420_v56 = vpop.permute.xlu1 %419 }
  0x8c   : > { %v317_v32 = vmul.f32 %v314_v28, %v941_v24  ;;  %v316_v34 = vmul.f32 %v314_v28, %v946_v25  ;;  %v318_v41 = vmul.f32 %v314_v28, %v964_v36  ;;  %v353_v53 = vmul.f32 %v988_v50, %v314_v28 }
  0x8d   : > { %241 = vrot.lane.b32.xlu1 %v234_v29, %s872_s23  ;;  %v355_v58 = vmul.f32 %v997_v54, %v314_v28  ;;  %v423_v60 = vmul.f32 %v420_v56, %v938_v23  ;;  %v354_v61 = vmul.f32 %v1003_v57, %v314_v28  ;;  %v422_v63 = vmul.f32 %v420_v56, %v932_v17 }
  0x8e   : > { %324 = vrot.lane.b32.xlu0 %v317_v32, %s873_s28  ;;  %v424_v2 = vmul.f32 %v420_v56, %v930_v16  ;;  %v443_v9 = vmul.f32 %v420_v56, %v957_v33  ;;  %v445_v12 = vmul.f32 %v420_v56, %v967_v38  ;;  %v444_v14 = vmul.f32 %v420_v56, %v977_v43 }
  0x90   : > { %v465_v3 = vpop.permute.xlu1 %464  ;;  %v510_v11 = vpop.permute.xlu0 %509 }
  0x91   : > { %322 = vrot.lane.b32.xlu1 %v316_v34, %s873_s28  ;;  %v468_v6 = vmul.f32 %v465_v3, %v941_v24  ;;  %v467_v8 = vmul.f32 %v465_v3, %v946_v25  ;;  %v469_v10 = vmul.f32 %v465_v3, %v964_v36  ;;  %v513_v13 = vmul.f32 %v510_v11, %v973_v40 }
  0x92   : > { %276 = vrot.lane.b32.xlu0 %v270_v37, %s872_s23  ;;  %v512_v15 = vmul.f32 %v510_v11, %v982_v46  ;;  %v488_v18 = vmul.f32 %v465_v3, %v988_v50  ;;  %v514_v19 = vmul.f32 %v510_v11, %v994_v52  ;;  %v490_v21 = vmul.f32 %v465_v3, %v997_v54 }
  0x93   : > { %v489_v26 = vmul.f32 %v465_v3, %v1003_v57  ;;  %v533_v28 = vmul.f32 %v510_v11, %v1011_v62  ;;  %v535_v31 = vmul.f32 %v510_v11, %v1016_v1  ;;  %v534_v34 = vmul.f32 %v510_v11, %v1021_v4 }
  0x95   : > { %326 = vrot.lane.b32.xlu1 %v318_v41, %s873_s28  ;;  %v555_v20 = vpop.permute.xlu1 %554  ;;  %v199_v45 = vpop.permute.xlu0 %198 }
  0x96   : > { %280 = vrot.lane.b32.xlu0 %v272_v44, %s872_s23  ;;  %v558_v22 = vmul.f32 %v555_v20, %v938_v23  ;;  %v557_v27 = vmul.f32 %v555_v20, %v932_v17  ;;  %v559_v29 = vmul.f32 %v555_v20, %v930_v16  ;;  %v578_v37 = vmul.f32 %v555_v20, %v957_v33 }
  0x97   : > { %v580_v41 = vmul.f32 %v555_v20, %v967_v38  ;;  %v579_v42 = vmul.f32 %v555_v20, %v977_v43  ;;  %v202_v43 = vmul.f32 %v199_v45, %v973_v40  ;;  %v201_v49 = vmul.f32 %v199_v45, %v982_v46 }
  0x98   : > { %v225_v40 = vmul.f32 %v1016_v1, %v199_v45  ;;  %v224_v3 = vmul.f32 %v1021_v4, %v199_v45 }
  0x99   : > { %278 = vrot.lane.b32.xlu1 %v271_v48, %s872_s23 }
  0x9a   : > { %385 = vrot.lane.b32.xlu0 %v378_v47, %s874_s29  ;;  %v600_v30 = vpop.permute.xlu1 %599 }
  0x9b   : > { %v603_v32 = vmul.f32 %v600_v30, %v941_v24  ;;  %v602_v35 = vmul.f32 %v600_v30, %v946_v25  ;;  %v604_v39 = vmul.f32 %v600_v30, %v964_v36  ;;  %v623_v24 = vmul.f32 %v600_v30, %v988_v50 }
  0x9c   : > { %v624_v25 = vmul.f32 %v600_v30, %v1003_v57  ;;  %v625_v44 = vmul.f32 %v600_v30, %v997_v54  ;;  %v203_v36 = vmul.f32 %v199_v45, %v994_v52 }
  0x9d   : > { %383 = vrot.lane.b32.xlu1 %v377_v51, %s874_s29 }
  0x9e   : > { %359 = vrot.lane.b32.xlu0 %v353_v53, %s873_s28  ;;  %v1054_v33 = vpop.permute.xlu1 %848 }
  0xa1   : > { %387 = vrot.lane.b32.xlu1 %v379_v55, %s874_s29 }
  0xa2   : > { %363 = vrot.lane.b32.xlu0 %v355_v58, %s873_s28 }
  0xa5   : > { %361 = vrot.lane.b32.xlu1 %v354_v61, %s873_s28 }
  0xa6   : > { %430 = vrot.lane.b32.xlu0 %v423_v60, %s875_s30 }
  0xa9   : > { %428 = vrot.lane.b32.xlu1 %v422_v63, %s875_s30 }
  0xaa   : > { %404 = vrot.lane.b32.xlu0 %v398_v0, %s874_s29 }
  0xad   : > { %432 = vrot.lane.b32.xlu1 %v424_v2, %s875_s30  ;;  %v223_v2 = vmul.f32 %v1011_v62, %v199_v45 }
  0xae   : > { %408 = vrot.lane.b32.xlu0 %v400_v5, %s874_s29 }
  0xb1   : > { %406 = vrot.lane.b32.xlu1 %v399_v7, %s874_s29 }
  0xb2   : > { %475 = vrot.lane.b32.xlu0 %v468_v6, %s876_s4 }
  0xb5   : > { %473 = vrot.lane.b32.xlu1 %v467_v8, %s876_s4 }
  0xb6   : > { %449 = vrot.lane.b32.xlu0 %v443_v9, %s875_s30 }
  0xb9   : > { %477 = vrot.lane.b32.xlu1 %v469_v10, %s876_s4 }
  0xba   : > { %453 = vrot.lane.b32.xlu0 %v445_v12, %s875_s30 }
  0xbd   : > { %451 = vrot.lane.b32.xlu1 %v444_v14, %s875_s30 }
  0xbe   : > { %520 = vrot.lane.b32.xlu0 %v513_v13, %s877_s5 }
  0xc1   : > { %518 = vrot.lane.b32.xlu1 %v512_v15, %s877_s5 }
  0xc2   : > { %494 = vrot.lane.b32.xlu0 %v488_v18, %s876_s4 }
  0xc5   : > { %522 = vrot.lane.b32.xlu1 %v514_v19, %s877_s5 }
  0xc6   : > { %498 = vrot.lane.b32.xlu0 %v490_v21, %s876_s4 }
  0xc9   : > { %496 = vrot.lane.b32.xlu1 %v489_v26, %s876_s4 }
  0xca   : > { %565 = vrot.lane.b32.xlu0 %v558_v22, %s878_s6 }
  0xcd   : > { %563 = vrot.lane.b32.xlu1 %v557_v27, %s878_s6 }
  0xce   : > { %539 = vrot.lane.b32.xlu0 %v533_v28, %s877_s5 }
  0xd1   : > { %567 = vrot.lane.b32.xlu1 %v559_v29, %s878_s6 }
  0xd2   : > { %543 = vrot.lane.b32.xlu0 %v535_v31, %s877_s5 }
  0xd5   : > { %541 = vrot.lane.b32.xlu1 %v534_v34, %s877_s5 }
  0xd6   : > { %610 = vrot.lane.b32.xlu0 %v603_v32, %s879_s7 }
  0xd9   : > { %608 = vrot.lane.b32.xlu1 %v602_v35, %s879_s7 }
  0xda   : > { %584 = vrot.lane.b32.xlu0 %v578_v37, %s878_s6 }
  0xdd   : > { %612 = vrot.lane.b32.xlu1 %v604_v39, %s879_s7 }
  0xde   : > { %588 = vrot.lane.b32.xlu0 %v580_v41, %s878_s6 }
  0xe1   : > { %586 = vrot.lane.b32.xlu1 %v579_v42, %s878_s6 }
  0xe2   : > { %629 = vrot.lane.b32.xlu0 %v623_v24, %s879_s7  ;;  %v851_v24 = vunpack.i.h.bf16 %v1054_v33 }
  0xe5   : > { %631 = vrot.lane.b32.xlu1 %v624_v25, %s879_s7  ;;  %v850_v25 = vunpack.i.l.bf16 %v1054_v33 }
  0xe6   : > { %633 = vrot.lane.b32.xlu0 %v625_v44, %s879_s7 }
  0xfb   : > { %v244_v38 = vpop.permute.xlu0 %243  ;;  %v240_v47 = vpop.permute.xlu1 %239 }
  0xfc   : > { %v253_v48 = vadd.f32 %v244_v38, %v203_v36 }
  0xff   : > { %v242_v50 = vpop.permute.xlu1 %241 }
 0x100   : > { %v246_v51 = vsel %vm245_vm0, %v240_v47, %v242_v50  ;;  %v247_v53 = vsel %vm245_vm0, %v242_v50, %v244_v38  ;;  %v325_v54 = vpop.permute.xlu0 %324  ;;  %v659_v50 = vsel %vm658_vm3, %v850_v25, %v851_v24 }
 0x101   : > { %v251_v55 = vadd.f32 %v246_v51, %v201_v49  ;;  %v252_v56 = vadd.f32 %v247_v53, %v202_v43 }
 0x103   : > { %v323_v57 = vpop.permute.xlu1 %322 }
 0x104   : > { %v329_v52 = vsel %vm328_vm1, %v323_v57, %v325_v54  ;;  %v277_v58 = vpop.permute.xlu0 %276 }
 0x105   : > { %v334_v59 = vadd.f32 %v329_v52, %v251_v55 }
 0x107   : > { %v327_v60 = vpop.permute.xlu1 %326 }
 0x108   : > { %v330_v61 = vsel %vm328_vm1, %v325_v54, %v327_v60  ;;  %v281_v46 = vpop.permute.xlu0 %280  ;;  %v336_v45 = vadd.f32 %v327_v60, %v253_v48 }
 0x109   : > { %v335_v63 = vadd.f32 %v330_v61, %v252_v56  ;;  %v289_v0 = vadd.f32 %v281_v46, %v225_v40 }
 0x10b   : > { %v279_v5 = vpop.permute.xlu1 %278 }
 0x10c   : > { %v282_v6 = vsel %vm245_vm0, %v277_v58, %v279_v5  ;;  %v283_v7 = vsel %vm245_vm0, %v279_v5, %v281_v46  ;;  %v386_v8 = vpop.permute.xlu0 %385 }
 0x10d   : > { %v287_v9 = vadd.f32 %v282_v6, %v223_v2  ;;  %v1068_v10 = vadd.f32 %v283_v7, %v224_v3 }
 0x10f   : > { %v384_v11 = vpop.permute.xlu1 %383 }
 0x110   : > { %v360_v1 = vpop.permute.xlu0 %359  ;;  %v390_v47 = vsel %vm389_vm2, %v384_v11, %v386_v8 }
 0x111   : > { %v395_v54 = vadd.f32 %v390_v47, %v334_v59 }
 0x113   : > { %v388_v12 = vpop.permute.xlu1 %387 }
 0x114   : > { %v364_v13 = vpop.permute.xlu0 %363  ;;  %v391_v36 = vsel %vm389_vm2, %v386_v8, %v388_v12  ;;  %v397_v43 = vadd.f32 %v388_v12, %v336_v45 }
 0x115   : > { %v396_v51 = vadd.f32 %v391_v36, %v335_v63  ;;  %v372_v58 = vadd.f32 %v364_v13, %v289_v0 }
 0x117   : > { %v362_v14 = vpop.permute.xlu1 %361 }
 0x118   : > { %v431_v15 = vpop.permute.xlu0 %430  ;;  %v365_v55 = vsel %vm328_vm1, %v360_v1, %v362_v14  ;;  %v366_v61 = vsel %vm328_vm1, %v362_v14, %v364_v13 }
 0x119   : > { %v370_v3 = vadd.f32 %v365_v55, %v287_v9  ;;  %v371_v13 = vadd.f32 %v366_v61, %v1068_v10 }
 0x11b   : > { %v429_v18 = vpop.permute.xlu1 %428 }
 0x11c   : > { %v405_v19 = vpop.permute.xlu0 %404  ;;  %v435_v53 = vsel %vm434_vm4, %v429_v18, %v431_v15 }
 0x11d   : > { %v440_v46 = vadd.f32 %v435_v53, %v395_v54 }
 0x11f   : > { %v433_v62 = vpop.permute.xlu1 %432 }
 0x120   : > { %v409_v20 = vpop.permute.xlu0 %408  ;;  %v436_v49 = vsel %vm434_vm4, %v431_v15, %v433_v62  ;;  %v442_v56 = vadd.f32 %v433_v62, %v397_v43 }
 0x121   : > { %v441_v60 = vadd.f32 %v436_v49, %v396_v51  ;;  %v417_v14 = vadd.f32 %v409_v20, %v372_v58 }
 0x123   : > { %v407_v4 = vpop.permute.xlu1 %406 }
 0x124   : > { %v476_v21 = vpop.permute.xlu0 %475  ;;  %v410_v59 = vsel %vm389_vm2, %v405_v19, %v407_v4  ;;  %v411_v8 = vsel %vm389_vm2, %v407_v4, %v409_v20 }
 0x125   : > { %v415_v9 = vadd.f32 %v410_v59, %v370_v3 }
 0x127   : > { %v474_v22 = vpop.permute.xlu1 %473 }
 0x128   : > { %v450_v26 = vpop.permute.xlu0 %449  ;;  %v480_v40 = vsel %vm479_vm5, %v474_v22, %v476_v21  ;;  %v416_v22 = vadd.f32 %v411_v8, %v371_v13 }
 0x129   : > { %v485_v0 = vadd.f32 %v480_v40, %v440_v46 }
 0x12b   : > { %v478_v27 = vpop.permute.xlu1 %477 }
 0x12c   : > { %v1070_v28 = vpop.permute.xlu0 %453  ;;  %v481_v57 = vsel %vm479_vm5, %v476_v21, %v478_v27  ;;  %v487_v63 = vadd.f32 %v478_v27, %v442_v56 }
 0x12d   : > { %v486_v5 = vadd.f32 %v481_v57, %v441_v60 }
 0x12f   : > { %v452_v29 = vpop.permute.xlu1 %451 }
 0x130   : > { %v521_v30 = vpop.permute.xlu0 %520  ;;  %v455_v19 = vsel %vm434_vm4, %v450_v26, %v452_v29  ;;  %v456_v4 = vsel %vm434_vm4, %v452_v29, %v1070_v28  ;;  %v462_v26 = vadd.f32 %v1070_v28, %v417_v14 }
 0x131   : > { %v461_v36 = vadd.f32 %v456_v4, %v416_v22 }
 0x133   : > { %v519_v31 = vpop.permute.xlu1 %518 }
 0x134   : > { %v1072_v32 = vpop.permute.xlu0 %494  ;;  %v525_v6 = vsel %vm524_vm6, %v519_v31, %v521_v30 }
 0x135   : > { %v530_v62 = vadd.f32 %v525_v6, %v485_v0  ;;  %v672_v0 = vmul.f32 %v932_v17, %v932_v17 }
 0x137   : > { %v523_v34 = vpop.permute.xlu1 %522 }
 0x138   : > { %v1074_v35 = vpop.permute.xlu0 %498  ;;  %v526_v2 = vsel %vm524_vm6, %v521_v30, %v523_v34  ;;  %v532_v11 = vadd.f32 %v523_v34, %v487_v63 }
 0x139   : > { %v531_v15 = vadd.f32 %v526_v2, %v486_v5  ;;  %v507_v49 = vadd.f32 %v1074_v35, %v462_v26 }
 0x13b   : > { %v1076_v37 = vpop.permute.xlu1 %496 }
 0x13c   : > { %v566_v39 = vpop.permute.xlu0 %565  ;;  %v500_v10 = vsel %vm479_vm5, %v1072_v32, %v1076_v37  ;;  %v501_v29 = vsel %vm479_vm5, %v1076_v37, %v1074_v35 }
 0x13d   : > { %v506_v55 = vadd.f32 %v501_v29, %v461_v36 }
 0x13f   : > { %v564_v41 = vpop.permute.xlu1 %563 }
 0x140   : > { %v1078_v42 = vpop.permute.xlu0 %539  ;;  %v570_v18 = vsel %vm569_vm7, %v564_v41, %v566_v39 }
 0x141   : > { %v575_v20 = vadd.f32 %v570_v18, %v530_v62 }
 0x143   : > { %v568_v44 = vpop.permute.xlu1 %567 }
 0x144   : > { %v1083_v38 = vpop.permute.xlu0 %543  ;;  %v571_v1 = vsel %vm569_vm7, %v566_v39, %v568_v44  ;;  %v577_v21 = vadd.f32 %v568_v44, %v532_v11  ;;  %v460_v44 = vadd.f32 %v455_v19, %v415_v9  ;;  %v673_v11 = vmul.f32 %v938_v23, %v938_v23 }
 0x145   : > { %v576_v27 = vadd.f32 %v571_v1, %v531_v15  ;;  %v674_v1 = vmul.f32 %v930_v16, %v930_v16 }
 0x146   : > { %v505_v51 = vadd.f32 %v500_v10, %v460_v44 }
 0x147   : > { %v542_v48 = vpop.permute.xlu1 %541 }
 0x148   : > { %v611_v52 = vpop.permute.xlu0 %610  ;;  %v545_v47 = vsel %vm524_vm6, %v1078_v42, %v542_v48  ;;  %v546_v28 = vsel %vm524_vm6, %v542_v48, %v1083_v38  ;;  %v552_v42 = vadd.f32 %v1083_v38, %v507_v49 }
 0x149   : > { %v550_v57 = vadd.f32 %v545_v47, %v505_v51 }
 0x14b   : > { %v609_v7 = vpop.permute.xlu1 %608 }
 0x14c   : > { %v585_v12 = vpop.permute.xlu0 %584  ;;  %v615_v30 = vsel %vm614_vm8, %v609_v7, %v611_v52  ;;  %v666_v7 = vadd.f32 %v938_v23, %v932_v17 }
 0x14d   : > { %v620_v43 = vadd.f32 %v615_v30, %v575_v20 }
 0x14e   : > { %v667_v8 = vadd.f32 %v666_v7, %v930_v16 }
 0x14f   : > { %v613_v31 = vpop.permute.xlu1 %612  ;;  %v663_v35 = vmul.f32 %v850_v25, %v620_v43 }
 0x150   : > { %v616_v34 = vsel %vm614_vm8, %v611_v52, %v613_v31  ;;  %v622_v39 = vadd.f32 %v613_v31, %v577_v21  ;;  %v589_v41 = vpop.permute.xlu0 %588 }
 0x151   : > { %v621_v45 = vadd.f32 %v616_v34, %v576_v27  ;;  %v597_v48 = vadd.f32 %v589_v41, %v552_v42  ;;  %v700_v6 = vmul.f32 %v663_v35, %v620_v43 }
 0x152   : > { %v665_v32 = vmul.f32 %v851_v24, %v622_v39  ;;  %v551_v24 = vadd.f32 %v546_v28, %v506_v55 }
 0x153   : > { %v587_v53 = vpop.permute.xlu1 %586  ;;  %v664_v54 = vmul.f32 %v659_v50, %v621_v45 }
 0x154   : > { %v590_v37 = vsel %vm569_vm7, %v585_v12, %v587_v53  ;;  %v630_v56 = vpop.permute.xlu0 %629  ;;  %688 = vrot.lane.b32.xlu1 %v665_v32, %s880_s8  ;;  %v591_v52 = vsel %vm569_vm7, %v587_v53, %v589_v41  ;;  %v702_v58 = vmul.f32 %v665_v32, %v622_v39  ;;  %v675_v12 = vadd.f32 %v673_v11, %v672_v0 }
 0x155   : > { %686 = vrot.lane.b32.xlu0 %v664_v54, %s880_s8  ;;  %v595_v60 = vadd.f32 %v590_v37, %v550_v57  ;;  %v596_v40 = vadd.f32 %v591_v52, %v551_v24  ;;  %v701_v59 = vmul.f32 %v664_v54, %v621_v45  ;;  %v881_v45 = vmov 0.0  }
 0x156   : > { %v676_v13 = vadd.f32 %v675_v12, %v674_v1 }
 0x157   : > { %v632_v50 = vpop.permute.xlu1 %631 }
 0x158   : > { %v635_v61 = vsel %vm614_vm8, %v630_v56, %v632_v50  ;;  %v634_v46 = vpop.permute.xlu0 %633  ;;  %684 = vrot.lane.b32.xlu1 %v663_v35, %s880_s8 }
 0x159   : > { %v640_v63 = vadd.f32 %v635_v61, %v595_v60  ;;  %v636_v38 = vsel %vm614_vm8, %v632_v50, %v634_v46  ;;  %v642_v2 = vadd.f32 %v634_v46, %v597_v48  ;;  %710 = vrot.lane.b32.xlu0 %v702_v58, %s880_s8 }
 0x15a   : > { %v641_v3 = vadd.f32 %v636_v38, %v596_v40 }
 0x15b   : > { %v723_v5 = vmul.f32 %v665_v32, %v642_v2  ;;  %v721_v33 = vmul.f32 %v663_v35, %v640_v63 }
 0x15c   : > { %708 = vrot.lane.b32.xlu1 %v701_v59, %s880_s8  ;;  %v722_v25 = vmul.f32 %v664_v54, %v641_v3 }
 0x15d   : > { %706 = vrot.lane.b32.xlu0 %v700_v6, %s880_s8 }
 0x160   : > { %727 = vrot.lane.b32.xlu1 %v721_v33, %s880_s8 }
 0x161   : > { %729 = vrot.lane.b32.xlu0 %v722_v25, %s880_s8 }
 0x164   : > { %731 = vrot.lane.b32.xlu1 %v723_v5, %s880_s8 }
 0x180   : > { %668 = vadd.xlane.f32.xlu0 %v667_v8 }
 0x188   : > { %677 = vadd.xlane.f32.xlu1 %v676_v13 }
 0x1c6   : > { %v689_v14 = vpop.permute.xlu1 %688 }
 0x1c7   : > { %v687_v15 = vpop.permute.xlu0 %686 }
 0x1c8   : > { %v692_v9 = vsel %vm690_vm9, %v687_v15, %v689_v14 }
 0x1ca   : > { %v685_v18 = vpop.permute.xlu1 %684 }
 0x1cb   : > { %v691_v19 = vsel %vm690_vm9, %v685_v18, %v687_v15  ;;  %v711_v62 = vpop.permute.xlu0 %710 }
 0x1cc   : > { %v695_v17 = vadd.f32 %v692_v9, %v691_v19 }
 0x1ce   : > { %v709_v21 = vpop.permute.xlu1 %708  ;;  %696 = vadd.xlane.f32.xlu0 %v695_v17 }
 0x1cf   : > { %v713_v23 = vsel %vm690_vm9, %v709_v21, %v711_v62  ;;  %v707_v22 = vpop.permute.xlu0 %706 }
 0x1d0   : > { %v712_v16 = vsel %vm690_vm9, %v707_v22, %v709_v21 }
 0x1d1   : > { %v716_v4 = vadd.f32 %v713_v23, %v712_v16 }
 0x1d2   : > { %v728_v27 = vpop.permute.xlu1 %727 }
 0x1d3   : > { %717 = vadd.xlane.f32.xlu0 %v716_v4  ;;  %v730_v30 = vpop.permute.xlu0 %729 }
 0x1d4   : > { %v733_v10 = vsel %vm690_vm9, %v728_v27, %v730_v30 }
 0x1d6   : > { %v732_v31 = vpop.permute.xlu1 %731 }
 0x1d7   : > { %v734_v20 = vsel %vm690_vm9, %v730_v30, %v732_v31 }
 0x1d8   : > { %v737_v34 = vadd.f32 %v734_v20, %v733_v10 }
 0x1da   : > { %738 = vadd.xlane.f32.xlu1 %v737_v34 }
 0x20d   : > { %v669_v39 = vpop.xlane.xlu0 %668 }
 0x20e   : > { %671 = vst.msk [vmem:[%s168_s14] sm:$0xff] %vm670_vm10, %v669_v39 }
 0x215   : > { %v678_v41 = vpop.xlane.xlu1 %677 }
 0x216   : > { %680 = vst.msk [vmem:[%s168_s14] sm:$0xff] %vm679_vm11, %v678_v41 }
 0x25b   : > { %v697_v26 = vpop.xlane.xlu0 %696 }
 0x25c   : > { %699 = vst.msk [vmem:[%s168_s14] sm:$0xff] %vm698_vm12, %v697_v26 }
 0x260   : > { %v718_v44 = vpop.xlane.xlu0 %717 }
 0x261   : > { %720 = vst.msk [vmem:[%s168_s14] sm:$0xff] %vm719_vm13, %v718_v44 }
 0x267   : > { %v739_v29 = vpop.xlane.xlu1 %738 }
 0x268   : > { %741 = vst.msk [vmem:[%s168_s14] sm:$0xff] %vm740_vm14, %v739_v29 }
 0x269   : > { %743 = vst.msk [vmem:[%s168_s14] sm:$0xff] %vm742_vm15, %v881_v45 }
 0x26a PF: > { %s13_s12 = sadd.s32 1, %s859_s12  }
 0x26b   : > { %p10_p4 = scmp.ge.s32.totalorder %s13_s12, 4  }
 0x26d   :  { %12 = sbr.rel (!%p10_p4) target bundleno = 1 (0x1), region = 64 }

// kernel: first_octave_conv.7
= control target key start
LH: loop header
LB: loop body
LE: loop exit
PB: predicated region body
PF: predicated region fallthrough
CT: control target
= control target key end

     0   :  { %s1348_s18 = smov 0   ;;  %s1693_s0 = inlined_call_operand.vmem [shape: f32[2,8,384], index: 0, kind: input, shape index: {}]   ;;  %s1694_s1 = inlined_call_operand.vmem [shape: f32[8,384], index: 1, kind: input, shape index: {}]   ;;  %s1695_s2 = inlined_call_operand.vmem [shape: f32[8,19], index: 2, kind: input, shape index: {}]   ;;  %s1696_s3 = inlined_call_operand.vmem [shape: f32[8,8], index: 3, kind: input, shape index: {}]   ;;  %s1697_s4 = inlined_call_operand.vmem [shape: f32[2,8,256], index: 4, kind: output, shape index: {0}]   ;;  %s1698_s5 = inlined_call_operand.vmem [shape: f32[2,8,8], index: 5, kind: output, shape index: {1}]  }
   0x1 LB: > { %s1178_s19 = sadd.s32 4294967295, %s1284_s18   ;;  %p1182_p0 = scmp.ge.s32.totalorder %s1284_s18, 1  ;;  %s1284_s18 = sphi %s1348_s18, %s16_s18  }
   0x2   : > { %p190_p1 = scmp.lt.s32.totalorder %s1284_s18, 3 }
   0x4   : > { %p191_p2 = pnand %p1182_p0, %p190_p1 }
   0x5   : > { %v1359_v0 = vld [vmem:[%s1695_s2] sm:$0xff] (!%p191_p2)  ;;  %v1286_v1 = vmov (!%p191_p2), 1   ;;  %v1287_v2 = vmov (!%p191_p2), 2   ;;  %v1288_v3 = vmov (!%p191_p2), 10   ;;  %v1289_v4 = vmov (!%p191_p2), 11   ;;  %p222_p3 = scmp.lt.s32.totalorder (!%p191_p2), %s1178_s19, 1 }
   0x6   : > { %194 = sbr.rel (%p191_p2) target bundleno = 701 (0x2bd), region = 36  ;;  %1233 = vset.pattern.permute.xlu0 (!%p191_p2), %v1286_v1  ;;  %1235 = vset.pattern.permute.xlu1 (!%p191_p2), %v1287_v2  ;;  %v1290_v5 = vmov (!%p191_p2), 3   ;;  %v1291_v6 = vmov (!%p191_p2), 12   ;;  %v1292_v7 = vmov (!%p191_p2), 4   ;;  %v1293_v8 = vmov (!%p191_p2), 5   ;;  %s1305_s30 = smov (!%p191_p2), 127  }
   0x7   : > { %301 = vperm.xlu0 (!%p191_p2), %1233, %v1359_v0   ;;  %388 = vperm.xlu1 (!%p191_p2), %1235, %v1359_v0   ;;  %v1294_v9 = vmov (!%p191_p2), 13   ;;  %v1295_v10 = vmov (!%p191_p2), 15   ;;  %v1296_v11 = vmov (!%p191_p2), 14   ;;  %v1297_v12 = vmov (!%p191_p2), 8   ;;  %s1306_s8 = smov (!%p191_p2), 126   ;;  %s1307_s9 = smov (!%p191_p2), 112  }
   0x8   : > { %v1298_v13 = vmov (!%p191_p2), 6   ;;  %v1299_v14 = vmov (!%p191_p2), 9   ;;  %v1300_v15 = vmov (!%p191_p2), 7   ;;  %v1301_v16 = vmov (!%p191_p2), 16   ;;  %s1308_s10 = smov (!%p191_p2), 111   ;;  %s1309_s11 = smov (!%p191_p2), 110  }
   0x9   : > { %v1302_v17 = vmov (!%p191_p2), 17   ;;  %v1303_v18 = vmov (!%p191_p2), 0   ;;  %v1304_v19 = vmov (!%p191_p2), 18   ;;  %v243_v20 = vlaneseq (!%p191_p2)  ;;  %v1188_v22 = vld [vmem:[%s1694_s1 + $0x2] ss:$8 sm:$0x7] (!%p191_p2) }
   0xa   : > { %v239_v27 = vld [vmem:[%s1694_s1] ss:$8 sm:$0x7] (!%p191_p2)  ;;  %v1187_v47 = vld [vmem:[%s1694_s1 + $0x1] ss:$8 sm:$0x7] (!%p191_p2) }
   0xb   : > { %1234 = vset.pattern.permute.xlu0 (!%p191_p2), %v1288_v3  ;;  %1236 = vset.pattern.permute.xlu1 (!%p191_p2), %v1289_v4  ;;  %v1393_v21 = vshrl.u32 (!%p191_p2), %v243_v20, 7  ;;  %v386_v43 = vmul.f32 (!%p191_p2), %v1188_v22, %v239_v27  ;;  %v261_v62 = vmul.f32 (!%p191_p2), %v1187_v47, %v239_v27  ;;  %s1310_s12 = smov (!%p191_p2), 96   ;;  %s1311_s13 = smov (!%p191_p2), 95   ;;  %vm316_vm0 = vcmask (!%p191_p2), 1039360  }
   0xc   : > { %326 = vperm.xlu0 (!%p191_p2), %1234, %v1359_v0   ;;  %413 = vperm.xlu1 (!%p191_p2), %1236, %v1359_v0   ;;  %s1312_s14 = smov (!%p191_p2), 94   ;;  %s1314_s17 = smov (!%p191_p2), 15   ;;  %vm403_vm1 = vcmask (!%p191_p2), 1031168   ;;  %vm468_vm2 = vcmask (!%p191_p2), 916480   ;;  %vm517_vm3 = vcmask (!%p191_p2), 908288   ;;  %vm566_vm4 = vcmask (!%p191_p2), 900096  }
   0xd   : > { %s1700_s19 = smov (!%p222_p3, %s1178_s19), 1  ;;  %v1406_v25 = vsub.s32 0, %v1393_v21  ;;  %v1409_v26 = vsub.s32 1, %v1393_v21  ;;  %v1423_v34 = vsub.s32 2, %v1393_v21  ;;  %vm615_vm5 = vcmask 785408   ;;  %s1316_s20 = smov 113  }
   0xe   : > { %s1192_s22 = smul.u32 24, %s1700_s19  ;;  %vm664_vm6 = vcmask 777216   ;;  %vm713_vm7 = vcmask 769024   ;;  %vm1043_vm11 = vcmask 121856   ;;  %vm1021_vm12 = vcmask 924672   ;;  %s1186_s21 = sshll.u32 %s1700_s19, 3 }
   0xf   : > { %v371_v29 = vrot.slane %v1188_v22, %v1406_v25  ;;  %v1420_v33 = vrot.slane %v239_v27, %v1409_v26  ;;  %v1430_v38 = vrot.slane %v239_v27, %v1406_v25  ;;  %v379_v41 = vrot.slane %v1188_v22, %v1423_v34  ;;  %s235_s24 = scalar_lea.vmem %s1698_s5, %s1186_s21 }
  0x10   : > { %1237 = vset.pattern.permute.xlu1 %v1290_v5  ;;  %1238 = vset.pattern.permute.xlu0 %v1291_v6  ;;  %s226_s25 = scalar_lea.vmem %s1693_s0, %s1192_s22  ;;  %v1436_v44 = vrot.slane %v239_v27, %v1423_v34  ;;  %v375_v46 = vrot.slane %v1188_v22, %v1409_v26  ;;  %v1448_v50 = vrot.slane %v386_v43, %v1409_v26  ;;  %vm1067_vm13 = vcmask 7168  }
  0x11   : > { %453 = vperm.xlu1 %1237, %v1359_v0   ;;  %478 = vperm.xlu0 %1238, %v1359_v0   ;;  %v1401_v23 = vld [vmem:[%s226_s25] sm:$0xff]  ;;  %v1403_v24 = vld [vmem:[%s226_s25 + $0x10] sm:$0xff]  ;;  %v1417_v32 = vld [vmem:[%s226_s25 + $0x8] sm:$0xff]  ;;  %v246_v51 = vrot.slane %v1187_v47, %v1406_v25  ;;  %v1463_v59 = vrot.slane %v386_v43, %v1406_v25  ;;  %v254_v60 = vrot.slane %v1187_v47, %v1423_v34  ;;  %vm1088_vm14 = vcmask 15368   ;;  %s1191_s25 = sshll.u32 %s1700_s19, 4 }
  0x12   : > { %v1426_v35 = vmul.f32 %v371_v29, %v1401_v23  ;;  %v1444_v48 = vmul.f32 %v379_v41, %v1403_v24  ;;  %v1453_v53 = vmul.f32 %v375_v46, %v1417_v32  ;;  %v250_v4 = vrot.slane %v1187_v47, %v1409_v26  ;;  %s231_s28 = scalar_lea.vmem %s1697_s4, %s1191_s25 }
  0x13   : > { %v1459_v57 = vmul.f32 %v246_v51, %v1401_v23  ;;  %v1475_v6 = vmul.f32 %v254_v60, %v1403_v24  ;;  %v282_v22 = vrot.slane %v261_v62, %v1406_v25  ;;  %vm1090_vm15 = vcmask 64528  }
  0x15   : > { %1239 = vset.pattern.permute.xlu1 %v1292_v7  ;;  %1241 = vset.pattern.permute.xlu0 %v1293_v8 }
  0x16   : > { %502 = vperm.xlu1 %1239, %v1359_v0   ;;  %551 = vperm.xlu0 %1241, %v1359_v0  }
  0x1a   : > { %1240 = vset.pattern.permute.xlu1 %v1294_v9  ;;  %1244 = vset.pattern.permute.xlu0 %v1295_v10  ;;  %v1479_v9 = vrot.slane %v261_v62, %v1409_v26 }
  0x1b   : > { %527 = vperm.xlu1 %1240, %v1359_v0   ;;  %625 = vperm.xlu0 %1244, %v1359_v0  }
  0x1f   : > { %1242 = vset.pattern.permute.xlu1 %v1296_v11  ;;  %1247 = vset.pattern.permute.xlu0 %v1297_v12  ;;  %v1483_v12 = vmul.f32 %v250_v4, %v1417_v32 }
  0x20   : > { %576 = vperm.xlu1 %1242, %v1359_v0   ;;  %698 = vperm.xlu0 %1247, %v1359_v0  }
  0x24   : > { %1243 = vset.pattern.permute.xlu1 %v1298_v13  ;;  %1250 = vset.pattern.permute.xlu0 %v1299_v14 }
  0x25   : > { %600 = vperm.xlu1 %1243, %v1359_v0   ;;  %275 = vperm.xlu0 %1250, %v1359_v0  }
  0x29   : > { %1245 = vset.pattern.permute.xlu1 %v1300_v15  ;;  %1251 = vset.pattern.permute.xlu0 %v1304_v19 }
  0x2a   : > { %649 = vperm.xlu1 %1245, %v1359_v0  }
  0x2e   : > { %1246 = vset.pattern.permute.xlu1 %v1301_v16 }
  0x2f   : > { %674 = vperm.xlu1 %1246, %v1359_v0  }
  0x33   : > { %1248 = vset.pattern.permute.xlu1 %v1302_v17 }
  0x34   : > { %723 = vperm.xlu1 %1248, %v1359_v0  }
  0x38   : > { %1249 = vset.pattern.permute.xlu1 %v1303_v18 }
  0x39   : > { %265 = vperm.xlu1 %1249, %v1359_v0  }
  0x3d   : > { %1253 = vset.pattern.permute.xlu1 %v1286_v1  ;;  %v1470_v1 = vrot.slane %v386_v43, %v1423_v34 }
  0x86   : > { %v302_v28 = vpop.permute.xlu0 %301  ;;  %v389_v39 = vpop.permute.xlu1 %388 }
  0x87   : > { %v304_v30 = vmul.f32 %v302_v28, %v1401_v23  ;;  %v306_v31 = vmul.f32 %v302_v28, %v1403_v24  ;;  %v305_v36 = vmul.f32 %v302_v28, %v1417_v32  ;;  %v391_v42 = vmul.f32 %v389_v39, %v1426_v35 }
  0x88   : > { %v393_v54 = vmul.f32 %v389_v39, %v1444_v48  ;;  %v392_v58 = vmul.f32 %v389_v39, %v1453_v53  ;;  %v290_v28 = vrot.slane %v261_v62, %v1423_v34 }
  0x89   : > { %314 = vrot.lane.b32.xlu0 %v306_v31, %s1305_s30  ;;  %310 = vrot.lane.b32.xlu1 %v304_v30, %s1305_s30 }
  0x8b   : > { %v327_v37 = vpop.permute.xlu0 %326  ;;  %v414_v49 = vpop.permute.xlu1 %413 }
  0x8c   : > { %v346_v40 = vmul.f32 %v1420_v33, %v327_v37  ;;  %v345_v45 = vmul.f32 %v1430_v38, %v327_v37  ;;  %v347_v52 = vmul.f32 %v1436_v44, %v327_v37  ;;  %v433_v55 = vmul.f32 %v1448_v50, %v414_v49 }
  0x8d   : > { %312 = vrot.lane.b32.xlu1 %v305_v36, %s1305_s30  ;;  %v432_v3 = vmul.f32 %v1463_v59, %v414_v49  ;;  %v434_v11 = vmul.f32 %v1470_v1, %v414_v49 }
  0x8e   : > { %353 = vrot.lane.b32.xlu0 %v346_v40, %s1305_s30 }
  0x90   : > { %v454_v56 = vpop.permute.xlu1 %453  ;;  %v479_v14 = vpop.permute.xlu0 %478 }
  0x91   : > { %351 = vrot.lane.b32.xlu1 %v345_v45, %s1305_s30  ;;  %v456_v61 = vmul.f32 %v454_v56, %v1459_v57  ;;  %v458_v16 = vmul.f32 %v454_v56, %v1475_v6  ;;  %v482_v17 = vmul.f32 %v479_v14, %v1479_v9  ;;  %v457_v20 = vmul.f32 %v454_v56, %v1483_v12 }
  0x92   : > { %397 = vrot.lane.b32.xlu0 %v391_v42, %s1306_s8  ;;  %v481_v29 = vmul.f32 %v479_v14, %v282_v22  ;;  %v483_v36 = vmul.f32 %v479_v14, %v290_v28 }
  0x95   : > { %355 = vrot.lane.b32.xlu1 %v347_v52, %s1305_s30  ;;  %v503_v63 = vpop.permute.xlu1 %502  ;;  %v552_v30 = vpop.permute.xlu0 %551 }
  0x96   : > { %401 = vrot.lane.b32.xlu0 %v393_v54, %s1306_s8  ;;  %v505_v27 = vmul.f32 %v503_v63, %v1401_v23  ;;  %v507_v37 = vmul.f32 %v503_v63, %v1403_v24  ;;  %v506_v42 = vmul.f32 %v503_v63, %v1417_v32  ;;  %v554_v46 = vmul.f32 %v552_v30, %v1426_v35 }
  0x97   : > { %v555_v4 = vmul.f32 %v552_v30, %v1453_v53 }
  0x99   : > { %399 = vrot.lane.b32.xlu1 %v392_v58, %s1306_s8  ;;  %v556_v58 = vmul.f32 %v552_v30, %v1444_v48 }
  0x9a   : > { %440 = vrot.lane.b32.xlu0 %v433_v55, %s1306_s8  ;;  %v528_v10 = vpop.permute.xlu1 %527  ;;  %v626_v39 = vpop.permute.xlu0 %625 }
  0x9b   : > { %v531_v41 = vmul.f32 %v528_v10, %v1420_v33  ;;  %v530_v47 = vmul.f32 %v528_v10, %v1430_v38  ;;  %v532_v52 = vmul.f32 %v528_v10, %v1436_v44 }
  0x9d   : > { %438 = vrot.lane.b32.xlu1 %v432_v3, %s1306_s8 }
  0x9e   : > { %462 = vrot.lane.b32.xlu0 %v456_v61, %s1307_s9 }
  0x9f   : > { %v577_v19 = vpop.permute.xlu1 %576  ;;  %v1495_v45 = vpop.permute.xlu0 %698 }
  0xa0   : > { %v580_v3 = vmul.f32 %v577_v19, %v1448_v50 }
  0xa1   : > { %442 = vrot.lane.b32.xlu1 %v434_v11, %s1306_s8 }
  0xa2   : > { %466 = vrot.lane.b32.xlu0 %v458_v16, %s1307_s9 }
  0xa4   : > { %v601_v31 = vpop.permute.xlu1 %600  ;;  %v276_v51 = vpop.permute.xlu0 %275 }
  0xa5   : > { %464 = vrot.lane.b32.xlu1 %v457_v20, %s1307_s9  ;;  %v294_v54 = vmul.f32 %v282_v22, %v276_v51  ;;  %v295_v55 = vmul.f32 %v1479_v9, %v276_v51  ;;  %v296_v56 = vmul.f32 %v290_v28, %v276_v51  ;;  %v603_v16 = vmul.f32 %v601_v31, %v1459_v57 }
  0xa6   : > { %489 = vrot.lane.b32.xlu0 %v482_v17, %s1307_s9  ;;  %v579_v17 = vmul.f32 %v577_v19, %v1463_v59  ;;  %v581_v20 = vmul.f32 %v577_v19, %v1470_v1  ;;  %v604_v30 = vmul.f32 %v601_v31, %v1483_v12 }
  0xa9   : > { %487 = vrot.lane.b32.xlu1 %v481_v29, %s1307_s9  ;;  %v650_v40 = vpop.permute.xlu1 %649  ;;  %v629_v29 = vmul.f32 %v626_v39, %v1479_v9 }
  0xaa   : > { %511 = vrot.lane.b32.xlu0 %v505_v27, %s1308_s10  ;;  %v605_v27 = vmul.f32 %v601_v31, %v1475_v6  ;;  %v653_v19 = vmul.f32 %v650_v40, %v1417_v32  ;;  %v1313_v31 = vmov 1.0|1.0  }
  0xad   : > { %491 = vrot.lane.b32.xlu1 %v483_v36, %s1307_s9  ;;  %v652_v36 = vmul.f32 %v650_v40, %v1401_v23  ;;  %v703_v23 = vmul.f32 %v1495_v45, %v1444_v48 }
  0xae   : > { %515 = vrot.lane.b32.xlu0 %v507_v37, %s1308_s10  ;;  %v675_v43 = vpop.permute.xlu1 %674  ;;  %v630_v37 = vmul.f32 %v626_v39, %v290_v28 }
  0xaf   : > { %v677_v9 = vmul.f32 %v675_v43, %v1430_v38 }
  0xb1   : > { %513 = vrot.lane.b32.xlu1 %v506_v42, %s1308_s10 }
  0xb2   : > { %538 = vrot.lane.b32.xlu0 %v531_v41, %s1308_s10  ;;  %v654_v41 = vmul.f32 %v650_v40, %v1403_v24  ;;  %v701_v24 = vmul.f32 %v1495_v45, %v1426_v35  ;;  %v834_v35 = vld [vmem:[%s1696_s3] sm:$0xff] }
  0xb3   : > { %v1499_v49 = vpop.permute.xlu1 %723 }
  0xb4   : > { %v727_v32 = vmul.f32 %v1499_v49, %v1448_v50 }
  0xb5   : > { %536 = vrot.lane.b32.xlu1 %v530_v47, %s1308_s10 }
  0xb6   : > { %560 = vrot.lane.b32.xlu0 %v554_v46, %s1309_s11 }
  0xb8   : > { %v266_v60 = vpop.permute.xlu1 %265 }
  0xb9   : > { %540 = vrot.lane.b32.xlu1 %v532_v52, %s1308_s10  ;;  %v268_v61 = vmul.f32 %v266_v60, %v1459_v57  ;;  %v269_v62 = vmul.f32 %v266_v60, %v1483_v12  ;;  %v270_v63 = vmul.f32 %v266_v60, %v1475_v6  ;;  %v628_v57 = vmul.f32 %v626_v39, %v282_v22 }
  0xba   : > { %564 = vrot.lane.b32.xlu0 %v556_v58, %s1309_s11  ;;  %v678_v6 = vmul.f32 %v675_v43, %v1420_v33  ;;  %v679_v12 = vmul.f32 %v675_v43, %v1436_v44  ;;  %v726_v33 = vmul.f32 %v1499_v49, %v1463_v59 }
  0xbb   : > { %v1509_v10 = vadd.f32 %v296_v56, %v270_v63  ;;  %v1511_v11 = vadd.f32 %v295_v55, %v269_v62  ;;  %v1513_v14 = vadd.f32 %v294_v54, %v268_v61 }
  0xbd   : > { %562 = vrot.lane.b32.xlu1 %v555_v4, %s1309_s11 }
  0xbe   : > { %587 = vrot.lane.b32.xlu0 %v580_v3, %s1309_s11 }
  0xc1   : > { %585 = vrot.lane.b32.xlu1 %v579_v17, %s1309_s11 }
  0xc2   : > { %609 = vrot.lane.b32.xlu0 %v603_v16, %s1310_s12 }
  0xc5   : > { %589 = vrot.lane.b32.xlu1 %v581_v20, %s1309_s11 }
  0xc6   : > { %613 = vrot.lane.b32.xlu0 %v605_v27, %s1310_s12 }
  0xc9   : > { %611 = vrot.lane.b32.xlu1 %v604_v30, %s1310_s12 }
  0xca   : > { %636 = vrot.lane.b32.xlu0 %v629_v29, %s1310_s12 }
  0xcd   : > { %634 = vrot.lane.b32.xlu1 %v628_v57, %s1310_s12 }
  0xce   : > { %658 = vrot.lane.b32.xlu0 %v652_v36, %s1311_s13 }
  0xd1   : > { %638 = vrot.lane.b32.xlu1 %v630_v37, %s1310_s12 }
  0xd2   : > { %662 = vrot.lane.b32.xlu0 %v654_v41, %s1311_s13 }
  0xd5   : > { %660 = vrot.lane.b32.xlu1 %v653_v19, %s1311_s13 }
  0xd6   : > { %685 = vrot.lane.b32.xlu0 %v678_v6, %s1311_s13 }
  0xd9   : > { %683 = vrot.lane.b32.xlu1 %v677_v9, %s1311_s13 }
  0xda   : > { %747 = vperm.xlu0 %1251, %v1359_v0   ;;  %v702_v0 = vmul.f32 %v1495_v45, %v1453_v53 }
  0xdd   : > { %687 = vrot.lane.b32.xlu1 %v679_v12, %s1311_s13 }
  0xde   : > { %711 = vrot.lane.b32.xlu0 %v703_v23, %s1312_s14 }
  0xdf   : > { %1252 = vset.pattern.permute.xlu0 %v1303_v18  ;;  %v728_v18 = vmul.f32 %v1499_v49, %v1470_v1 }
  0xe1   : > { %707 = vrot.lane.b32.xlu1 %v701_v24, %s1312_s14 }
  0xe2   : > { %734 = vrot.lane.b32.xlu0 %v727_v32, %s1312_s14 }
  0xe5   : > { %709 = vrot.lane.b32.xlu1 %v702_v0, %s1312_s14 }
  0xe6   : > { %837 = vperm.xlu0 %1252, %v834_v35  }
  0xe9   : > { %732 = vrot.lane.b32.xlu1 %v726_v33, %s1312_s14 }
  0xea   : > { %1255 = vset.pattern.permute.xlu0 %v1290_v5 }
  0xeb   : > { %903 = vperm.xlu0 %1255, %v834_v35  }
  0xed   : > { %736 = vrot.lane.b32.xlu1 %v728_v18, %s1312_s14 }
  0xef   : > { %1258 = vset.pattern.permute.xlu0 %v1298_v13 }
  0xf0   : > { %969 = vperm.xlu0 %1258, %v834_v35  }
  0xf1   : > { %859 = vperm.xlu1 %1253, %v834_v35  }
  0xf4   : > { %1265 = vset.pattern.permute.xlu0 %v1300_v15 }
  0xf5   : > { %1254 = vset.pattern.permute.xlu1 %v1287_v2 }
  0xf6   : > { %881 = vperm.xlu1 %1254, %v834_v35  }
  0xfa   : > { %1256 = vset.pattern.permute.xlu1 %v1292_v7 }
  0xfb   : > { %v315_v38 = vpop.permute.xlu0 %314  ;;  %v311_v44 = vpop.permute.xlu1 %310  ;;  %925 = vperm.xlu1 %1256, %v834_v35  }
  0xff   : > { %v313_v5 = vpop.permute.xlu1 %312  ;;  %1257 = vset.pattern.permute.xlu1 %v1293_v8 }
 0x100   : > { %v317_v48 = vsel %vm316_vm0, %v311_v44, %v313_v5  ;;  %v318_v13 = vsel %vm316_vm0, %v313_v5, %v315_v38  ;;  %v354_v50 = vpop.permute.xlu0 %353  ;;  %947 = vperm.xlu1 %1257, %v834_v35  }
 0x101   : > { %v322_v53 = vadd.f32 %v317_v48, %v1513_v14  ;;  %v323_v2 = vadd.f32 %v318_v13, %v1511_v11  ;;  %v324_v11 = vadd.f32 %v315_v38, %v1509_v10 }
 0x103   : > { %v352_v59 = vpop.permute.xlu1 %351 }
 0x104   : > { %v357_v7 = vsel %vm316_vm0, %v352_v59, %v354_v50  ;;  %v398_v1 = vpop.permute.xlu0 %397  ;;  %1259 = vset.pattern.permute.xlu1 %v1300_v15 }
 0x105   : > { %v362_v22 = vadd.f32 %v357_v7, %v322_v53  ;;  %991 = vperm.xlu1 %1259, %v834_v35  }
 0x107   : > { %v356_v28 = vpop.permute.xlu1 %355 }
 0x108   : > { %v402_v8 = vpop.permute.xlu0 %401  ;;  %v364_v17 = vadd.f32 %v356_v28, %v324_v11  ;;  %v358_v6 = vsel %vm316_vm0, %v354_v50, %v356_v28 }
 0x109   : > { %1261 = vrot.lane.b32.xlu1 %v1313_v31, %s1314_s17  ;;  %v363_v12 = vadd.f32 %v358_v6, %v323_v2 }
 0x10a   : > { %v411_v27 = vadd.f32 %v402_v8, %v364_v17 }
 0x10b   : > { %v400_v39 = vpop.permute.xlu1 %399 }
 0x10c   : > { %v441_v40 = vpop.permute.xlu0 %440  ;;  %v404_v9 = vsel %vm403_vm1, %v398_v1, %v400_v39  ;;  %v405_v23 = vsel %vm403_vm1, %v400_v39, %v402_v8 }
 0x10d   : > { %v409_v33 = vadd.f32 %v404_v9, %v362_v22  ;;  %v410_v35 = vadd.f32 %v405_v23, %v363_v12 }
 0x10f   : > { %v439_v42 = vpop.permute.xlu1 %438 }
 0x110   : > { %v463_v43 = vpop.permute.xlu0 %462  ;;  %v444_v24 = vsel %vm403_vm1, %v439_v42, %v441_v40 }
 0x111   : > { %v449_v48 = vadd.f32 %v444_v24, %v409_v33 }
 0x113   : > { %v443_v45 = vpop.permute.xlu1 %442 }
 0x114   : > { %v467_v46 = vpop.permute.xlu0 %466  ;;  %v451_v30 = vadd.f32 %v443_v45, %v411_v27  ;;  %v445_v32 = vsel %vm403_vm1, %v441_v40, %v443_v45 }
 0x115   : > { %v450_v13 = vadd.f32 %v445_v32, %v410_v35 }
 0x116   : > { %v476_v57 = vadd.f32 %v467_v46, %v451_v30 }
 0x117   : > { %v465_v47 = vpop.permute.xlu1 %464 }
 0x118   : > { %v490_v49 = vpop.permute.xlu0 %489  ;;  %v469_v38 = vsel %vm468_vm2, %v463_v43, %v465_v47  ;;  %v470_v44 = vsel %vm468_vm2, %v465_v47, %v467_v46 }
 0x119   : > { %v474_v59 = vadd.f32 %v469_v38, %v449_v48  ;;  %v475_v7 = vadd.f32 %v470_v44, %v450_v13 }
 0x11b   : > { %v488_v51 = vpop.permute.xlu1 %487 }
 0x11c   : > { %v512_v52 = vpop.permute.xlu0 %511  ;;  %v493_v53 = vsel %vm468_vm2, %v488_v51, %v490_v49 }
 0x11d   : > { %v498_v8 = vadd.f32 %v493_v53, %v474_v59 }
 0x11f   : > { %v492_v54 = vpop.permute.xlu1 %491 }
 0x120   : > { %v516_v55 = vpop.permute.xlu0 %515  ;;  %v500_v19 = vadd.f32 %v492_v54, %v476_v57  ;;  %v494_v2 = vsel %vm468_vm2, %v490_v49, %v492_v54 }
 0x121   : > { %v499_v31 = vadd.f32 %v494_v2, %v475_v7 }
 0x122   : > { %v525_v0 = vadd.f32 %v516_v55, %v500_v19 }
 0x123   : > { %v514_v15 = vpop.permute.xlu1 %513 }
 0x124   : > { %v539_v56 = vpop.permute.xlu0 %538  ;;  %v518_v1 = vsel %vm517_vm3, %v512_v52, %v514_v15  ;;  %v519_v28 = vsel %vm517_vm3, %v514_v15, %v516_v55 }
 0x125   : > { %v523_v46 = vadd.f32 %v518_v1, %v498_v8  ;;  %v524_v47 = vadd.f32 %v519_v28, %v499_v31 }
 0x127   : > { %v537_v58 = vpop.permute.xlu1 %536 }
 0x128   : > { %v561_v60 = vpop.permute.xlu0 %560  ;;  %v542_v42 = vsel %vm517_vm3, %v537_v58, %v539_v56 }
 0x129   : > { %v547_v51 = vadd.f32 %v542_v42, %v523_v46 }
 0x12b   : > { %v541_v61 = vpop.permute.xlu1 %540 }
 0x12c   : > { %v565_v62 = vpop.permute.xlu0 %564  ;;  %v549_v5 = vadd.f32 %v541_v61, %v525_v0  ;;  %v543_v43 = vsel %vm517_vm3, %v539_v56, %v541_v61 }
 0x12d   : > { %v548_v27 = vadd.f32 %v543_v43, %v524_v47 }
 0x12e   : > { %v574_v22 = vadd.f32 %v565_v62, %v549_v5 }
 0x12f   : > { %v563_v63 = vpop.permute.xlu1 %562 }
 0x130   : > { %v588_v3 = vpop.permute.xlu0 %587  ;;  %v567_v11 = vsel %vm566_vm4, %v561_v60, %v563_v63  ;;  %v568_v17 = vsel %vm566_vm4, %v563_v63, %v565_v62 }
 0x131   : > { %v572_v15 = vadd.f32 %v567_v11, %v547_v51  ;;  %v573_v30 = vadd.f32 %v568_v17, %v548_v27 }
 0x133   : > { %v586_v4 = vpop.permute.xlu1 %585 }
 0x134   : > { %v610_v14 = vpop.permute.xlu0 %609  ;;  %v591_v54 = vsel %vm566_vm4, %v586_v4, %v588_v3 }
 0x135   : > { %v596_v61 = vadd.f32 %v591_v54, %v572_v15 }
 0x137   : > { %v590_v16 = vpop.permute.xlu1 %589 }
 0x138   : > { %v614_v29 = vpop.permute.xlu0 %613  ;;  %v598_v45 = vadd.f32 %v590_v16, %v574_v22  ;;  %v592_v52 = vsel %vm566_vm4, %v588_v3, %v590_v16 }
 0x139   : > { %v597_v19 = vadd.f32 %v592_v52, %v573_v30 }
 0x13a   : > { %v623_v55 = vadd.f32 %v614_v29, %v598_v45 }
 0x13b   : > { %v612_v20 = vpop.permute.xlu1 %611 }
 0x13c   : > { %v637_v37 = vpop.permute.xlu0 %636  ;;  %v616_v6 = vsel %vm615_vm5, %v610_v14, %v612_v20  ;;  %v617_v58 = vsel %vm615_vm5, %v612_v20, %v614_v29 }
 0x13d   : > { %v621_v9 = vadd.f32 %v616_v6, %v596_v61  ;;  %v622_v4 = vadd.f32 %v617_v58, %v597_v19 }
 0x13f   : > { %v635_v36 = vpop.permute.xlu1 %634 }
 0x140   : > { %v659_v18 = vpop.permute.xlu0 %658  ;;  %v640_v62 = vsel %vm615_vm5, %v635_v36, %v637_v37 }
 0x141   : > { %v645_v24 = vadd.f32 %v640_v62, %v621_v9 }
 0x143   : > { %v639_v41 = vpop.permute.xlu1 %638 }
 0x144   : > { %v663_v39 = vpop.permute.xlu0 %662  ;;  %v647_v56 = vadd.f32 %v639_v41, %v623_v55  ;;  %v641_v63 = vsel %vm615_vm5, %v637_v37, %v639_v41 }
 0x145   : > { %v646_v32 = vadd.f32 %v641_v63, %v622_v4 }
 0x146   : > { %v672_v16 = vadd.f32 %v663_v39, %v647_v56 }
 0x147   : > { %v661_v10 = vpop.permute.xlu1 %660 }
 0x148   : > { %v686_v57 = vpop.permute.xlu0 %685  ;;  %v665_v23 = vsel %vm664_vm6, %v659_v18, %v661_v10  ;;  %v666_v12 = vsel %vm664_vm6, %v661_v10, %v663_v39 }
 0x149   : > { %v670_v33 = vadd.f32 %v665_v23, %v645_v24  ;;  %v671_v35 = vadd.f32 %v666_v12, %v646_v32 }
 0x14b   : > { %v684_v50 = vpop.permute.xlu1 %683 }
 0x14c   : > { %v689_v20 = vsel %vm664_vm6, %v684_v50, %v686_v57 }
 0x14d   : > { %v694_v44 = vadd.f32 %v689_v20, %v670_v33 }
 0x14f   : > { %v688_v40 = vpop.permute.xlu1 %687 }
 0x150   : > { %v690_v29 = vsel %vm664_vm6, %v686_v57, %v688_v40  ;;  %v696_v0 = vadd.f32 %v688_v40, %v672_v16 }
 0x151   : > { %v695_v5 = vadd.f32 %v690_v29, %v671_v35 }
 0x153   : > { %v708_v49 = vpop.permute.xlu1 %707 }
 0x157   : > { %v710_v60 = vpop.permute.xlu1 %709 }
 0x158   : > { %v714_v36 = vsel %vm713_vm7, %v708_v49, %v710_v60 }
 0x159   : > { %v748_v3 = vpop.permute.xlu0 %747  ;;  %v719_v10 = vadd.f32 %v714_v36, %v694_v44 }
 0x15b   : > { %v733_v14 = vpop.permute.xlu1 %732 }
 0x15d   : > { %v712_v38 = vpop.permute.xlu0 %711 }
 0x15e   : > { %v715_v37 = vsel %vm713_vm7, %v710_v60, %v712_v38  ;;  %v721_v41 = vadd.f32 %v712_v38, %v696_v0 }
 0x15f   : > { %v737_v48 = vpop.permute.xlu1 %736  ;;  %v720_v13 = vadd.f32 %v715_v37, %v695_v5 }
 0x160   : > { %v745_v18 = vadd.f32 %v737_v48, %v721_v41 }
 0x161   : > { %v735_v53 = vpop.permute.xlu0 %734 }
 0x162   : > { %v1568_v2 = vadd.f32 %v748_v3, %v745_v18  ;;  %v738_v50 = vsel %vm713_vm7, %v733_v14, %v735_v53  ;;  %v739_v59 = vsel %vm713_vm7, %v735_v53, %v737_v48 }
 0x163   : > { %v743_v7 = vadd.f32 %v738_v50, %v719_v10  ;;  %v744_v1 = vadd.f32 %v739_v59, %v720_v13 }
 0x164   : > { %v1573_v28 = vmul.f32 0.70710677, %v1568_v2 }
 0x165   : > { %v1575_v22 = vadd.f32 %v748_v3, %v743_v7  ;;  %v1577_v8 = vadd.f32 %v748_v3, %v744_v1 }
 0x166   : > { %v767_v31 = vand.u32 2147483647, %v1573_v28  ;;  %vm761_vm8 = vcmp.ge.f32.partialorder %v1573_v28, 0.0  ;;  %v755_v28 = vmul.f32 0.5, %v1568_v2 }
 0x167   : > { %v1581_v39 = vmul.f32 0.70710677, %v1575_v22  ;;  %v1584_v42 = vmul.f32 0.70710677, %v1577_v8 }
 0x168   : > { %v770_v40 = vmul.f32 0.3275911, %v767_v31  ;;  %v809_v27 = vsub.f32 0.0, %v767_v31 }
 0x169   : > { %v765_v43 = vand.u32 2147483647, %v1581_v39  ;;  %v766_v46 = vand.u32 2147483647, %v1584_v42  ;;  %vm759_vm9 = vcmp.ge.f32.partialorder %v1581_v39, 0.0  ;;  %vm760_vm10 = vcmp.ge.f32.partialorder %v1584_v42, 0.0 }
 0x16a   : > { %v773_v45 = vadd.f32 1.0, %v770_v40  ;;  %v812_v52 = vmul.f32 %v809_v27, %v767_v31  ;;  %v1315_v40 = vmov -1.0   ;;  %v753_v39 = vmul.f32 0.5, %v1575_v22 }
 0x16b   : > { %v768_v47 = vmul.f32 0.3275911, %v765_v43  ;;  %v769_v11 = vmul.f32 0.3275911, %v766_v46  ;;  %v807_v49 = vsub.f32 0.0, %v765_v43  ;;  %v808_v15 = vsub.f32 0.0, %v766_v46 }
 0x16c   : > { %1266 = vrcp.f32 %v773_v45  ;;  %v817_v56 = vmul.f32 1.442695, %v812_v52 }
 0x16d   : > { %v771_v17 = vadd.f32 1.0, %v768_v47  ;;  %v772_v51 = vadd.f32 1.0, %v769_v11  ;;  %v810_v58 = vmul.f32 %v807_v49, %v765_v43  ;;  %v811_v62 = vmul.f32 %v808_v15, %v766_v46 }
 0x16e   : > { %v764_v43 = vsel %vm761_vm8, 1.0, %v1315_v40  ;;  %v762_v49 = vsel %vm759_vm9, 1.0, %v1315_v40 }
 0x16f   : > { %1268 = vrcp.f32 %v771_v17  ;;  %v813_v3 = vmul.f32 1.442695, %v810_v58  ;;  %v815_v32 = vmul.f32 1.442695, %v811_v62 }
 0x170   : > { %1270 = vrcp.f32 %v772_v51  ;;  %v1588_v30 = vpop.permute.xlu1 %859 }
 0x171   : > { %1272 = vpow2.f32 %v817_v56  ;;  %v930_v56 = vsub.s32 4, %v1393_v21 }
 0x172   : > { %1274 = vpow2.f32 %v813_v3 }
 0x173   : > { %1276 = vpow2.f32 %v815_v32  ;;  %v974_v32 = vsub.s32 6, %v1393_v21 }
 0x175   : > { %v1590_v12 = vpop.permute.xlu1 %881 }
 0x176   : > { %v1267_v54 = vpop.eup %1266 }
 0x177   : > { %v782_v55 = vmul.f32 1.0614054, %v1267_v54 }
 0x179   : > { %v1269_v57 = vpop.eup %1268  ;;  %v785_v6 = vadd.f32 -1.4531521, %v782_v55 }
 0x17a   : > { %v780_v61 = vmul.f32 1.0614054, %v1269_v57  ;;  %v1271_v19 = vpop.eup %1270  ;;  %v1592_v37 = vpop.permute.xlu1 %925 }
 0x17b   : > { %v788_v60 = vmul.f32 %v1267_v54, %v785_v6  ;;  %v781_v63 = vmul.f32 1.0614054, %v1271_v19  ;;  %v1273_v18 = vpop.eup %1272 }
 0x17c   : > { %v783_v9 = vadd.f32 -1.4531521, %v780_v61  ;;  %v1275_v1 = vpop.eup %1274  ;;  %v838_v61 = vpop.permute.xlu0 %837 }
 0x17d   : > { %v791_v4 = vadd.f32 1.4214138, %v788_v60  ;;  %v784_v16 = vadd.f32 -1.4531521, %v781_v63  ;;  %v1277_v47 = vpop.eup %1276  ;;  %v908_v63 = vsub.s32 3, %v1393_v21 }
 0x17e   : > { %v786_v23 = vmul.f32 %v1269_v57, %v783_v9 }
 0x17f   : > { %v794_v24 = vmul.f32 %v1267_v54, %v791_v4  ;;  %v787_v14 = vmul.f32 %v1271_v19, %v784_v16  ;;  %v1595_v7 = vpop.permute.xlu1 %947  ;;  %v952_v16 = vsub.s32 5, %v1393_v21 }
 0x180   : > { %v789_v20 = vadd.f32 1.4214138, %v786_v23 }
 0x181   : > { %v797_v29 = vadd.f32 -0.28449672, %v794_v24  ;;  %v790_v0 = vadd.f32 1.4214138, %v787_v14  ;;  %v1625_v24 = vsub.s32 7, %v1393_v21 }
 0x182   : > { %v792_v33 = vmul.f32 %v1269_v57, %v789_v20 }
 0x183   : > { %v800_v35 = vmul.f32 %v1267_v54, %v797_v29  ;;  %v793_v38 = vmul.f32 %v1271_v19, %v790_v0 }
 0x184   : > { %v795_v36 = vadd.f32 -0.28449672, %v792_v33  ;;  %v1600_v55 = vpop.permute.xlu1 %991 }
 0x185   : > { %v803_v41 = vadd.f32 0.2548296, %v800_v35  ;;  %v796_v44 = vadd.f32 -0.28449672, %v793_v38 }
 0x186   : > { %v798_v5 = vmul.f32 %v1269_v57, %v795_v36 }
 0x187   : > { %v806_v48 = vmul.f32 %v1267_v54, %v803_v41  ;;  %v799_v10 = vmul.f32 %v1271_v19, %v796_v44 }
 0x188   : > { %v801_v13 = vadd.f32 0.2548296, %v798_v5  ;;  %v1614_v9 = vpop.permute.xlu1 %1261 }
 0x189   : > { %v821_v53 = vmul.f32 %v1273_v18, %v806_v48  ;;  %v802_v50 = vadd.f32 0.2548296, %v799_v10  ;;  %v1264_v0 = vunpack.i.h.bf16 %v1614_v9  ;;  %v904_v48 = vpop.permute.xlu0 %903 }
 0x18a   : > { %v804_v59 = vmul.f32 %v1269_v57, %v801_v13  ;;  %v763_v57 = vsel %vm760_vm10, 1.0, %v1315_v40 }
 0x18b   : > { %v824_v31 = vsub.f32 1.0, %v821_v53  ;;  %v805_v45 = vmul.f32 %v1271_v19, %v802_v50  ;;  %v754_v19 = vmul.f32 0.5, %v1577_v8 }
 0x18c   : > { %v819_v46 = vmul.f32 %v1275_v1, %v804_v59 }
 0x18d   : > { %v827_v11 = vmul.f32 %v824_v31, %v764_v43  ;;  %v820_v17 = vmul.f32 %v1277_v47, %v805_v45 }
 0x18e   : > { %v822_v51 = vsub.f32 1.0, %v819_v46 }
 0x18f   : > { %v830_v27 = vadd.f32 1.0, %v827_v11  ;;  %v823_v54 = vsub.f32 1.0, %v820_v17 }
 0x190   : > { %v825_v52 = vmul.f32 %v822_v51, %v762_v49 }
 0x191   : > { %v1602_v15 = vmul.f32 %v830_v27, %v755_v28  ;;  %v826_v6 = vmul.f32 %v823_v54, %v763_v57 }
 0x192   : > { %v828_v58 = vadd.f32 1.0, %v825_v52  ;;  %v970_v52 = vpop.permute.xlu0 %969 }
 0x193   : > { %v873_v42 = vrot.slane %v1602_v15, %v1409_v26  ;;  %v851_v2 = vrot.slane %v1602_v15, %v1406_v25  ;;  %v829_v60 = vadd.f32 1.0, %v826_v6  ;;  %v895_v4 = vrot.slane %v1602_v15, %v1423_v34 }
 0x194   : > { %v1611_v62 = vmul.f32 %v828_v58, %v753_v39  ;;  %v939_v38 = vrot.slane %v1602_v15, %v930_v56  ;;  %v917_v36 = vrot.slane %v1602_v15, %v908_v63  ;;  %v961_v13 = vrot.slane %v1602_v15, %v952_v16 }
 0x195   : > { %v876_v22 = vmul.f32 %v873_v42, %v1588_v30  ;;  %v854_v3 = vmul.f32 %v851_v2, %v838_v61  ;;  %v1620_v23 = vmul.f32 %v829_v60, %v754_v19  ;;  %v898_v41 = vmul.f32 %v895_v4, %v1590_v12 }
 0x196   : > { %v865_v8 = vrot.slane %v1611_v62, %v1409_v26  ;;  %v887_v14 = vrot.slane %v1611_v62, %v1423_v34  ;;  %v843_v20 = vrot.slane %v1611_v62, %v1406_v25  ;;  %v953_v10 = vrot.slane %v1611_v62, %v952_v16 }
 0x197   : > { %v879_v29 = vadd.f32 %v876_v22, %v854_v3  ;;  %v869_v33 = vrot.slane %v1620_v23, %v1409_v26  ;;  %v891_v21 = vrot.slane %v1620_v23, %v1423_v34  ;;  %v847_v44 = vrot.slane %v1620_v23, %v1406_v25 }
 0x198   : > { %v874_v35 = vmul.f32 %v865_v8, %v1588_v30  ;;  %v852_v5 = vmul.f32 %v843_v20, %v838_v61  ;;  %v931_v26 = vrot.slane %v1611_v62, %v930_v56  ;;  %v896_v53 = vmul.f32 %v887_v14, %v1590_v12 }
 0x199   : > { %v875_v18 = vmul.f32 %v869_v33, %v1588_v30  ;;  %v853_v50 = vmul.f32 %v847_v44, %v838_v61  ;;  %v901_v34 = vadd.f32 %v898_v41, %v879_v29  ;;  %v942_v1 = vmul.f32 %v939_v38, %v1592_v37 }
 0x19a   : > { %v877_v59 = vadd.f32 %v874_v35, %v852_v5  ;;  %v913_v31 = vrot.slane %v1620_v23, %v908_v63  ;;  %v909_v25 = vrot.slane %v1611_v62, %v908_v63  ;;  %v920_v40 = vmul.f32 %v917_v36, %v904_v48 }
 0x19b   : > { %v897_v30 = vmul.f32 %v891_v21, %v1590_v12  ;;  %v935_v43 = vrot.slane %v1620_v23, %v930_v56  ;;  %v878_v45 = vadd.f32 %v875_v18, %v853_v50  ;;  %v940_v47 = vmul.f32 %v931_v26, %v1592_v37 }
 0x19c   : > { %v899_v46 = vadd.f32 %v896_v53, %v877_v59  ;;  %v964_v11 = vmul.f32 %v961_v13, %v1595_v7  ;;  %v918_v17 = vmul.f32 %v909_v25, %v904_v48  ;;  %v923_v51 = vadd.f32 %v920_v40, %v901_v34 }
 0x19d   : > { %v957_v28 = vrot.slane %v1620_v23, %v952_v16  ;;  %v962_v27 = vmul.f32 %v953_v10, %v1595_v7  ;;  %v900_v49 = vadd.f32 %v897_v30, %v878_v45  ;;  %v919_v54 = vmul.f32 %v913_v31, %v904_v48 }
 0x19e   : > { %v921_v57 = vadd.f32 %v918_v17, %v899_v46  ;;  %v945_v39 = vadd.f32 %v942_v1, %v923_v51  ;;  %v1005_v12 = vrot.slane %v1602_v15, %v1625_v24  ;;  %v983_v6 = vrot.slane %v1602_v15, %v974_v32 }
 0x19f   : > { %v941_v58 = vmul.f32 %v935_v43, %v1592_v37  ;;  %v922_v42 = vadd.f32 %v919_v54, %v900_v49  ;;  %v979_v56 = vrot.slane %v1620_v23, %v974_v32  ;;  %v975_v2 = vrot.slane %v1611_v62, %v974_v32 }
 0x1a0   : > { %v943_v61 = vadd.f32 %v940_v47, %v921_v57  ;;  %v997_v19 = vrot.slane %v1611_v62, %v1625_v24  ;;  %v967_v60 = vadd.f32 %v964_v11, %v945_v39  ;;  %v986_v63 = vmul.f32 %v983_v6, %v970_v52 }
 0x1a1   : > { %v963_v22 = vmul.f32 %v957_v28, %v1595_v7  ;;  %v944_v4 = vadd.f32 %v941_v58, %v922_v42  ;;  %v1001_v3 = vrot.slane %v1620_v23, %v1625_v24  ;;  %v1263_v15 = vunpack.i.l.bf16 %v1614_v9 }
 0x1a2   : > { %v1008_v37 = vmul.f32 %v1005_v12, %v1600_v55  ;;  %v965_v16 = vadd.f32 %v962_v27, %v943_v61  ;;  %v984_v8 = vmul.f32 %v975_v2, %v970_v52  ;;  %v989_v14 = vadd.f32 %v986_v63, %v967_v60 }
 0x1a3   : > { %v966_v32 = vadd.f32 %v963_v22, %v944_v4  ;;  %v985_v20 = vmul.f32 %v979_v56, %v970_v52  ;;  %v1006_v62 = vmul.f32 %v997_v19, %v1600_v55  ;;  %v1007_v7 = vmul.f32 %v1001_v3, %v1600_v55 }
 0x1a4   : > { %v987_v29 = vadd.f32 %v984_v8, %v965_v16  ;;  %v1011_v33 = vadd.f32 %v1008_v37, %v989_v14  ;;  %v1044_v24 = vsel %vm1043_vm11, %v1263_v15, %v1264_v0  ;;  %v1317_v30 = vmov 0.0  }
 0x1a5   : > { %v988_v35 = vadd.f32 %v985_v20, %v966_v32 }
 0x1a6   : > { %v1009_v38 = vadd.f32 %v1006_v62, %v987_v29  ;;  %v1050_v23 = vmul.f32 %v1264_v0, %v1011_v33 }
 0x1a7   : > { %v1010_v36 = vadd.f32 %v1007_v7, %v988_v35 }
 0x1a8   : > { %v1048_v21 = vmul.f32 %v1263_v15, %v1009_v38  ;;  %1058 = vrot.lane.b32.xlu0 %v1050_v23, %s1316_s20  ;;  %v1071_v55 = vmul.f32 %v1050_v23, %v1011_v33 }
 0x1a9   : > { %v1049_v41 = vmul.f32 %v1044_v24, %v1010_v36 }
 0x1aa   : > { %v1069_v44 = vmul.f32 %v1048_v21, %v1009_v38 }
 0x1ab   : > { %1056 = vrot.lane.b32.xlu1 %v1049_v41, %s1316_s20  ;;  %v1070_v5 = vmul.f32 %v1049_v41, %v1010_v36 }
 0x1ac   : > { %1054 = vrot.lane.b32.xlu0 %v1048_v21, %s1316_s20 }
 0x1af   : > { %1075 = vrot.lane.b32.xlu1 %v1069_v44, %s1316_s20 }
 0x1b0   : > { %1077 = vrot.lane.b32.xlu0 %v1070_v5, %s1316_s20 }
 0x1b3   : > { %1079 = vrot.lane.b32.xlu1 %v1071_v55, %s1316_s20 }
 0x1b4   : > { %1015 = vrot.lane.b32.xlu0 %v1009_v38, %s1316_s20 }
 0x21a   : > { %v1059_v48 = vpop.permute.xlu0 %1058 }
 0x21d   : > { %v1057_v18 = vpop.permute.xlu1 %1056 }
 0x21e   : > { %v1061_v9 = vsel %vm1021_vm12, %v1057_v18, %v1059_v48  ;;  %v1055_v0 = vpop.permute.xlu0 %1054 }
 0x21f   : > { %v1060_v26 = vsel %vm1021_vm12, %v1055_v0, %v1057_v18 }
 0x220   : > { %v1064_v10 = vadd.f32 %v1061_v9, %v1060_v26 }
 0x221   : > { %v1076_v13 = vpop.permute.xlu1 %1075 }
 0x222   : > { %1065 = vadd.xlane.f32.xlu0 %v1064_v10  ;;  %v1078_v53 = vpop.permute.xlu0 %1077 }
 0x223   : > { %v1081_v59 = vsel %vm1021_vm12, %v1076_v13, %v1078_v53 }
 0x225   : > { %v1080_v50 = vpop.permute.xlu1 %1079 }
 0x226   : > { %v1082_v34 = vsel %vm1021_vm12, %v1078_v53, %v1080_v50  ;;  %v1016_v31 = vpop.permute.xlu0 %1015 }
 0x227   : > { %v1085_v1 = vadd.f32 %v1082_v34, %v1081_v59 }
 0x229   : > { %1086 = vadd.xlane.f32.xlu1 %v1085_v1 }
 0x238   : > { %1019 = vrot.lane.b32.xlu0 %v1011_v33, %s1316_s20 }
 0x23a   : > { %1017 = vrot.lane.b32.xlu1 %v1010_v36, %s1316_s20 }
 0x2af   : > { %v1066_v25 = vpop.xlane.xlu0 %1065 }
 0x2b0   : > { %1068 = vst.msk [vmem:[%s235_s24] sm:$0xff] %vm1067_vm13, %v1066_v25 }
 0x2b3   : > { %v1020_v43 = vpop.permute.xlu0 %1019 }
 0x2b6   : > { %v1087_v40 = vpop.xlane.xlu1 %1086 }
 0x2b7   : > { %1089 = vst.msk [vmem:[%s235_s24] sm:$0xff] %vm1088_vm14, %v1087_v40 }
 0x2b8   : > { %1091 = vst.msk [vmem:[%s235_s24] sm:$0xff] %vm1090_vm15, %v1317_v30 }
 0x2ba   : > { %v1018_v45 = vpop.permute.xlu1 %1017 }
 0x2bb   : > { %v1022_v46 = vsel %vm1021_vm12, %v1016_v31, %v1018_v45  ;;  %v1023_v47 = vsel %vm1021_vm12, %v1018_v45, %v1020_v43 }
 0x2bc   : > { %1026 = vst [vmem:[%s231_s28] sm:$0xff] %v1022_v46  ;;  %1027 = vst [vmem:[%s231_s28 + $0x8] sm:$0xff] %v1023_v47 }
 0x2bd PF: > { %s16_s18 = sadd.s32 1, %s1284_s18  }
 0x2be   : > { %p13_p4 = scmp.ge.s32.totalorder %s16_s18, 4  }
 0x2c0   :  { %15 = sbr.rel (!%p13_p4) target bundleno = 1 (0x1), region = 80 }

</bundles_post_ra>
